<compile_context>
chip_gen: v7x
topology: tpu7x:2x2x1
jax: 0.10.0
libtpu: 0.0.40
codegen_flags: <defaults>
</compile_context>

<pallas_src>
import jax
import jax.numpy as jnp
from jax.experimental import pallas as pl
from jax.experimental.pallas import tpu as pltpu

_BN_EPS = 1e-5
_VMEM_LIMIT_BYTES = 32 * 1024 * 1024   # well under v7x's 64 MiB physical VMEM
_MAX_TILE_ROWS = 1024                  # rows per block; lanes carry channels


# ----------------------------------------------------------------------------
# Small helpers
# ----------------------------------------------------------------------------
def _round_up(v, m):
    return (v + m - 1) // m * m


def _row_tiling(m):
    """Rows per block for a (rows, lanes) slab; grid = pl.cdiv(m, tile)."""
    if m <= _MAX_TILE_ROWS:
        return _round_up(m, 8)
    # >= 2 blocks (lets "parallel" shard across the 2 TensorCores on v7x),
    # each block capped at _MAX_TILE_ROWS and >= 512 rows (v5e per-step overhead).
    nblk = max(2, -(-m // _MAX_TILE_ROWS))
    return _round_up(-(-m // nblk), 8)


def _compiler_params():
    return pltpu.CompilerParams(
        dimension_semantics=("parallel",),
        vmem_limit_bytes=_VMEM_LIMIT_BYTES,
    )


# ----------------------------------------------------------------------------
# Pallas kernel bodies
# ----------------------------------------------------------------------------
def _matmul_bias_prelu_kernel(x_ref, w_ref, b_ref, a_ref, o_ref):
    # 1x1 conv (BN scale pre-folded into w) + bias + PReLU on the MXU/VPU.
    y = jnp.dot(x_ref[...], w_ref[...], preferred_element_type=jnp.float32)
    y = y + b_ref[...]
    o_ref[...] = jnp.where(y >= 0.0, y, a_ref[...] * y).astype(o_ref.dtype)


def _matmul_bias_kernel(x_ref, w_ref, b_ref, o_ref):
    # 1x1 conv + bias, no activation (upsample identity path).
    y = jnp.dot(x_ref[...], w_ref[...], preferred_element_type=jnp.float32)
    o_ref[...] = (y + b_ref[...]).astype(o_ref.dtype)


def _bias_prelu_kernel(x_ref, b_ref, a_ref, o_ref):
    y = x_ref[...].astype(jnp.float32) + b_ref[...]
    o_ref[...] = jnp.where(y >= 0.0, y, a_ref[...] * y).astype(o_ref.dtype)


def _tail_kernel(h_ref, id_ref, w3_ref, b2_ref, a2_ref, b3_ref, a3_ref, ao_ref,
                 o_ref):
    # Fused bottleneck tail:
    #   bn2(+bias)+act2 -> 1x1 conv3 (scale-folded) + bias3 + act3
    #   -> residual add -> act_out
    t = h_ref[...].astype(jnp.float32) + b2_ref[...]
    t = jnp.where(t >= 0.0, t, a2_ref[...] * t)
    y = jnp.dot(t, w3_ref[...], preferred_element_type=jnp.float32) + b3_ref[...]
    y = jnp.where(y >= 0.0, y, a3_ref[...] * y)
    y = y + id_ref[...].astype(jnp.float32)
    o_ref[...] = jnp.where(y >= 0.0, y, ao_ref[...] * y).astype(o_ref.dtype)


# ----------------------------------------------------------------------------
# Pallas wrappers (NHWC slabs; reshapes are free, no transposes / pads / slices)
# ----------------------------------------------------------------------------
def _pallas_matmul(kernel, x2d, w, vecs):
    m, k = x2d.shape
    n = w.shape[1]
    tile_m = _row_tiling(m)
    in_specs = [pl.BlockSpec((tile_m, k), lambda i: (i, 0)),
                pl.BlockSpec((k, n), lambda i: (0, 0))]
    in_specs += [pl.BlockSpec((1, n), lambda i: (0, 0))] * len(vecs)
    return pl.pallas_call(
        kernel,
        out_shape=jax.ShapeDtypeStruct((m, n), x2d.dtype),
        grid_spec=pltpu.PrefetchScalarGridSpec(
            num_scalar_prefetch=0,
            grid=(pl.cdiv(m, tile_m),),
            in_specs=in_specs,
            out_specs=pl.BlockSpec((tile_m, n), lambda i: (i, 0)),
        ),
        compiler_params=_compiler_params(),
    )(x2d, w, *(v.reshape(1, n) for v in vecs))


def matmul_bias_prelu(x_nhwc, w, bias, alpha):
    n, h, wd, c = x_nhwc.shape
    out2d = _pallas_matmul(_matmul_bias_prelu_kernel,
                           x_nhwc.reshape(n * h * wd, c), w, (bias, alpha))
    return out2d.reshape(n, h, wd, w.shape[1])


def matmul_bias(x_nhwc, w, bias):
    n, h, wd, c = x_nhwc.shape
    out2d = _pallas_matmul(_matmul_bias_kernel,
                           x_nhwc.reshape(n * h * wd, c), w, (bias,))
    return out2d.reshape(n, h, wd, w.shape[1])


def bias_prelu(x_nhwc, bias, alpha):
    """Per-channel bias + PReLU.  Lane-dense layout whenever C divides 128."""
    shape = x_nhwc.shape
    c = shape[-1]
    total = x_nhwc.size
    if c <= 128 and 128 % c == 0 and total % 128 == 0:
        rep = 128 // c
        x2d = x_nhwc.reshape(total // 128, 128)
        b2 = jnp.tile(bias, rep).reshape(1, 128)
        a2 = jnp.tile(alpha, rep).reshape(1, 128)
    else:
        x2d = x_nhwc.reshape(-1, c)
        b2, a2 = bias.reshape(1, c), alpha.reshape(1, c)
    m, cc = x2d.shape
    tile_m = _row_tiling(m)
    out = pl.pallas_call(
        _bias_prelu_kernel,
        out_shape=jax.ShapeDtypeStruct((m, cc), x_nhwc.dtype),
        grid_spec=pltpu.PrefetchScalarGridSpec(
            num_scalar_prefetch=0,
            grid=(pl.cdiv(m, tile_m),),
            in_specs=[pl.BlockSpec((tile_m, cc), lambda i: (i, 0)),
                      pl.BlockSpec((1, cc), lambda i: (0, 0)),
                      pl.BlockSpec((1, cc), lambda i: (0, 0))],
            out_specs=pl.BlockSpec((tile_m, cc), lambda i: (i, 0)),
        ),
        compiler_params=_compiler_params(),
    )(x2d, b2, a2)
    return out.reshape(shape)


def bottleneck_tail(h_nhwc, id_nhwc, w3, b2, a2, b3, a3, aout):
    n, hh, ww, cin = h_nhwc.shape
    cout = w3.shape[1]
    h2d = h_nhwc.reshape(-1, cin)
    id2d = id_nhwc.reshape(-1, cout)
    m = h2d.shape[0]
    tile_m = _row_tiling(m)
    out2d = pl.pallas_call(
        _tail_kernel,
        out_shape=jax.ShapeDtypeStruct((m, cout), h_nhwc.dtype),
        grid_spec=pltpu.PrefetchScalarGridSpec(
            num_scalar_prefetch=0,
            grid=(pl.cdiv(m, tile_m),),
            in_specs=[
                pl.BlockSpec((tile_m, cin), lambda i: (i, 0)),
                pl.BlockSpec((tile_m, cout), lambda i: (i, 0)),
                pl.BlockSpec((cin, cout), lambda i: (0, 0)),
                pl.BlockSpec((1, cin), lambda i: (0, 0)),
                pl.BlockSpec((1, cin), lambda i: (0, 0)),
                pl.BlockSpec((1, cout), lambda i: (0, 0)),
                pl.BlockSpec((1, cout), lambda i: (0, 0)),
                pl.BlockSpec((1, cout), lambda i: (0, 0)),
            ],
            out_specs=pl.BlockSpec((tile_m, cout), lambda i: (i, 0)),
        ),
        compiler_params=_compiler_params(),
    )(h2d, id2d, w3, b2.reshape(1, cin), a2.reshape(1, cin),
      b3.reshape(1, cout), a3.reshape(1, cout), aout.reshape(1, cout))
    return out2d.reshape(n, hh, ww, cout)


# ----------------------------------------------------------------------------
# Non-Pallas building blocks (spatial convs, pooling) -- all NHWC
# ----------------------------------------------------------------------------
def conv2d(x, w, stride=(1, 1), padding=((0, 0), (0, 0)), dilation=(1, 1)):
    # TODO(synk): spatial (3x3 / dilated / asymmetric / strided-2) convolutions use
    # XLA's conv; a Pallas im2col+MXU kernel is out of scope here.
    return jax.lax.conv_general_dilated(
        x, w, window_strides=stride, padding=padding, rhs_dilation=dilation,
        dimension_numbers=("NHWC", "HWIO", "NHWC"))


def conv_transpose2d_s2(x, w_hwio):
    # PyTorch ConvTranspose2d(k=3, stride=2, padding=1, output_padding=1) ==
    # forward conv with lhs_dilation=2, padding (1,2).  Weights are stored here
    # directly in forward-conv HWIO form (a PyTorch checkpoint would need a
    # spatial flip + (2,3,0,1) transpose).
    return jax.lax.conv_general_dilated(
        x, w_hwio, window_strides=(1, 1), padding=((1, 2), (1, 2)),
        lhs_dilation=(2, 2), dimension_numbers=("NHWC", "HWIO", "NHWC"))


def maxpool2x2(x, ceil_mode=False):
    n, h, w, c = x.shape
    if ceil_mode and (h % 2 or w % 2):
        x = jnp.pad(x, ((0, 0), (0, h % 2), (0, w % 2), (0, 0)),
                    constant_values=-jnp.inf)
        h, w = x.shape[1], x.shape[2]
    return jnp.max(x.reshape(n, h // 2, 2, w // 2, 2, c), axis=(2, 4))


def maxpool2x2_with_indices(x):
    # TODO(synk): pool-with-argmax / unpool are irregular gather/scatter; done with
    # jnp indexing rather than a Pallas kernel.
    n, h, w, c = x.shape
    xr = x.reshape(n, h // 2, 2, w // 2, 2, c)
    xr = jnp.transpose(xr, (0, 1, 3, 2, 4, 5)).reshape(n, h // 2, w // 2, 4, c)
    vals = jnp.max(xr, axis=3)
    arg = jnp.argmax(xr, axis=3)
    di, dj = arg // 2, arg % 2
    ii = jnp.arange(h // 2)[None, :, None, None]
    jj = jnp.arange(w // 2)[None, None, :, None]
    flat_idx = (2 * ii + di) * w + (2 * jj + dj)   # PyTorch-style flat H*W index
    return vals, flat_idx, (h, w)


def max_unpool2x2(x, indices, out_hw):
    n, h, w, c = x.shape
    oh, ow = out_hw
    flat = jnp.zeros((n, oh * ow, c), x.dtype)
    nn = jnp.arange(n)[:, None, None]
    cc = jnp.arange(c)[None, None, :]
    flat = flat.at[nn, indices.reshape(n, h * w, c), cc].set(x.reshape(n, h * w, c))
    return flat.reshape(n, oh, ow, c)


# ----------------------------------------------------------------------------
# Parameters (BatchNorm folded into weights; inference mode)
# ----------------------------------------------------------------------------
def _kaiming(key, shape):
    # HWIO conv: fan_in = kh*kw*I; matmul (I,O): fan_in = I.
    fan_in = shape[0] * shape[1] * shape[2] if len(shape) == 4 else shape[0]
    return jax.random.normal(key, shape, jnp.float32) * (2.0 / fan_in) ** 0.5


def _bn_affine(c):
    # Inference-mode BN with running_mean=0, running_var=1, gamma=1, beta=1e-4
    # (matches initialize_weights + fresh BN statistics).
    gamma = jnp.ones((c,), jnp.float32)
    beta = jnp.full((c,), 1e-4, jnp.float32)
    mean = jnp.zeros((c,), jnp.float32)
    var = jnp.ones((c,), jnp.float32)
    scale = gamma / jnp.sqrt(var + _BN_EPS)
    return scale, beta - mean * scale


def make_bottleneck_params(key, in_ch, out_ch=None, dilation=1, downsample=False,
                           upsample=False, asymetric=False, use_prelu=True):
    if out_ch is None:
        out_ch, pad = in_ch, 0
    else:
        pad = out_ch - in_ch
    inter = in_ch // 4
    ks = iter(jax.random.split(key, 8))
    a = 0.25 if use_prelu else 0.0   # PReLU default slope / ReLU
    s1, b1 = _bn_affine(inter)
    s2, b2 = _bn_affine(inter)
    s3, b3 = _bn_affine(out_ch)
    p = dict(pad=pad, dilation=dilation, downsample=downsample,
             upsample=upsample, asymetric=asymetric)
    if upsample:
        su, bu = _bn_affine(out_ch)
        p["w_sp"] = _kaiming(next(ks), (in_ch, out_ch)) * su[None, :]   # 1x1, bn folded
        p["b_sp"] = bu
    if downsample:
        p["w1"] = _kaiming(next(ks), (2, 2, in_ch, inter)) * s1         # 2x2 s2 conv
    else:
        p["w1"] = _kaiming(next(ks), (in_ch, inter)) * s1[None, :]      # 1x1 matmul
    p["b1"] = b1
    p["a1"] = jnp.full((inter,), a, jnp.float32)
    if asymetric:
        s2a, b2a = _bn_affine(inter)
        # conv biases use 0 here (initialize_weights leaves them at PyTorch default).
        p["w2a"] = _kaiming(next(ks), (1, 5, inter, inter)) * s2a
        p["b2a"] = b2a
        p["a2a"] = jnp.full((inter,), a, jnp.float32)
        p["w2b"] = _kaiming(next(ks), (5, 1, inter, inter)) * s2
    else:
        p["w2"] = _kaiming(next(ks), (3, 3, inter, inter)) * s2         # conv / transpose
    p["b2"] = b2
    p["a2"] = jnp.full((inter,), a, jnp.float32)
    p["w3"] = _kaiming(next(ks), (inter, out_ch)) * s3[None, :]         # 1x1 matmul
    p["b3"] = b3
    p["a3"] = jnp.full((out_ch,), a, jnp.float32)
    p["a_out"] = jnp.full((out_ch,), a, jnp.float32)
    return p


_STAGE_CONFIGS = [
    ("10", dict(in_ch=16, out_ch=64, downsample=True)),
    ("11", dict(in_ch=64)), ("12", dict(in_ch=64)),
    ("13", dict(in_ch=64)), ("14", dict(in_ch=64)),
    ("20", dict(in_ch=64, out_ch=128, downsample=True)),
    ("21", dict(in_ch=128)), ("22", dict(in_ch=128, dilation=2)),
    ("23", dict(in_ch=128, asymetric=True)), ("24", dict(in_ch=128, dilation=4)),
    ("25", dict(in_ch=128)), ("26", dict(in_ch=128, dilation=8)),
    ("27", dict(in_ch=128, asymetric=True)), ("28", dict(in_ch=128, dilation=16)),
    ("31", dict(in_ch=128)), ("32", dict(in_ch=128, dilation=2)),
    ("33", dict(in_ch=128, asymetric=True)), ("34", dict(in_ch=128, dilation=4)),
    ("35", dict(in_ch=128)), ("36", dict(in_ch=128, dilation=8)),
    ("37", dict(in_ch=128, asymetric=True)), ("38", dict(in_ch=128, dilation=16)),
    ("40", dict(in_ch=128, out_ch=64, upsample=True, use_prelu=False)),
    ("41", dict(in_ch=64, use_prelu=False)), ("42", dict(in_ch=64, use_prelu=False)),
    ("50", dict(in_ch=64, out_ch=16, upsample=True, use_prelu=False)),
    ("51", dict(in_ch=16, use_prelu=False)),
]


def init_enet_params(key, num_classes, in_channels=3):
    keys = jax.random.split(key, len(_STAGE_CONFIGS) + 2)
    scale, beta = _bn_affine(16)                   # BN over the 16 concat channels
    conv_out = 16 - in_channels
    w = _kaiming(keys[0], (3, 3, in_channels, conv_out))
    b_conv = jnp.zeros((conv_out,), jnp.float32)
    initial = {
        "w": w * scale[in_channels:],              # fold BN scale into conv weight
        "pool_scale": scale[:in_channels],         # pooled half gets its scale in jnp
        "bias": jnp.concatenate([beta[:in_channels],
                                 b_conv * scale[in_channels:] + beta[in_channels:]]),
        "alpha": jnp.full((16,), 0.25, jnp.float32),
    }
    bottlenecks = {name: make_bottleneck_params(keys[i + 1], **cfg)
                   for i, (name, cfg) in enumerate(_STAGE_CONFIGS)}
    fullconv_w = _kaiming(keys[-1], (3, 3, 16, num_classes))   # transpose conv (HWIO fwd)
    return {"initial": initial, "bottlenecks": bottlenecks, "fullconv_w": fullconv_w}


# ----------------------------------------------------------------------------
# Forward pass (all intermediates NHWC)
# ----------------------------------------------------------------------------
def bottleneck_forward(p, x, indices=None, pool_hw=None):
    identity = x
    pool_idx, pre_hw = None, None
    if p["upsample"]:
        identity = matmul_bias(identity, p["w_sp"], p["b_sp"])    # 1x1 conv + BN
        if identity.shape[1:3] != indices.shape[1:3]:
            dh = indices.shape[1] - identity.shape[1]
            dw = indices.shape[2] - identity.shape[2]
            identity = jnp.pad(identity, ((0, 0), (dh, 0), (dw, 0), (0, 0)))
        identity = max_unpool2x2(identity, indices, pool_hw)
    elif p["downsample"]:
        identity, pool_idx, pre_hw = maxpool2x2_with_indices(identity)
    if p["pad"] > 0:
        zeros = jnp.zeros(identity.shape[:3] + (p["pad"],), identity.dtype)
        identity = jnp.concatenate([identity, zeros], axis=-1)

    # conv1 + bn1 + prelu1
    if p["downsample"]:
        h = conv2d(x, p["w1"], stride=(2, 2))
        h = bias_prelu(h, p["b1"], p["a1"])
    else:
        h = matmul_bias_prelu(x, p["w1"], p["b1"], p["a1"])

    # conv2 (bn2/act2 deferred into the fused tail kernel)
    if p["asymetric"]:
        h = conv2d(h, p["w2a"], padding=((0, 0), (2, 2)))
        h = bias_prelu(h, p["b2a"], p["a2a"])
        h = conv2d(h, p["w2b"], padding=((2, 2), (0, 0)))
    elif p["upsample"]:
        h = conv_transpose2d_s2(h, p["w2"])
    else:
        d = p["dilation"]
        h = conv2d(h, p["w2"], padding=((d, d), (d, d)), dilation=(d, d))

    # TODO(synk): Dropout2d regularizer is a no-op in inference mode.
    if h.shape[1:3] == identity.shape[1:3]:
        # Fused tail: bn2+act2 -> conv3+bn3+act3 -> +identity -> act_out.
        out = bottleneck_tail(h, identity, p["w3"], p["b2"], p["a2"],
                              p["b3"], p["a3"], p["a_out"])
    else:
        # TODO(synk): rare odd-spatial-size fallback (never hit for even input sizes);
        # matches the reference's pad-after-prelu3 semantics, done in plain XLA.
        t = h + p["b2"]
        t = jnp.where(t >= 0.0, t, p["a2"] * t)
        y = jnp.einsum("nhwc,cd->nhwd", t, p["w3"]) + p["b3"]
        y = jnp.where(y >= 0.0, y, p["a3"] * y)
        dh = identity.shape[1] - y.shape[1]
        dw = identity.shape[2] - y.shape[2]
        y = jnp.pad(y, ((0, 0), (dh, 0), (dw, 0), (0, 0))) + identity
        out = jnp.where(y >= 0.0, y, p["a_out"] * y)

    if p["downsample"]:
        return out, pool_idx, pre_hw
    return out


def enet_forward(params, x_nchw):
    x = jnp.transpose(x_nchw, (0, 2, 3, 1))        # single NCHW -> NHWC at the boundary

    ip = params["initial"]
    pooled = maxpool2x2(x, ceil_mode=True) * ip["pool_scale"]
    conved = conv2d(x, ip["w"], stride=(2, 2), padding=((1, 1), (1, 1)))
    x = jnp.concatenate([pooled, conved], axis=-1)
    x = bias_prelu(x, ip["bias"], ip["alpha"])     # folded BN bias + PReLU

    b = params["bottlenecks"]
    x, idx1, hw1 = bottleneck_forward(b["10"], x)
    for name in ("11", "12", "13", "14"):
        x = bottleneck_forward(b[name], x)
    x, idx2, hw2 = bottleneck_forward(b["20"], x)
    for name in ("21", "22", "23", "24", "25", "26", "27", "28",
                 "31", "32", "33", "34", "35", "36", "37", "38"):
        x = bottleneck_forward(b[name], x)
    x = bottleneck_forward(b["40"], x, indices=idx2, pool_hw=hw2)
    for name in ("41", "42"):
        x = bottleneck_forward(b[name], x)
    x = bottleneck_forward(b["50"], x, indices=idx1, pool_hw=hw1)
    x = bottleneck_forward(b["51"], x)
    x = conv_transpose2d_s2(x, params["fullconv_w"])

    return jnp.transpose(x, (0, 3, 1, 2))          # back to NCHW for the caller


if __name__ == "__main__":
    root = jax.random.PRNGKey(0)
    pkey, xkey = jax.random.split(root)
    num_classes = 12
    params = init_enet_params(pkey, num_classes=num_classes, in_channels=3)
    x = jax.random.normal(xkey, (2, 3, 16, 16), dtype=jnp.float32)

    fwd = jax.jit(lambda inp: enet_forward(params, inp))
    y = jax.block_until_ready(fwd(x))

    assert y.shape == (2, num_classes, 16, 16), y.shape
    assert y.dtype == jnp.float32
    assert bool(jnp.all(jnp.isfinite(y)))
    print("KERNEL_OK")
</pallas_src>

<mosaic_0001>
module attributes {stable_mosaic.version = 11 : i64} {
  func.func @_bias_prelu_kernel(%arg0: i32, %arg1: memref<16x128xf32, #tpu.memory_space<vmem>>, %arg2: memref<1x128xf32, #tpu.memory_space<vmem>>, %arg3: memref<1x128xf32, #tpu.memory_space<vmem>>, %arg4: memref<16x128xf32, #tpu.memory_space<vmem>>) attributes {dimension_semantics = [#tpu.dimension_semantics<parallel>], iteration_bounds = array<i64: 1>, scalar_prefetch = 0 : i64, scratch_operands = 0 : i64, tpu.core_type = #tpu.core_type<tc>, window_params = [{transform_indices = @transform_0, window_bounds = array<i64: 16, 128>}, {pipeline_mode = #tpu.pipeline_mode<synchronous>, transform_indices = @transform_1, window_bounds = array<i64: 1, 128>}, {pipeline_mode = #tpu.pipeline_mode<synchronous>, transform_indices = @transform_2, window_bounds = array<i64: 1, 128>}, {transform_indices = @transform_3, window_bounds = array<i64: 16, 128>}]} {
    %c0 = arith.constant 0 : index
    %c0_0 = arith.constant 0 : index
    %0 = vector.load %arg1[%c0, %c0_0] : memref<16x128xf32, #tpu.memory_space<vmem>>, vector<16x128xf32>
    %c0_1 = arith.constant 0 : index
    %c0_2 = arith.constant 0 : index
    %1 = vector.load %arg2[%c0_1, %c0_2] : memref<1x128xf32, #tpu.memory_space<vmem>>, vector<1x128xf32>
    %2 = vector.broadcast %1 : vector<1x128xf32> to vector<16x128xf32>
    %3 = arith.addf %0, %2 : vector<16x128xf32>
    %cst = arith.constant 0.000000e+00 : f32
    %4 = vector.broadcast %cst : f32 to vector<16x128xf32>
    %5 = arith.cmpf oge, %3, %4 : vector<16x128xf32>
    %c0_3 = arith.constant 0 : index
    %c0_4 = arith.constant 0 : index
    %6 = vector.load %arg3[%c0_3, %c0_4] : memref<1x128xf32, #tpu.memory_space<vmem>>, vector<1x128xf32>
    %7 = vector.broadcast %6 : vector<1x128xf32> to vector<16x128xf32>
    %8 = arith.mulf %7, %3 : vector<16x128xf32>
    %9 = arith.select %5, %3, %8 : vector<16x128xi1>, vector<16x128xf32>
    %c0_5 = arith.constant 0 : index
    %c0_6 = arith.constant 0 : index
    %10 = vector.load %arg4[%c0_5, %c0_6] : memref<16x128xf32, #tpu.memory_space<vmem>>, vector<16x128xf32>
    tpu.vector_store %arg4[%c0_5, %c0_6], %9 {strides = array<i32>} : memref<16x128xf32, #tpu.memory_space<vmem>>, vector<16x128xf32>,
    return
  }
  func.func @transform_0(%arg0: i32) -> (i32, i32) {
    %c0_i32 = arith.constant 0 : i32
    %c0_i32_0 = arith.constant 0 : i32
    return %arg0, %c0_i32 : i32, i32
  }
  func.func @transform_1(%arg0: i32) -> (i32, i32) {
    %c0_i32 = arith.constant 0 : i32
    %c0_i32_0 = arith.constant 0 : i32
    %c0_i32_1 = arith.constant 0 : i32
    return %c0_i32, %c0_i32_0 : i32, i32
  }
  func.func @transform_2(%arg0: i32) -> (i32, i32) {
    %c0_i32 = arith.constant 0 : i32
    %c0_i32_0 = arith.constant 0 : i32
    %c0_i32_1 = arith.constant 0 : i32
    return %c0_i32, %c0_i32_0 : i32, i32
  }
  func.func @transform_3(%arg0: i32) -> (i32, i32) {
    %c0_i32 = arith.constant 0 : i32
    %c0_i32_0 = arith.constant 0 : i32
    return %arg0, %c0_i32 : i32, i32
  }
}

module attributes {stable_mosaic.version = 11 : i64} {
  func.func @_bias_prelu_kernel(%arg0: i32, %arg1: memref<8x128xf32, #tpu.memory_space<vmem>>, %arg2: memref<1x128xf32, #tpu.memory_space<vmem>>, %arg3: memref<1x128xf32, #tpu.memory_space<vmem>>, %arg4: memref<8x128xf32, #tpu.memory_space<vmem>>) attributes {dimension_semantics = [#tpu.dimension_semantics<parallel>], iteration_bounds = array<i64: 1>, scalar_prefetch = 0 : i64, scratch_operands = 0 : i64, tpu.core_type = #tpu.core_type<tc>, window_params = [{transform_indices = @transform_0, window_bounds = array<i64: 8, 128>}, {pipeline_mode = #tpu.pipeline_mode<synchronous>, transform_indices = @transform_1, window_bounds = array<i64: 1, 128>}, {pipeline_mode = #tpu.pipeline_mode<synchronous>, transform_indices = @transform_2, window_bounds = array<i64: 1, 128>}, {transform_indices = @transform_3, window_bounds = array<i64: 8, 128>}]} {
    %c0 = arith.constant 0 : index
    %c0_0 = arith.constant 0 : index
    %0 = vector.load %arg1[%c0, %c0_0] : memref<8x128xf32, #tpu.memory_space<vmem>>, vector<8x128xf32>
    %c0_1 = arith.constant 0 : index
    %c0_2 = arith.constant 0 : index
    %1 = vector.load %arg2[%c0_1, %c0_2] : memref<1x128xf32, #tpu.memory_space<vmem>>, vector<1x128xf32>
    %2 = vector.broadcast %1 : vector<1x128xf32> to vector<8x128xf32>
    %3 = arith.addf %0, %2 : vector<8x128xf32>
    %cst = arith.constant 0.000000e+00 : f32
    %4 = vector.broadcast %cst : f32 to vector<8x128xf32>
    %5 = arith.cmpf oge, %3, %4 : vector<8x128xf32>
    %c0_3 = arith.constant 0 : index
    %c0_4 = arith.constant 0 : index
    %6 = vector.load %arg3[%c0_3, %c0_4] : memref<1x128xf32, #tpu.memory_space<vmem>>, vector<1x128xf32>
    %7 = vector.broadcast %6 : vector<1x128xf32> to vector<8x128xf32>
    %8 = arith.mulf %7, %3 : vector<8x128xf32>
    %9 = arith.select %5, %3, %8 : vector<8x128xi1>, vector<8x128xf32>
    %c0_5 = arith.constant 0 : index
    %c0_6 = arith.constant 0 : index
    %10 = vector.load %arg4[%c0_5, %c0_6] : memref<8x128xf32, #tpu.memory_space<vmem>>, vector<8x128xf32>
    tpu.vector_store %arg4[%c0_5, %c0_6], %9 {strides = array<i32>} : memref<8x128xf32, #tpu.memory_space<vmem>>, vector<8x128xf32>,
    return
  }
  func.func @transform_0(%arg0: i32) -> (i32, i32) {
    %c0_i32 = arith.constant 0 : i32
    %c0_i32_0 = arith.constant 0 : i32
    return %arg0, %c0_i32 : i32, i32
  }
  func.func @transform_1(%arg0: i32) -> (i32, i32) {
    %c0_i32 = arith.constant 0 : i32
    %c0_i32_0 = arith.constant 0 : i32
    %c0_i32_1 = arith.constant 0 : i32
    return %c0_i32, %c0_i32_0 : i32, i32
  }
  func.func @transform_2(%arg0: i32) -> (i32, i32) {
    %c0_i32 = arith.constant 0 : i32
    %c0_i32_0 = arith.constant 0 : i32
    %c0_i32_1 = arith.constant 0 : i32
    return %c0_i32, %c0_i32_0 : i32, i32
  }
  func.func @transform_3(%arg0: i32) -> (i32, i32) {
    %c0_i32 = arith.constant 0 : i32
    %c0_i32_0 = arith.constant 0 : i32
    return %arg0, %c0_i32 : i32, i32
  }
}

module attributes {stable_mosaic.version = 11 : i64} {
  func.func @_tail_kernel(%arg0: i32, %arg1: memref<32x4xf32, #tpu.memory_space<vmem>>, %arg2: memref<32x64xf32, #tpu.memory_space<vmem>>, %arg3: memref<4x64xf32, #tpu.memory_space<vmem>>, %arg4: memref<1x4xf32, #tpu.memory_space<vmem>>, %arg5: memref<1x4xf32, #tpu.memory_space<vmem>>, %arg6: memref<1x64xf32, #tpu.memory_space<vmem>>, %arg7: memref<1x64xf32, #tpu.memory_space<vmem>>, %arg8: memref<1x64xf32, #tpu.memory_space<vmem>>, %arg9: memref<32x64xf32, #tpu.memory_space<vmem>>) attributes {dimension_semantics = [#tpu.dimension_semantics<parallel>], iteration_bounds = array<i64: 1>, scalar_prefetch = 0 : i64, scratch_operands = 0 : i64, tpu.core_type = #tpu.core_type<tc>, window_params = [{transform_indices = @transform_0, window_bounds = array<i64: 32, 4>}, {transform_indices = @transform_1, window_bounds = array<i64: 32, 64>}, {pipeline_mode = #tpu.pipeline_mode<synchronous>, transform_indices = @transform_2, window_bounds = array<i64: 4, 64>}, {pipeline_mode = #tpu.pipeline_mode<synchronous>, transform_indices = @transform_3, window_bounds = array<i64: 1, 4>}, {pipeline_mode = #tpu.pipeline_mode<synchronous>, transform_indices = @transform_4, window_bounds = array<i64: 1, 4>}, {pipeline_mode = #tpu.pipeline_mode<synchronous>, transform_indices = @transform_5, window_bounds = array<i64: 1, 64>}, {pipeline_mode = #tpu.pipeline_mode<synchronous>, transform_indices = @transform_6, window_bounds = array<i64: 1, 64>}, {pipeline_mode = #tpu.pipeline_mode<synchronous>, transform_indices = @transform_7, window_bounds = array<i64: 1, 64>}, {transform_indices = @transform_8, window_bounds = array<i64: 32, 64>}]} {
    %c0 = arith.constant 0 : index
    %c0_0 = arith.constant 0 : index
    %0 = vector.load %arg1[%c0, %c0_0] : memref<32x4xf32, #tpu.memory_space<vmem>>, vector<32x4xf32>
    %c0_1 = arith.constant 0 : index
    %c0_2 = arith.constant 0 : index
    %1 = vector.load %arg4[%c0_1, %c0_2] : memref<1x4xf32, #tpu.memory_space<vmem>>, vector<1x4xf32>
    %2 = vector.broadcast %1 : vector<1x4xf32> to vector<32x4xf32>
    %3 = arith.addf %0, %2 : vector<32x4xf32>
    %cst = arith.constant 0.000000e+00 : f32
    %4 = vector.broadcast %cst : f32 to vector<32x4xf32>
    %5 = arith.cmpf oge, %3, %4 : vector<32x4xf32>
    %c0_3 = arith.constant 0 : index
    %c0_4 = arith.constant 0 : index
    %6 = vector.load %arg5[%c0_3, %c0_4] : memref<1x4xf32, #tpu.memory_space<vmem>>, vector<1x4xf32>
    %7 = vector.broadcast %6 : vector<1x4xf32> to vector<32x4xf32>
    %8 = arith.mulf %7, %3 : vector<32x4xf32>
    %9 = arith.select %5, %3, %8 : vector<32x4xi1>, vector<32x4xf32>
    %c0_5 = arith.constant 0 : index
    %c0_6 = arith.constant 0 : index
    %10 = vector.load %arg3[%c0_5, %c0_6] : memref<4x64xf32, #tpu.memory_space<vmem>>, vector<4x64xf32>
    %cst_7 = arith.constant dense<0.000000e+00> : vector<32x64xf32>
    %11 = tpu.matmul %9, %10, %cst_7 {dimension_numbers = #tpu.dot_dimension_numbers<[1], [0], [0], [1], [0, 0, 1, 1], [], []>} : vector<32x4xf32>, vector<4x64xf32>, vector<32x64xf32> -> vector<32x64xf32>
    %c0_8 = arith.constant 0 : index
    %c0_9 = arith.constant 0 : index
    %12 = vector.load %arg6[%c0_8, %c0_9] : memref<1x64xf32, #tpu.memory_space<vmem>>, vector<1x64xf32>
    %13 = vector.broadcast %12 : vector<1x64xf32> to vector<32x64xf32>
    %14 = arith.addf %11, %13 : vector<32x64xf32>
    %cst_10 = arith.constant 0.000000e+00 : f32
    %15 = vector.broadcast %cst_10 : f32 to vector<32x64xf32>
    %16 = arith.cmpf oge, %14, %15 : vector<32x64xf32>
    %c0_11 = arith.constant 0 : index
    %c0_12 = arith.constant 0 : index
    %17 = vector.load %arg7[%c0_11, %c0_12] : memref<1x64xf32, #tpu.memory_space<vmem>>, vector<1x64xf32>
    %18 = vector.broadcast %17 : vector<1x64xf32> to vector<32x64xf32>
    %19 = arith.mulf %18, %14 : vector<32x64xf32>
    %20 = arith.select %16, %14, %19 : vector<32x64xi1>, vector<32x64xf32>
    %c0_13 = arith.constant 0 : index
    %c0_14 = arith.constant 0 : index
    %21 = vector.load %arg2[%c0_13, %c0_14] : memref<32x64xf32, #tpu.memory_space<vmem>>, vector<32x64xf32>
    %22 = arith.addf %20, %21 : vector<32x64xf32>
    %cst_15 = arith.constant 0.000000e+00 : f32
    %23 = vector.broadcast %cst_15 : f32 to vector<32x64xf32>
    %24 = arith.cmpf oge, %22, %23 : vector<32x64xf32>
    %c0_16 = arith.constant 0 : index
    %c0_17 = arith.constant 0 : index
    %25 = vector.load %arg8[%c0_16, %c0_17] : memref<1x64xf32, #tpu.memory_space<vmem>>, vector<1x64xf32>
    %26 = vector.broadcast %25 : vector<1x64xf32> to vector<32x64xf32>
    %27 = arith.mulf %26, %22 : vector<32x64xf32>
    %28 = arith.select %24, %22, %27 : vector<32x64xi1>, vector<32x64xf32>
    %c0_18 = arith.constant 0 : index
    %c0_19 = arith.constant 0 : index
    %29 = vector.load %arg9[%c0_18, %c0_19] : memref<32x64xf32, #tpu.memory_space<vmem>>, vector<32x64xf32>
    tpu.vector_store %arg9[%c0_18, %c0_19], %28 {strides = array<i32>} : memref<32x64xf32, #tpu.memory_space<vmem>>, vector<32x64xf32>,
    return
  }
  func.func @transform_0(%arg0: i32) -> (i32, i32) {
    %c0_i32 = arith.constant 0 : i32
    %c0_i32_0 = arith.constant 0 : i32
    return %arg0, %c0_i32 : i32, i32
  }
  func.func @transform_1(%arg0: i32) -> (i32, i32) {
    %c0_i32 = arith.constant 0 : i32
    %c0_i32_0 = arith.constant 0 : i32
    return %arg0, %c0_i32 : i32, i32
  }
  func.func @transform_2(%arg0: i32) -> (i32, i32) {
    %c0_i32 = arith.constant 0 : i32
    %c0_i32_0 = arith.constant 0 : i32
    %c0_i32_1 = arith.constant 0 : i32
    return %c0_i32, %c0_i32_0 : i32, i32
  }
  func.func @transform_3(%arg0: i32) -> (i32, i32) {
    %c0_i32 = arith.constant 0 : i32
    %c0_i32_0 = arith.constant 0 : i32
    %c0_i32_1 = arith.constant 0 : i32
    return %c0_i32, %c0_i32_0 : i32, i32
  }
  func.func @transform_4(%arg0: i32) -> (i32, i32) {
    %c0_i32 = arith.constant 0 : i32
    %c0_i32_0 = arith.constant 0 : i32
    %c0_i32_1 = arith.constant 0 : i32
    return %c0_i32, %c0_i32_0 : i32, i32
  }
  func.func @transform_5(%arg0: i32) -> (i32, i32) {
    %c0_i32 = arith.constant 0 : i32
    %c0_i32_0 = arith.constant 0 : i32
    %c0_i32_1 = arith.constant 0 : i32
    return %c0_i32, %c0_i32_0 : i32, i32
  }
  func.func @transform_6(%arg0: i32) -> (i32, i32) {
    %c0_i32 = arith.constant 0 : i32
    %c0_i32_0 = arith.constant 0 : i32
    %c0_i32_1 = arith.constant 0 : i32
    return %c0_i32, %c0_i32_0 : i32, i32
  }
  func.func @transform_7(%arg0: i32) -> (i32, i32) {
    %c0_i32 = arith.constant 0 : i32
    %c0_i32_0 = arith.constant 0 : i32
    %c0_i32_1 = arith.constant 0 : i32
    return %c0_i32, %c0_i32_0 : i32, i32
  }
  func.func @transform_8(%arg0: i32) -> (i32, i32) {
    %c0_i32 = arith.constant 0 : i32
    %c0_i32_0 = arith.constant 0 : i32
    return %arg0, %c0_i32 : i32, i32
  }
}

module attributes {stable_mosaic.version = 11 : i64} {
  func.func @_matmul_bias_prelu_kernel(%arg0: i32, %arg1: memref<32x64xf32, #tpu.memory_space<vmem>>, %arg2: memref<64x16xf32, #tpu.memory_space<vmem>>, %arg3: memref<1x16xf32, #tpu.memory_space<vmem>>, %arg4: memref<1x16xf32, #tpu.memory_space<vmem>>, %arg5: memref<32x16xf32, #tpu.memory_space<vmem>>) attributes {dimension_semantics = [#tpu.dimension_semantics<parallel>], iteration_bounds = array<i64: 1>, scalar_prefetch = 0 : i64, scratch_operands = 0 : i64, tpu.core_type = #tpu.core_type<tc>, window_params = [{transform_indices = @transform_0, window_bounds = array<i64: 32, 64>}, {pipeline_mode = #tpu.pipeline_mode<synchronous>, transform_indices = @transform_1, window_bounds = array<i64: 64, 16>}, {pipeline_mode = #tpu.pipeline_mode<synchronous>, transform_indices = @transform_2, window_bounds = array<i64: 1, 16>}, {pipeline_mode = #tpu.pipeline_mode<synchronous>, transform_indices = @transform_3, window_bounds = array<i64: 1, 16>}, {transform_indices = @transform_4, window_bounds = array<i64: 32, 16>}]} {
    %c0 = arith.constant 0 : index
    %c0_0 = arith.constant 0 : index
    %0 = vector.load %arg1[%c0, %c0_0] : memref<32x64xf32, #tpu.memory_space<vmem>>, vector<32x64xf32>
    %c0_1 = arith.constant 0 : index
    %c0_2 = arith.constant 0 : index
    %1 = vector.load %arg2[%c0_1, %c0_2] : memref<64x16xf32, #tpu.memory_space<vmem>>, vector<64x16xf32>
    %cst = arith.constant dense<0.000000e+00> : vector<32x16xf32>
    %2 = tpu.matmul %0, %1, %cst {dimension_numbers = #tpu.dot_dimension_numbers<[1], [0], [0], [1], [0, 0, 1, 1], [], []>} : vector<32x64xf32>, vector<64x16xf32>, vector<32x16xf32> -> vector<32x16xf32>
    %c0_3 = arith.constant 0 : index
    %c0_4 = arith.constant 0 : index
    %3 = vector.load %arg3[%c0_3, %c0_4] : memref<1x16xf32, #tpu.memory_space<vmem>>, vector<1x16xf32>
    %4 = vector.broadcast %3 : vector<1x16xf32> to vector<32x16xf32>
    %5 = arith.addf %2, %4 : vector<32x16xf32>
    %cst_5 = arith.constant 0.000000e+00 : f32
    %6 = vector.broadcast %cst_5 : f32 to vector<32x16xf32>
    %7 = arith.cmpf oge, %5, %6 : vector<32x16xf32>
    %c0_6 = arith.constant 0 : index
    %c0_7 = arith.constant 0 : index
    %8 = vector.load %arg4[%c0_6, %c0_7] : memref<1x16xf32, #tpu.memory_space<vmem>>, vector<1x16xf32>
    %9 = vector.broadcast %8 : vector<1x16xf32> to vector<32x16xf32>
    %10 = arith.mulf %9, %5 : vector<32x16xf32>
    %11 = arith.select %7, %5, %10 : vector<32x16xi1>, vector<32x16xf32>
    %c0_8 = arith.constant 0 : index
    %c0_9 = arith.constant 0 : index
    %12 = vector.load %arg5[%c0_8, %c0_9] : memref<32x16xf32, #tpu.memory_space<vmem>>, vector<32x16xf32>
    tpu.vector_store %arg5[%c0_8, %c0_9], %11 {strides = array<i32>} : memref<32x16xf32, #tpu.memory_space<vmem>>, vector<32x16xf32>,
    return
  }
  func.func @transform_0(%arg0: i32) -> (i32, i32) {
    %c0_i32 = arith.constant 0 : i32
    %c0_i32_0 = arith.constant 0 : i32
    return %arg0, %c0_i32 : i32, i32
  }
  func.func @transform_1(%arg0: i32) -> (i32, i32) {
    %c0_i32 = arith.constant 0 : i32
    %c0_i32_0 = arith.constant 0 : i32
    %c0_i32_1 = arith.constant 0 : i32
    return %c0_i32, %c0_i32_0 : i32, i32
  }
  func.func @transform_2(%arg0: i32) -> (i32, i32) {
    %c0_i32 = arith.constant 0 : i32
    %c0_i32_0 = arith.constant 0 : i32
    %c0_i32_1 = arith.constant 0 : i32
    return %c0_i32, %c0_i32_0 : i32, i32
  }
  func.func @transform_3(%arg0: i32) -> (i32, i32) {
    %c0_i32 = arith.constant 0 : i32
    %c0_i32_0 = arith.constant 0 : i32
    %c0_i32_1 = arith.constant 0 : i32
    return %c0_i32, %c0_i32_0 : i32, i32
  }
  func.func @transform_4(%arg0: i32) -> (i32, i32) {
    %c0_i32 = arith.constant 0 : i32
    %c0_i32_0 = arith.constant 0 : i32
    return %arg0, %c0_i32 : i32, i32
  }
}

module attributes {stable_mosaic.version = 11 : i64} {
  func.func @_tail_kernel(%arg0: i32, %arg1: memref<32x16xf32, #tpu.memory_space<vmem>>, %arg2: memref<32x64xf32, #tpu.memory_space<vmem>>, %arg3: memref<16x64xf32, #tpu.memory_space<vmem>>, %arg4: memref<1x16xf32, #tpu.memory_space<vmem>>, %arg5: memref<1x16xf32, #tpu.memory_space<vmem>>, %arg6: memref<1x64xf32, #tpu.memory_space<vmem>>, %arg7: memref<1x64xf32, #tpu.memory_space<vmem>>, %arg8: memref<1x64xf32, #tpu.memory_space<vmem>>, %arg9: memref<32x64xf32, #tpu.memory_space<vmem>>) attributes {dimension_semantics = [#tpu.dimension_semantics<parallel>], iteration_bounds = array<i64: 1>, scalar_prefetch = 0 : i64, scratch_operands = 0 : i64, tpu.core_type = #tpu.core_type<tc>, window_params = [{transform_indices = @transform_0, window_bounds = array<i64: 32, 16>}, {transform_indices = @transform_1, window_bounds = array<i64: 32, 64>}, {pipeline_mode = #tpu.pipeline_mode<synchronous>, transform_indices = @transform_2, window_bounds = array<i64: 16, 64>}, {pipeline_mode = #tpu.pipeline_mode<synchronous>, transform_indices = @transform_3, window_bounds = array<i64: 1, 16>}, {pipeline_mode = #tpu.pipeline_mode<synchronous>, transform_indices = @transform_4, window_bounds = array<i64: 1, 16>}, {pipeline_mode = #tpu.pipeline_mode<synchronous>, transform_indices = @transform_5, window_bounds = array<i64: 1, 64>}, {pipeline_mode = #tpu.pipeline_mode<synchronous>, transform_indices = @transform_6, window_bounds = array<i64: 1, 64>}, {pipeline_mode = #tpu.pipeline_mode<synchronous>, transform_indices = @transform_7, window_bounds = array<i64: 1, 64>}, {transform_indices = @transform_8, window_bounds = array<i64: 32, 64>}]} {
    %c0 = arith.constant 0 : index
    %c0_0 = arith.constant 0 : index
    %0 = vector.load %arg1[%c0, %c0_0] : memref<32x16xf32, #tpu.memory_space<vmem>>, vector<32x16xf32>
    %c0_1 = arith.constant 0 : index
    %c0_2 = arith.constant 0 : index
    %1 = vector.load %arg4[%c0_1, %c0_2] : memref<1x16xf32, #tpu.memory_space<vmem>>, vector<1x16xf32>
    %2 = vector.broadcast %1 : vector<1x16xf32> to vector<32x16xf32>
    %3 = arith.addf %0, %2 : vector<32x16xf32>
    %cst = arith.constant 0.000000e+00 : f32
    %4 = vector.broadcast %cst : f32 to vector<32x16xf32>
    %5 = arith.cmpf oge, %3, %4 : vector<32x16xf32>
    %c0_3 = arith.constant 0 : index
    %c0_4 = arith.constant 0 : index
    %6 = vector.load %arg5[%c0_3, %c0_4] : memref<1x16xf32, #tpu.memory_space<vmem>>, vector<1x16xf32>
    %7 = vector.broadcast %6 : vector<1x16xf32> to vector<32x16xf32>
    %8 = arith.mulf %7, %3 : vector<32x16xf32>
    %9 = arith.select %5, %3, %8 : vector<32x16xi1>, vector<32x16xf32>
    %c0_5 = arith.constant 0 : index
    %c0_6 = arith.constant 0 : index
    %10 = vector.load %arg3[%c0_5, %c0_6] : memref<16x64xf32, #tpu.memory_space<vmem>>, vector<16x64xf32>
    %cst_7 = arith.constant dense<0.000000e+00> : vector<32x64xf32>
    %11 = tpu.matmul %9, %10, %cst_7 {dimension_numbers = #tpu.dot_dimension_numbers<[1], [0], [0], [1], [0, 0, 1, 1], [], []>} : vector<32x16xf32>, vector<16x64xf32>, vector<32x64xf32> -> vector<32x64xf32>
    %c0_8 = arith.constant 0 : index
    %c0_9 = arith.constant 0 : index
    %12 = vector.load %arg6[%c0_8, %c0_9] : memref<1x64xf32, #tpu.memory_space<vmem>>, vector<1x64xf32>
    %13 = vector.broadcast %12 : vector<1x64xf32> to vector<32x64xf32>
    %14 = arith.addf %11, %13 : vector<32x64xf32>
    %cst_10 = arith.constant 0.000000e+00 : f32
    %15 = vector.broadcast %cst_10 : f32 to vector<32x64xf32>
    %16 = arith.cmpf oge, %14, %15 : vector<32x64xf32>
    %c0_11 = arith.constant 0 : index
    %c0_12 = arith.constant 0 : index
    %17 = vector.load %arg7[%c0_11, %c0_12] : memref<1x64xf32, #tpu.memory_space<vmem>>, vector<1x64xf32>
    %18 = vector.broadcast %17 : vector<1x64xf32> to vector<32x64xf32>
    %19 = arith.mulf %18, %14 : vector<32x64xf32>
    %20 = arith.select %16, %14, %19 : vector<32x64xi1>, vector<32x64xf32>
    %c0_13 = arith.constant 0 : index
    %c0_14 = arith.constant 0 : index
    %21 = vector.load %arg2[%c0_13, %c0_14] : memref<32x64xf32, #tpu.memory_space<vmem>>, vector<32x64xf32>
    %22 = arith.addf %20, %21 : vector<32x64xf32>
    %cst_15 = arith.constant 0.000000e+00 : f32
    %23 = vector.broadcast %cst_15 : f32 to vector<32x64xf32>
    %24 = arith.cmpf oge, %22, %23 : vector<32x64xf32>
    %c0_16 = arith.constant 0 : index
    %c0_17 = arith.constant 0 : index
    %25 = vector.load %arg8[%c0_16, %c0_17] : memref<1x64xf32, #tpu.memory_space<vmem>>, vector<1x64xf32>
    %26 = vector.broadcast %25 : vector<1x64xf32> to vector<32x64xf32>
    %27 = arith.mulf %26, %22 : vector<32x64xf32>
    %28 = arith.select %24, %22, %27 : vector<32x64xi1>, vector<32x64xf32>
    %c0_18 = arith.constant 0 : index
    %c0_19 = arith.constant 0 : index
    %29 = vector.load %arg9[%c0_18, %c0_19] : memref<32x64xf32, #tpu.memory_space<vmem>>, vector<32x64xf32>
    tpu.vector_store %arg9[%c0_18, %c0_19], %28 {strides = array<i32>} : memref<32x64xf32, #tpu.memory_space<vmem>>, vector<32x64xf32>,
    return
  }
  func.func @transform_0(%arg0: i32) -> (i32, i32) {
    %c0_i32 = arith.constant 0 : i32
    %c0_i32_0 = arith.constant 0 : i32
    return %arg0, %c0_i32 : i32, i32
  }
  func.func @transform_1(%arg0: i32) -> (i32, i32) {
    %c0_i32 = arith.constant 0 : i32
    %c0_i32_0 = arith.constant 0 : i32
    return %arg0, %c0_i32 : i32, i32
  }
  func.func @transform_2(%arg0: i32) -> (i32, i32) {
    %c0_i32 = arith.constant 0 : i32
    %c0_i32_0 = arith.constant 0 : i32
    %c0_i32_1 = arith.constant 0 : i32
    return %c0_i32, %c0_i32_0 : i32, i32
  }
  func.func @transform_3(%arg0: i32) -> (i32, i32) {
    %c0_i32 = arith.constant 0 : i32
    %c0_i32_0 = arith.constant 0 : i32
    %c0_i32_1 = arith.constant 0 : i32
    return %c0_i32, %c0_i32_0 : i32, i32
  }
  func.func @transform_4(%arg0: i32) -> (i32, i32) {
    %c0_i32 = arith.constant 0 : i32
    %c0_i32_0 = arith.constant 0 : i32
    %c0_i32_1 = arith.constant 0 : i32
    return %c0_i32, %c0_i32_0 : i32, i32
  }
  func.func @transform_5(%arg0: i32) -> (i32, i32) {
    %c0_i32 = arith.constant 0 : i32
    %c0_i32_0 = arith.constant 0 : i32
    %c0_i32_1 = arith.constant 0 : i32
    return %c0_i32, %c0_i32_0 : i32, i32
  }
  func.func @transform_6(%arg0: i32) -> (i32, i32) {
    %c0_i32 = arith.constant 0 : i32
    %c0_i32_0 = arith.constant 0 : i32
    %c0_i32_1 = arith.constant 0 : i32
    return %c0_i32, %c0_i32_0 : i32, i32
  }
  func.func @transform_7(%arg0: i32) -> (i32, i32) {
    %c0_i32 = arith.constant 0 : i32
    %c0_i32_0 = arith.constant 0 : i32
    %c0_i32_1 = arith.constant 0 : i32
    return %c0_i32, %c0_i32_0 : i32, i32
  }
  func.func @transform_8(%arg0: i32) -> (i32, i32) {
    %c0_i32 = arith.constant 0 : i32
    %c0_i32_0 = arith.constant 0 : i32
    return %arg0, %c0_i32 : i32, i32
  }
}

module attributes {stable_mosaic.version = 11 : i64} {
  func.func @_tail_kernel(%arg0: i32, %arg1: memref<8x16xf32, #tpu.memory_space<vmem>>, %arg2: memref<8x128xf32, #tpu.memory_space<vmem>>, %arg3: memref<16x128xf32, #tpu.memory_space<vmem>>, %arg4: memref<1x16xf32, #tpu.memory_space<vmem>>, %arg5: memref<1x16xf32, #tpu.memory_space<vmem>>, %arg6: memref<1x128xf32, #tpu.memory_space<vmem>>, %arg7: memref<1x128xf32, #tpu.memory_space<vmem>>, %arg8: memref<1x128xf32, #tpu.memory_space<vmem>>, %arg9: memref<8x128xf32, #tpu.memory_space<vmem>>) attributes {dimension_semantics = [#tpu.dimension_semantics<parallel>], iteration_bounds = array<i64: 1>, scalar_prefetch = 0 : i64, scratch_operands = 0 : i64, tpu.core_type = #tpu.core_type<tc>, window_params = [{transform_indices = @transform_0, window_bounds = array<i64: 8, 16>}, {transform_indices = @transform_1, window_bounds = array<i64: 8, 128>}, {pipeline_mode = #tpu.pipeline_mode<synchronous>, transform_indices = @transform_2, window_bounds = array<i64: 16, 128>}, {pipeline_mode = #tpu.pipeline_mode<synchronous>, transform_indices = @transform_3, window_bounds = array<i64: 1, 16>}, {pipeline_mode = #tpu.pipeline_mode<synchronous>, transform_indices = @transform_4, window_bounds = array<i64: 1, 16>}, {pipeline_mode = #tpu.pipeline_mode<synchronous>, transform_indices = @transform_5, window_bounds = array<i64: 1, 128>}, {pipeline_mode = #tpu.pipeline_mode<synchronous>, transform_indices = @transform_6, window_bounds = array<i64: 1, 128>}, {pipeline_mode = #tpu.pipeline_mode<synchronous>, transform_indices = @transform_7, window_bounds = array<i64: 1, 128>}, {transform_indices = @transform_8, window_bounds = array<i64: 8, 128>}]} {
    %c0 = arith.constant 0 : index
    %c0_0 = arith.constant 0 : index
    %0 = vector.load %arg1[%c0, %c0_0] : memref<8x16xf32, #tpu.memory_space<vmem>>, vector<8x16xf32>
    %c0_1 = arith.constant 0 : index
    %c0_2 = arith.constant 0 : index
    %1 = vector.load %arg4[%c0_1, %c0_2] : memref<1x16xf32, #tpu.memory_space<vmem>>, vector<1x16xf32>
    %2 = vector.broadcast %1 : vector<1x16xf32> to vector<8x16xf32>
    %3 = arith.addf %0, %2 : vector<8x16xf32>
    %cst = arith.constant 0.000000e+00 : f32
    %4 = vector.broadcast %cst : f32 to vector<8x16xf32>
    %5 = arith.cmpf oge, %3, %4 : vector<8x16xf32>
    %c0_3 = arith.constant 0 : index
    %c0_4 = arith.constant 0 : index
    %6 = vector.load %arg5[%c0_3, %c0_4] : memref<1x16xf32, #tpu.memory_space<vmem>>, vector<1x16xf32>
    %7 = vector.broadcast %6 : vector<1x16xf32> to vector<8x16xf32>
    %8 = arith.mulf %7, %3 : vector<8x16xf32>
    %9 = arith.select %5, %3, %8 : vector<8x16xi1>, vector<8x16xf32>
    %c0_5 = arith.constant 0 : index
    %c0_6 = arith.constant 0 : index
    %10 = vector.load %arg3[%c0_5, %c0_6] : memref<16x128xf32, #tpu.memory_space<vmem>>, vector<16x128xf32>
    %cst_7 = arith.constant dense<0.000000e+00> : vector<8x128xf32>
    %11 = tpu.matmul %9, %10, %cst_7 {dimension_numbers = #tpu.dot_dimension_numbers<[1], [0], [0], [1], [0, 0, 1, 1], [], []>} : vector<8x16xf32>, vector<16x128xf32>, vector<8x128xf32> -> vector<8x128xf32>
    %c0_8 = arith.constant 0 : index
    %c0_9 = arith.constant 0 : index
    %12 = vector.load %arg6[%c0_8, %c0_9] : memref<1x128xf32, #tpu.memory_space<vmem>>, vector<1x128xf32>
    %13 = vector.broadcast %12 : vector<1x128xf32> to vector<8x128xf32>
    %14 = arith.addf %11, %13 : vector<8x128xf32>
    %cst_10 = arith.constant 0.000000e+00 : f32
    %15 = vector.broadcast %cst_10 : f32 to vector<8x128xf32>
    %16 = arith.cmpf oge, %14, %15 : vector<8x128xf32>
    %c0_11 = arith.constant 0 : index
    %c0_12 = arith.constant 0 : index
    %17 = vector.load %arg7[%c0_11, %c0_12] : memref<1x128xf32, #tpu.memory_space<vmem>>, vector<1x128xf32>
    %18 = vector.broadcast %17 : vector<1x128xf32> to vector<8x128xf32>
    %19 = arith.mulf %18, %14 : vector<8x128xf32>
    %20 = arith.select %16, %14, %19 : vector<8x128xi1>, vector<8x128xf32>
    %c0_13 = arith.constant 0 : index
    %c0_14 = arith.constant 0 : index
    %21 = vector.load %arg2[%c0_13, %c0_14] : memref<8x128xf32, #tpu.memory_space<vmem>>, vector<8x128xf32>
    %22 = arith.addf %20, %21 : vector<8x128xf32>
    %cst_15 = arith.constant 0.000000e+00 : f32
    %23 = vector.broadcast %cst_15 : f32 to vector<8x128xf32>
    %24 = arith.cmpf oge, %22, %23 : vector<8x128xf32>
    %c0_16 = arith.constant 0 : index
    %c0_17 = arith.constant 0 : index
    %25 = vector.load %arg8[%c0_16, %c0_17] : memref<1x128xf32, #tpu.memory_space<vmem>>, vector<1x128xf32>
    %26 = vector.broadcast %25 : vector<1x128xf32> to vector<8x128xf32>
    %27 = arith.mulf %26, %22 : vector<8x128xf32>
    %28 = arith.select %24, %22, %27 : vector<8x128xi1>, vector<8x128xf32>
    %c0_18 = arith.constant 0 : index
    %c0_19 = arith.constant 0 : index
    %29 = vector.load %arg9[%c0_18, %c0_19] : memref<8x128xf32, #tpu.memory_space<vmem>>, vector<8x128xf32>
    tpu.vector_store %arg9[%c0_18, %c0_19], %28 {strides = array<i32>} : memref<8x128xf32, #tpu.memory_space<vmem>>, vector<8x128xf32>,
    return
  }
  func.func @transform_0(%arg0: i32) -> (i32, i32) {
    %c0_i32 = arith.constant 0 : i32
    %c0_i32_0 = arith.constant 0 : i32
    return %arg0, %c0_i32 : i32, i32
  }
  func.func @transform_1(%arg0: i32) -> (i32, i32) {
    %c0_i32 = arith.constant 0 : i32
    %c0_i32_0 = arith.constant 0 : i32
    return %arg0, %c0_i32 : i32, i32
  }
  func.func @transform_2(%arg0: i32) -> (i32, i32) {
    %c0_i32 = arith.constant 0 : i32
    %c0_i32_0 = arith.constant 0 : i32
    %c0_i32_1 = arith.constant 0 : i32
    return %c0_i32, %c0_i32_0 : i32, i32
  }
  func.func @transform_3(%arg0: i32) -> (i32, i32) {
    %c0_i32 = arith.constant 0 : i32
    %c0_i32_0 = arith.constant 0 : i32
    %c0_i32_1 = arith.constant 0 : i32
    return %c0_i32, %c0_i32_0 : i32, i32
  }
  func.func @transform_4(%arg0: i32) -> (i32, i32) {
    %c0_i32 = arith.constant 0 : i32
    %c0_i32_0 = arith.constant 0 : i32
    %c0_i32_1 = arith.constant 0 : i32
    return %c0_i32, %c0_i32_0 : i32, i32
  }
  func.func @transform_5(%arg0: i32) -> (i32, i32) {
    %c0_i32 = arith.constant 0 : i32
    %c0_i32_0 = arith.constant 0 : i32
    %c0_i32_1 = arith.constant 0 : i32
    return %c0_i32, %c0_i32_0 : i32, i32
  }
  func.func @transform_6(%arg0: i32) -> (i32, i32) {
    %c0_i32 = arith.constant 0 : i32
    %c0_i32_0 = arith.constant 0 : i32
    %c0_i32_1 = arith.constant 0 : i32
    return %c0_i32, %c0_i32_0 : i32, i32
  }
  func.func @transform_7(%arg0: i32) -> (i32, i32) {
    %c0_i32 = arith.constant 0 : i32
    %c0_i32_0 = arith.constant 0 : i32
    %c0_i32_1 = arith.constant 0 : i32
    return %c0_i32, %c0_i32_0 : i32, i32
  }
  func.func @transform_8(%arg0: i32) -> (i32, i32) {
    %c0_i32 = arith.constant 0 : i32
    %c0_i32_0 = arith.constant 0 : i32
    return %arg0, %c0_i32 : i32, i32
  }
}

module attributes {stable_mosaic.version = 11 : i64} {
  func.func @_matmul_bias_prelu_kernel(%arg0: i32, %arg1: memref<8x128xf32, #tpu.memory_space<vmem>>, %arg2: memref<128x32xf32, #tpu.memory_space<vmem>>, %arg3: memref<1x32xf32, #tpu.memory_space<vmem>>, %arg4: memref<1x32xf32, #tpu.memory_space<vmem>>, %arg5: memref<8x32xf32, #tpu.memory_space<vmem>>) attributes {dimension_semantics = [#tpu.dimension_semantics<parallel>], iteration_bounds = array<i64: 1>, scalar_prefetch = 0 : i64, scratch_operands = 0 : i64, tpu.core_type = #tpu.core_type<tc>, window_params = [{transform_indices = @transform_0, window_bounds = array<i64: 8, 128>}, {pipeline_mode = #tpu.pipeline_mode<synchronous>, transform_indices = @transform_1, window_bounds = array<i64: 128, 32>}, {pipeline_mode = #tpu.pipeline_mode<synchronous>, transform_indices = @transform_2, window_bounds = array<i64: 1, 32>}, {pipeline_mode = #tpu.pipeline_mode<synchronous>, transform_indices = @transform_3, window_bounds = array<i64: 1, 32>}, {transform_indices = @transform_4, window_bounds = array<i64: 8, 32>}]} {
    %c0 = arith.constant 0 : index
    %c0_0 = arith.constant 0 : index
    %0 = vector.load %arg1[%c0, %c0_0] : memref<8x128xf32, #tpu.memory_space<vmem>>, vector<8x128xf32>
    %c0_1 = arith.constant 0 : index
    %c0_2 = arith.constant 0 : index
    %1 = vector.load %arg2[%c0_1, %c0_2] : memref<128x32xf32, #tpu.memory_space<vmem>>, vector<128x32xf32>
    %cst = arith.constant dense<0.000000e+00> : vector<8x32xf32>
    %2 = tpu.matmul %0, %1, %cst {dimension_numbers = #tpu.dot_dimension_numbers<[1], [0], [0], [1], [0, 0, 1, 1], [], []>} : vector<8x128xf32>, vector<128x32xf32>, vector<8x32xf32> -> vector<8x32xf32>
    %c0_3 = arith.constant 0 : index
    %c0_4 = arith.constant 0 : index
    %3 = vector.load %arg3[%c0_3, %c0_4] : memref<1x32xf32, #tpu.memory_space<vmem>>, vector<1x32xf32>
    %4 = vector.broadcast %3 : vector<1x32xf32> to vector<8x32xf32>
    %5 = arith.addf %2, %4 : vector<8x32xf32>
    %cst_5 = arith.constant 0.000000e+00 : f32
    %6 = vector.broadcast %cst_5 : f32 to vector<8x32xf32>
    %7 = arith.cmpf oge, %5, %6 : vector<8x32xf32>
    %c0_6 = arith.constant 0 : index
    %c0_7 = arith.constant 0 : index
    %8 = vector.load %arg4[%c0_6, %c0_7] : memref<1x32xf32, #tpu.memory_space<vmem>>, vector<1x32xf32>
    %9 = vector.broadcast %8 : vector<1x32xf32> to vector<8x32xf32>
    %10 = arith.mulf %9, %5 : vector<8x32xf32>
    %11 = arith.select %7, %5, %10 : vector<8x32xi1>, vector<8x32xf32>
    %c0_8 = arith.constant 0 : index
    %c0_9 = arith.constant 0 : index
    %12 = vector.load %arg5[%c0_8, %c0_9] : memref<8x32xf32, #tpu.memory_space<vmem>>, vector<8x32xf32>
    tpu.vector_store %arg5[%c0_8, %c0_9], %11 {strides = array<i32>} : memref<8x32xf32, #tpu.memory_space<vmem>>, vector<8x32xf32>,
    return
  }
  func.func @transform_0(%arg0: i32) -> (i32, i32) {
    %c0_i32 = arith.constant 0 : i32
    %c0_i32_0 = arith.constant 0 : i32
    return %arg0, %c0_i32 : i32, i32
  }
  func.func @transform_1(%arg0: i32) -> (i32, i32) {
    %c0_i32 = arith.constant 0 : i32
    %c0_i32_0 = arith.constant 0 : i32
    %c0_i32_1 = arith.constant 0 : i32
    return %c0_i32, %c0_i32_0 : i32, i32
  }
  func.func @transform_2(%arg0: i32) -> (i32, i32) {
    %c0_i32 = arith.constant 0 : i32
    %c0_i32_0 = arith.constant 0 : i32
    %c0_i32_1 = arith.constant 0 : i32
    return %c0_i32, %c0_i32_0 : i32, i32
  }
  func.func @transform_3(%arg0: i32) -> (i32, i32) {
    %c0_i32 = arith.constant 0 : i32
    %c0_i32_0 = arith.constant 0 : i32
    %c0_i32_1 = arith.constant 0 : i32
    return %c0_i32, %c0_i32_0 : i32, i32
  }
  func.func @transform_4(%arg0: i32) -> (i32, i32) {
    %c0_i32 = arith.constant 0 : i32
    %c0_i32_0 = arith.constant 0 : i32
    return %arg0, %c0_i32 : i32, i32
  }
}

module attributes {stable_mosaic.version = 11 : i64} {
  func.func @_bias_prelu_kernel(%arg0: i32, %arg1: memref<8x128xf32, #tpu.memory_space<vmem>>, %arg2: memref<1x128xf32, #tpu.memory_space<vmem>>, %arg3: memref<1x128xf32, #tpu.memory_space<vmem>>, %arg4: memref<8x128xf32, #tpu.memory_space<vmem>>) attributes {dimension_semantics = [#tpu.dimension_semantics<parallel>], iteration_bounds = array<i64: 1>, scalar_prefetch = 0 : i64, scratch_operands = 0 : i64, tpu.core_type = #tpu.core_type<tc>, window_params = [{transform_indices = @transform_0, window_bounds = array<i64: 8, 128>}, {pipeline_mode = #tpu.pipeline_mode<synchronous>, transform_indices = @transform_1, window_bounds = array<i64: 1, 128>}, {pipeline_mode = #tpu.pipeline_mode<synchronous>, transform_indices = @transform_2, window_bounds = array<i64: 1, 128>}, {transform_indices = @transform_3, window_bounds = array<i64: 8, 128>}]} {
    %c0 = arith.constant 0 : index
    %c0_0 = arith.constant 0 : index
    %0 = vector.load %arg1[%c0, %c0_0] : memref<8x128xf32, #tpu.memory_space<vmem>>, vector<8x128xf32>
    %c0_1 = arith.constant 0 : index
    %c0_2 = arith.constant 0 : index
    %1 = vector.load %arg2[%c0_1, %c0_2] : memref<1x128xf32, #tpu.memory_space<vmem>>, vector<1x128xf32>
    %2 = vector.broadcast %1 : vector<1x128xf32> to vector<8x128xf32>
    %3 = arith.addf %0, %2 : vector<8x128xf32>
    %cst = arith.constant 0.000000e+00 : f32
    %4 = vector.broadcast %cst : f32 to vector<8x128xf32>
    %5 = arith.cmpf oge, %3, %4 : vector<8x128xf32>
    %c0_3 = arith.constant 0 : index
    %c0_4 = arith.constant 0 : index
    %6 = vector.load %arg3[%c0_3, %c0_4] : memref<1x128xf32, #tpu.memory_space<vmem>>, vector<1x128xf32>
    %7 = vector.broadcast %6 : vector<1x128xf32> to vector<8x128xf32>
    %8 = arith.mulf %7, %3 : vector<8x128xf32>
    %9 = arith.select %5, %3, %8 : vector<8x128xi1>, vector<8x128xf32>
    %c0_5 = arith.constant 0 : index
    %c0_6 = arith.constant 0 : index
    %10 = vector.load %arg4[%c0_5, %c0_6] : memref<8x128xf32, #tpu.memory_space<vmem>>, vector<8x128xf32>
    tpu.vector_store %arg4[%c0_5, %c0_6], %9 {strides = array<i32>} : memref<8x128xf32, #tpu.memory_space<vmem>>, vector<8x128xf32>,
    return
  }
  func.func @transform_0(%arg0: i32) -> (i32, i32) {
    %c0_i32 = arith.constant 0 : i32
    %c0_i32_0 = arith.constant 0 : i32
    return %arg0, %c0_i32 : i32, i32
  }
  func.func @transform_1(%arg0: i32) -> (i32, i32) {
    %c0_i32 = arith.constant 0 : i32
    %c0_i32_0 = arith.constant 0 : i32
    %c0_i32_1 = arith.constant 0 : i32
    return %c0_i32, %c0_i32_0 : i32, i32
  }
  func.func @transform_2(%arg0: i32) -> (i32, i32) {
    %c0_i32 = arith.constant 0 : i32
    %c0_i32_0 = arith.constant 0 : i32
    %c0_i32_1 = arith.constant 0 : i32
    return %c0_i32, %c0_i32_0 : i32, i32
  }
  func.func @transform_3(%arg0: i32) -> (i32, i32) {
    %c0_i32 = arith.constant 0 : i32
    %c0_i32_0 = arith.constant 0 : i32
    return %arg0, %c0_i32 : i32, i32
  }
}

module attributes {stable_mosaic.version = 11 : i64} {
  func.func @_tail_kernel(%arg0: i32, %arg1: memref<8x32xf32, #tpu.memory_space<vmem>>, %arg2: memref<8x128xf32, #tpu.memory_space<vmem>>, %arg3: memref<32x128xf32, #tpu.memory_space<vmem>>, %arg4: memref<1x32xf32, #tpu.memory_space<vmem>>, %arg5: memref<1x32xf32, #tpu.memory_space<vmem>>, %arg6: memref<1x128xf32, #tpu.memory_space<vmem>>, %arg7: memref<1x128xf32, #tpu.memory_space<vmem>>, %arg8: memref<1x128xf32, #tpu.memory_space<vmem>>, %arg9: memref<8x128xf32, #tpu.memory_space<vmem>>) attributes {dimension_semantics = [#tpu.dimension_semantics<parallel>], iteration_bounds = array<i64: 1>, scalar_prefetch = 0 : i64, scratch_operands = 0 : i64, tpu.core_type = #tpu.core_type<tc>, window_params = [{transform_indices = @transform_0, window_bounds = array<i64: 8, 32>}, {transform_indices = @transform_1, window_bounds = array<i64: 8, 128>}, {pipeline_mode = #tpu.pipeline_mode<synchronous>, transform_indices = @transform_2, window_bounds = array<i64: 32, 128>}, {pipeline_mode = #tpu.pipeline_mode<synchronous>, transform_indices = @transform_3, window_bounds = array<i64: 1, 32>}, {pipeline_mode = #tpu.pipeline_mode<synchronous>, transform_indices = @transform_4, window_bounds = array<i64: 1, 32>}, {pipeline_mode = #tpu.pipeline_mode<synchronous>, transform_indices = @transform_5, window_bounds = array<i64: 1, 128>}, {pipeline_mode = #tpu.pipeline_mode<synchronous>, transform_indices = @transform_6, window_bounds = array<i64: 1, 128>}, {pipeline_mode = #tpu.pipeline_mode<synchronous>, transform_indices = @transform_7, window_bounds = array<i64: 1, 128>}, {transform_indices = @transform_8, window_bounds = array<i64: 8, 128>}]} {
    %c0 = arith.constant 0 : index
    %c0_0 = arith.constant 0 : index
    %0 = vector.load %arg1[%c0, %c0_0] : memref<8x32xf32, #tpu.memory_space<vmem>>, vector<8x32xf32>
    %c0_1 = arith.constant 0 : index
    %c0_2 = arith.constant 0 : index
    %1 = vector.load %arg4[%c0_1, %c0_2] : memref<1x32xf32, #tpu.memory_space<vmem>>, vector<1x32xf32>
    %2 = vector.broadcast %1 : vector<1x32xf32> to vector<8x32xf32>
    %3 = arith.addf %0, %2 : vector<8x32xf32>
    %cst = arith.constant 0.000000e+00 : f32
    %4 = vector.broadcast %cst : f32 to vector<8x32xf32>
    %5 = arith.cmpf oge, %3, %4 : vector<8x32xf32>
    %c0_3 = arith.constant 0 : index
    %c0_4 = arith.constant 0 : index
    %6 = vector.load %arg5[%c0_3, %c0_4] : memref<1x32xf32, #tpu.memory_space<vmem>>, vector<1x32xf32>
    %7 = vector.broadcast %6 : vector<1x32xf32> to vector<8x32xf32>
    %8 = arith.mulf %7, %3 : vector<8x32xf32>
    %9 = arith.select %5, %3, %8 : vector<8x32xi1>, vector<8x32xf32>
    %c0_5 = arith.constant 0 : index
    %c0_6 = arith.constant 0 : index
    %10 = vector.load %arg3[%c0_5, %c0_6] : memref<32x128xf32, #tpu.memory_space<vmem>>, vector<32x128xf32>
    %cst_7 = arith.constant dense<0.000000e+00> : vector<8x128xf32>
    %11 = tpu.matmul %9, %10, %cst_7 {dimension_numbers = #tpu.dot_dimension_numbers<[1], [0], [0], [1], [0, 0, 1, 1], [], []>} : vector<8x32xf32>, vector<32x128xf32>, vector<8x128xf32> -> vector<8x128xf32>
    %c0_8 = arith.constant 0 : index
    %c0_9 = arith.constant 0 : index
    %12 = vector.load %arg6[%c0_8, %c0_9] : memref<1x128xf32, #tpu.memory_space<vmem>>, vector<1x128xf32>
    %13 = vector.broadcast %12 : vector<1x128xf32> to vector<8x128xf32>
    %14 = arith.addf %11, %13 : vector<8x128xf32>
    %cst_10 = arith.constant 0.000000e+00 : f32
    %15 = vector.broadcast %cst_10 : f32 to vector<8x128xf32>
    %16 = arith.cmpf oge, %14, %15 : vector<8x128xf32>
    %c0_11 = arith.constant 0 : index
    %c0_12 = arith.constant 0 : index
    %17 = vector.load %arg7[%c0_11, %c0_12] : memref<1x128xf32, #tpu.memory_space<vmem>>, vector<1x128xf32>
    %18 = vector.broadcast %17 : vector<1x128xf32> to vector<8x128xf32>
    %19 = arith.mulf %18, %14 : vector<8x128xf32>
    %20 = arith.select %16, %14, %19 : vector<8x128xi1>, vector<8x128xf32>
    %c0_13 = arith.constant 0 : index
    %c0_14 = arith.constant 0 : index
    %21 = vector.load %arg2[%c0_13, %c0_14] : memref<8x128xf32, #tpu.memory_space<vmem>>, vector<8x128xf32>
    %22 = arith.addf %20, %21 : vector<8x128xf32>
    %cst_15 = arith.constant 0.000000e+00 : f32
    %23 = vector.broadcast %cst_15 : f32 to vector<8x128xf32>
    %24 = arith.cmpf oge, %22, %23 : vector<8x128xf32>
    %c0_16 = arith.constant 0 : index
    %c0_17 = arith.constant 0 : index
    %25 = vector.load %arg8[%c0_16, %c0_17] : memref<1x128xf32, #tpu.memory_space<vmem>>, vector<1x128xf32>
    %26 = vector.broadcast %25 : vector<1x128xf32> to vector<8x128xf32>
    %27 = arith.mulf %26, %22 : vector<8x128xf32>
    %28 = arith.select %24, %22, %27 : vector<8x128xi1>, vector<8x128xf32>
    %c0_18 = arith.constant 0 : index
    %c0_19 = arith.constant 0 : index
    %29 = vector.load %arg9[%c0_18, %c0_19] : memref<8x128xf32, #tpu.memory_space<vmem>>, vector<8x128xf32>
    tpu.vector_store %arg9[%c0_18, %c0_19], %28 {strides = array<i32>} : memref<8x128xf32, #tpu.memory_space<vmem>>, vector<8x128xf32>,
    return
  }
  func.func @transform_0(%arg0: i32) -> (i32, i32) {
    %c0_i32 = arith.constant 0 : i32
    %c0_i32_0 = arith.constant 0 : i32
    return %arg0, %c0_i32 : i32, i32
  }
  func.func @transform_1(%arg0: i32) -> (i32, i32) {
    %c0_i32 = arith.constant 0 : i32
    %c0_i32_0 = arith.constant 0 : i32
    return %arg0, %c0_i32 : i32, i32
  }
  func.func @transform_2(%arg0: i32) -> (i32, i32) {
    %c0_i32 = arith.constant 0 : i32
    %c0_i32_0 = arith.constant 0 : i32
    %c0_i32_1 = arith.constant 0 : i32
    return %c0_i32, %c0_i32_0 : i32, i32
  }
  func.func @transform_3(%arg0: i32) -> (i32, i32) {
    %c0_i32 = arith.constant 0 : i32
    %c0_i32_0 = arith.constant 0 : i32
    %c0_i32_1 = arith.constant 0 : i32
    return %c0_i32, %c0_i32_0 : i32, i32
  }
  func.func @transform_4(%arg0: i32) -> (i32, i32) {
    %c0_i32 = arith.constant 0 : i32
    %c0_i32_0 = arith.constant 0 : i32
    %c0_i32_1 = arith.constant 0 : i32
    return %c0_i32, %c0_i32_0 : i32, i32
  }
  func.func @transform_5(%arg0: i32) -> (i32, i32) {
    %c0_i32 = arith.constant 0 : i32
    %c0_i32_0 = arith.constant 0 : i32
    %c0_i32_1 = arith.constant 0 : i32
    return %c0_i32, %c0_i32_0 : i32, i32
  }
  func.func @transform_6(%arg0: i32) -> (i32, i32) {
    %c0_i32 = arith.constant 0 : i32
    %c0_i32_0 = arith.constant 0 : i32
    %c0_i32_1 = arith.constant 0 : i32
    return %c0_i32, %c0_i32_0 : i32, i32
  }
  func.func @transform_7(%arg0: i32) -> (i32, i32) {
    %c0_i32 = arith.constant 0 : i32
    %c0_i32_0 = arith.constant 0 : i32
    %c0_i32_1 = arith.constant 0 : i32
    return %c0_i32, %c0_i32_0 : i32, i32
  }
  func.func @transform_8(%arg0: i32) -> (i32, i32) {
    %c0_i32 = arith.constant 0 : i32
    %c0_i32_0 = arith.constant 0 : i32
    return %arg0, %c0_i32 : i32, i32
  }
}

module attributes {stable_mosaic.version = 11 : i64} {
  func.func @_matmul_bias_kernel(%arg0: i32, %arg1: memref<8x128xf32, #tpu.memory_space<vmem>>, %arg2: memref<128x64xf32, #tpu.memory_space<vmem>>, %arg3: memref<1x64xf32, #tpu.memory_space<vmem>>, %arg4: memref<8x64xf32, #tpu.memory_space<vmem>>) attributes {dimension_semantics = [#tpu.dimension_semantics<parallel>], iteration_bounds = array<i64: 1>, scalar_prefetch = 0 : i64, scratch_operands = 0 : i64, tpu.core_type = #tpu.core_type<tc>, window_params = [{transform_indices = @transform_0, window_bounds = array<i64: 8, 128>}, {pipeline_mode = #tpu.pipeline_mode<synchronous>, transform_indices = @transform_1, window_bounds = array<i64: 128, 64>}, {pipeline_mode = #tpu.pipeline_mode<synchronous>, transform_indices = @transform_2, window_bounds = array<i64: 1, 64>}, {transform_indices = @transform_3, window_bounds = array<i64: 8, 64>}]} {
    %c0 = arith.constant 0 : index
    %c0_0 = arith.constant 0 : index
    %0 = vector.load %arg1[%c0, %c0_0] : memref<8x128xf32, #tpu.memory_space<vmem>>, vector<8x128xf32>
    %c0_1 = arith.constant 0 : index
    %c0_2 = arith.constant 0 : index
    %1 = vector.load %arg2[%c0_1, %c0_2] : memref<128x64xf32, #tpu.memory_space<vmem>>, vector<128x64xf32>
    %cst = arith.constant dense<0.000000e+00> : vector<8x64xf32>
    %2 = tpu.matmul %0, %1, %cst {dimension_numbers = #tpu.dot_dimension_numbers<[1], [0], [0], [1], [0, 0, 1, 1], [], []>} : vector<8x128xf32>, vector<128x64xf32>, vector<8x64xf32> -> vector<8x64xf32>
    %c0_3 = arith.constant 0 : index
    %c0_4 = arith.constant 0 : index
    %3 = vector.load %arg3[%c0_3, %c0_4] : memref<1x64xf32, #tpu.memory_space<vmem>>, vector<1x64xf32>
    %4 = vector.broadcast %3 : vector<1x64xf32> to vector<8x64xf32>
    %5 = arith.addf %2, %4 : vector<8x64xf32>
    %c0_5 = arith.constant 0 : index
    %c0_6 = arith.constant 0 : index
    %6 = vector.load %arg4[%c0_5, %c0_6] : memref<8x64xf32, #tpu.memory_space<vmem>>, vector<8x64xf32>
    tpu.vector_store %arg4[%c0_5, %c0_6], %5 {strides = array<i32>} : memref<8x64xf32, #tpu.memory_space<vmem>>, vector<8x64xf32>,
    return
  }
  func.func @transform_0(%arg0: i32) -> (i32, i32) {
    %c0_i32 = arith.constant 0 : i32
    %c0_i32_0 = arith.constant 0 : i32
    return %arg0, %c0_i32 : i32, i32
  }
  func.func @transform_1(%arg0: i32) -> (i32, i32) {
    %c0_i32 = arith.constant 0 : i32
    %c0_i32_0 = arith.constant 0 : i32
    %c0_i32_1 = arith.constant 0 : i32
    return %c0_i32, %c0_i32_0 : i32, i32
  }
  func.func @transform_2(%arg0: i32) -> (i32, i32) {
    %c0_i32 = arith.constant 0 : i32
    %c0_i32_0 = arith.constant 0 : i32
    %c0_i32_1 = arith.constant 0 : i32
    return %c0_i32, %c0_i32_0 : i32, i32
  }
  func.func @transform_3(%arg0: i32) -> (i32, i32) {
    %c0_i32 = arith.constant 0 : i32
    %c0_i32_0 = arith.constant 0 : i32
    return %arg0, %c0_i32 : i32, i32
  }
}

module attributes {stable_mosaic.version = 11 : i64} {
  func.func @_tail_kernel(%arg0: i32, %arg1: memref<32x32xf32, #tpu.memory_space<vmem>>, %arg2: memref<32x64xf32, #tpu.memory_space<vmem>>, %arg3: memref<32x64xf32, #tpu.memory_space<vmem>>, %arg4: memref<1x32xf32, #tpu.memory_space<vmem>>, %arg5: memref<1x32xf32, #tpu.memory_space<vmem>>, %arg6: memref<1x64xf32, #tpu.memory_space<vmem>>, %arg7: memref<1x64xf32, #tpu.memory_space<vmem>>, %arg8: memref<1x64xf32, #tpu.memory_space<vmem>>, %arg9: memref<32x64xf32, #tpu.memory_space<vmem>>) attributes {dimension_semantics = [#tpu.dimension_semantics<parallel>], iteration_bounds = array<i64: 1>, scalar_prefetch = 0 : i64, scratch_operands = 0 : i64, tpu.core_type = #tpu.core_type<tc>, window_params = [{transform_indices = @transform_0, window_bounds = array<i64: 32, 32>}, {transform_indices = @transform_1, window_bounds = array<i64: 32, 64>}, {pipeline_mode = #tpu.pipeline_mode<synchronous>, transform_indices = @transform_2, window_bounds = array<i64: 32, 64>}, {pipeline_mode = #tpu.pipeline_mode<synchronous>, transform_indices = @transform_3, window_bounds = array<i64: 1, 32>}, {pipeline_mode = #tpu.pipeline_mode<synchronous>, transform_indices = @transform_4, window_bounds = array<i64: 1, 32>}, {pipeline_mode = #tpu.pipeline_mode<synchronous>, transform_indices = @transform_5, window_bounds = array<i64: 1, 64>}, {pipeline_mode = #tpu.pipeline_mode<synchronous>, transform_indices = @transform_6, window_bounds = array<i64: 1, 64>}, {pipeline_mode = #tpu.pipeline_mode<synchronous>, transform_indices = @transform_7, window_bounds = array<i64: 1, 64>}, {transform_indices = @transform_8, window_bounds = array<i64: 32, 64>}]} {
    %c0 = arith.constant 0 : index
    %c0_0 = arith.constant 0 : index
    %0 = vector.load %arg1[%c0, %c0_0] : memref<32x32xf32, #tpu.memory_space<vmem>>, vector<32x32xf32>
    %c0_1 = arith.constant 0 : index
    %c0_2 = arith.constant 0 : index
    %1 = vector.load %arg4[%c0_1, %c0_2] : memref<1x32xf32, #tpu.memory_space<vmem>>, vector<1x32xf32>
    %2 = vector.broadcast %1 : vector<1x32xf32> to vector<32x32xf32>
    %3 = arith.addf %0, %2 : vector<32x32xf32>
    %cst = arith.constant 0.000000e+00 : f32
    %4 = vector.broadcast %cst : f32 to vector<32x32xf32>
    %5 = arith.cmpf oge, %3, %4 : vector<32x32xf32>
    %c0_3 = arith.constant 0 : index
    %c0_4 = arith.constant 0 : index
    %6 = vector.load %arg5[%c0_3, %c0_4] : memref<1x32xf32, #tpu.memory_space<vmem>>, vector<1x32xf32>
    %7 = vector.broadcast %6 : vector<1x32xf32> to vector<32x32xf32>
    %8 = arith.mulf %7, %3 : vector<32x32xf32>
    %9 = arith.select %5, %3, %8 : vector<32x32xi1>, vector<32x32xf32>
    %c0_5 = arith.constant 0 : index
    %c0_6 = arith.constant 0 : index
    %10 = vector.load %arg3[%c0_5, %c0_6] : memref<32x64xf32, #tpu.memory_space<vmem>>, vector<32x64xf32>
    %cst_7 = arith.constant dense<0.000000e+00> : vector<32x64xf32>
    %11 = tpu.matmul %9, %10, %cst_7 {dimension_numbers = #tpu.dot_dimension_numbers<[1], [0], [0], [1], [0, 0, 1, 1], [], []>} : vector<32x32xf32>, vector<32x64xf32>, vector<32x64xf32> -> vector<32x64xf32>
    %c0_8 = arith.constant 0 : index
    %c0_9 = arith.constant 0 : index
    %12 = vector.load %arg6[%c0_8, %c0_9] : memref<1x64xf32, #tpu.memory_space<vmem>>, vector<1x64xf32>
    %13 = vector.broadcast %12 : vector<1x64xf32> to vector<32x64xf32>
    %14 = arith.addf %11, %13 : vector<32x64xf32>
    %cst_10 = arith.constant 0.000000e+00 : f32
    %15 = vector.broadcast %cst_10 : f32 to vector<32x64xf32>
    %16 = arith.cmpf oge, %14, %15 : vector<32x64xf32>
    %c0_11 = arith.constant 0 : index
    %c0_12 = arith.constant 0 : index
    %17 = vector.load %arg7[%c0_11, %c0_12] : memref<1x64xf32, #tpu.memory_space<vmem>>, vector<1x64xf32>
    %18 = vector.broadcast %17 : vector<1x64xf32> to vector<32x64xf32>
    %19 = arith.mulf %18, %14 : vector<32x64xf32>
    %20 = arith.select %16, %14, %19 : vector<32x64xi1>, vector<32x64xf32>
    %c0_13 = arith.constant 0 : index
    %c0_14 = arith.constant 0 : index
    %21 = vector.load %arg2[%c0_13, %c0_14] : memref<32x64xf32, #tpu.memory_space<vmem>>, vector<32x64xf32>
    %22 = arith.addf %20, %21 : vector<32x64xf32>
    %cst_15 = arith.constant 0.000000e+00 : f32
    %23 = vector.broadcast %cst_15 : f32 to vector<32x64xf32>
    %24 = arith.cmpf oge, %22, %23 : vector<32x64xf32>
    %c0_16 = arith.constant 0 : index
    %c0_17 = arith.constant 0 : index
    %25 = vector.load %arg8[%c0_16, %c0_17] : memref<1x64xf32, #tpu.memory_space<vmem>>, vector<1x64xf32>
    %26 = vector.broadcast %25 : vector<1x64xf32> to vector<32x64xf32>
    %27 = arith.mulf %26, %22 : vector<32x64xf32>
    %28 = arith.select %24, %22, %27 : vector<32x64xi1>, vector<32x64xf32>
    %c0_18 = arith.constant 0 : index
    %c0_19 = arith.constant 0 : index
    %29 = vector.load %arg9[%c0_18, %c0_19] : memref<32x64xf32, #tpu.memory_space<vmem>>, vector<32x64xf32>
    tpu.vector_store %arg9[%c0_18, %c0_19], %28 {strides = array<i32>} : memref<32x64xf32, #tpu.memory_space<vmem>>, vector<32x64xf32>,
    return
  }
  func.func @transform_0(%arg0: i32) -> (i32, i32) {
    %c0_i32 = arith.constant 0 : i32
    %c0_i32_0 = arith.constant 0 : i32
    return %arg0, %c0_i32 : i32, i32
  }
  func.func @transform_1(%arg0: i32) -> (i32, i32) {
    %c0_i32 = arith.constant 0 : i32
    %c0_i32_0 = arith.constant 0 : i32
    return %arg0, %c0_i32 : i32, i32
  }
  func.func @transform_2(%arg0: i32) -> (i32, i32) {
    %c0_i32 = arith.constant 0 : i32
    %c0_i32_0 = arith.constant 0 : i32
    %c0_i32_1 = arith.constant 0 : i32
    return %c0_i32, %c0_i32_0 : i32, i32
  }
  func.func @transform_3(%arg0: i32) -> (i32, i32) {
    %c0_i32 = arith.constant 0 : i32
    %c0_i32_0 = arith.constant 0 : i32
    %c0_i32_1 = arith.constant 0 : i32
    return %c0_i32, %c0_i32_0 : i32, i32
  }
  func.func @transform_4(%arg0: i32) -> (i32, i32) {
    %c0_i32 = arith.constant 0 : i32
    %c0_i32_0 = arith.constant 0 : i32
    %c0_i32_1 = arith.constant 0 : i32
    return %c0_i32, %c0_i32_0 : i32, i32
  }
  func.func @transform_5(%arg0: i32) -> (i32, i32) {
    %c0_i32 = arith.constant 0 : i32
    %c0_i32_0 = arith.constant 0 : i32
    %c0_i32_1 = arith.constant 0 : i32
    return %c0_i32, %c0_i32_0 : i32, i32
  }
  func.func @transform_6(%arg0: i32) -> (i32, i32) {
    %c0_i32 = arith.constant 0 : i32
    %c0_i32_0 = arith.constant 0 : i32
    %c0_i32_1 = arith.constant 0 : i32
    return %c0_i32, %c0_i32_0 : i32, i32
  }
  func.func @transform_7(%arg0: i32) -> (i32, i32) {
    %c0_i32 = arith.constant 0 : i32
    %c0_i32_0 = arith.constant 0 : i32
    %c0_i32_1 = arith.constant 0 : i32
    return %c0_i32, %c0_i32_0 : i32, i32
  }
  func.func @transform_8(%arg0: i32) -> (i32, i32) {
    %c0_i32 = arith.constant 0 : i32
    %c0_i32_0 = arith.constant 0 : i32
    return %arg0, %c0_i32 : i32, i32
  }
}

module attributes {stable_mosaic.version = 11 : i64} {
  func.func @_matmul_bias_kernel(%arg0: i32, %arg1: memref<32x64xf32, #tpu.memory_space<vmem>>, %arg2: memref<64x16xf32, #tpu.memory_space<vmem>>, %arg3: memref<1x16xf32, #tpu.memory_space<vmem>>, %arg4: memref<32x16xf32, #tpu.memory_space<vmem>>) attributes {dimension_semantics = [#tpu.dimension_semantics<parallel>], iteration_bounds = array<i64: 1>, scalar_prefetch = 0 : i64, scratch_operands = 0 : i64, tpu.core_type = #tpu.core_type<tc>, window_params = [{transform_indices = @transform_0, window_bounds = array<i64: 32, 64>}, {pipeline_mode = #tpu.pipeline_mode<synchronous>, transform_indices = @transform_1, window_bounds = array<i64: 64, 16>}, {pipeline_mode = #tpu.pipeline_mode<synchronous>, transform_indices = @transform_2, window_bounds = array<i64: 1, 16>}, {transform_indices = @transform_3, window_bounds = array<i64: 32, 16>}]} {
    %c0 = arith.constant 0 : index
    %c0_0 = arith.constant 0 : index
    %0 = vector.load %arg1[%c0, %c0_0] : memref<32x64xf32, #tpu.memory_space<vmem>>, vector<32x64xf32>
    %c0_1 = arith.constant 0 : index
    %c0_2 = arith.constant 0 : index
    %1 = vector.load %arg2[%c0_1, %c0_2] : memref<64x16xf32, #tpu.memory_space<vmem>>, vector<64x16xf32>
    %cst = arith.constant dense<0.000000e+00> : vector<32x16xf32>
    %2 = tpu.matmul %0, %1, %cst {dimension_numbers = #tpu.dot_dimension_numbers<[1], [0], [0], [1], [0, 0, 1, 1], [], []>} : vector<32x64xf32>, vector<64x16xf32>, vector<32x16xf32> -> vector<32x16xf32>
    %c0_3 = arith.constant 0 : index
    %c0_4 = arith.constant 0 : index
    %3 = vector.load %arg3[%c0_3, %c0_4] : memref<1x16xf32, #tpu.memory_space<vmem>>, vector<1x16xf32>
    %4 = vector.broadcast %3 : vector<1x16xf32> to vector<32x16xf32>
    %5 = arith.addf %2, %4 : vector<32x16xf32>
    %c0_5 = arith.constant 0 : index
    %c0_6 = arith.constant 0 : index
    %6 = vector.load %arg4[%c0_5, %c0_6] : memref<32x16xf32, #tpu.memory_space<vmem>>, vector<32x16xf32>
    tpu.vector_store %arg4[%c0_5, %c0_6], %5 {strides = array<i32>} : memref<32x16xf32, #tpu.memory_space<vmem>>, vector<32x16xf32>,
    return
  }
  func.func @transform_0(%arg0: i32) -> (i32, i32) {
    %c0_i32 = arith.constant 0 : i32
    %c0_i32_0 = arith.constant 0 : i32
    return %arg0, %c0_i32 : i32, i32
  }
  func.func @transform_1(%arg0: i32) -> (i32, i32) {
    %c0_i32 = arith.constant 0 : i32
    %c0_i32_0 = arith.constant 0 : i32
    %c0_i32_1 = arith.constant 0 : i32
    return %c0_i32, %c0_i32_0 : i32, i32
  }
  func.func @transform_2(%arg0: i32) -> (i32, i32) {
    %c0_i32 = arith.constant 0 : i32
    %c0_i32_0 = arith.constant 0 : i32
    %c0_i32_1 = arith.constant 0 : i32
    return %c0_i32, %c0_i32_0 : i32, i32
  }
  func.func @transform_3(%arg0: i32) -> (i32, i32) {
    %c0_i32 = arith.constant 0 : i32
    %c0_i32_0 = arith.constant 0 : i32
    return %arg0, %c0_i32 : i32, i32
  }
}

module attributes {stable_mosaic.version = 11 : i64} {
  func.func @_tail_kernel(%arg0: i32, %arg1: memref<128x16xf32, #tpu.memory_space<vmem>>, %arg2: memref<128x16xf32, #tpu.memory_space<vmem>>, %arg3: memref<16x16xf32, #tpu.memory_space<vmem>>, %arg4: memref<1x16xf32, #tpu.memory_space<vmem>>, %arg5: memref<1x16xf32, #tpu.memory_space<vmem>>, %arg6: memref<1x16xf32, #tpu.memory_space<vmem>>, %arg7: memref<1x16xf32, #tpu.memory_space<vmem>>, %arg8: memref<1x16xf32, #tpu.memory_space<vmem>>, %arg9: memref<128x16xf32, #tpu.memory_space<vmem>>) attributes {dimension_semantics = [#tpu.dimension_semantics<parallel>], iteration_bounds = array<i64: 1>, scalar_prefetch = 0 : i64, scratch_operands = 0 : i64, tpu.core_type = #tpu.core_type<tc>, window_params = [{transform_indices = @transform_0, window_bounds = array<i64: 128, 16>}, {transform_indices = @transform_1, window_bounds = array<i64: 128, 16>}, {pipeline_mode = #tpu.pipeline_mode<synchronous>, transform_indices = @transform_2, window_bounds = array<i64: 16, 16>}, {pipeline_mode = #tpu.pipeline_mode<synchronous>, transform_indices = @transform_3, window_bounds = array<i64: 1, 16>}, {pipeline_mode = #tpu.pipeline_mode<synchronous>, transform_indices = @transform_4, window_bounds = array<i64: 1, 16>}, {pipeline_mode = #tpu.pipeline_mode<synchronous>, transform_indices = @transform_5, window_bounds = array<i64: 1, 16>}, {pipeline_mode = #tpu.pipeline_mode<synchronous>, transform_indices = @transform_6, window_bounds = array<i64: 1, 16>}, {pipeline_mode = #tpu.pipeline_mode<synchronous>, transform_indices = @transform_7, window_bounds = array<i64: 1, 16>}, {transform_indices = @transform_8, window_bounds = array<i64: 128, 16>}]} {
    %c0 = arith.constant 0 : index
    %c0_0 = arith.constant 0 : index
    %0 = vector.load %arg1[%c0, %c0_0] : memref<128x16xf32, #tpu.memory_space<vmem>>, vector<128x16xf32>
    %c0_1 = arith.constant 0 : index
    %c0_2 = arith.constant 0 : index
    %1 = vector.load %arg4[%c0_1, %c0_2] : memref<1x16xf32, #tpu.memory_space<vmem>>, vector<1x16xf32>
    %2 = vector.broadcast %1 : vector<1x16xf32> to vector<128x16xf32>
    %3 = arith.addf %0, %2 : vector<128x16xf32>
    %cst = arith.constant 0.000000e+00 : f32
    %4 = vector.broadcast %cst : f32 to vector<128x16xf32>
    %5 = arith.cmpf oge, %3, %4 : vector<128x16xf32>
    %c0_3 = arith.constant 0 : index
    %c0_4 = arith.constant 0 : index
    %6 = vector.load %arg5[%c0_3, %c0_4] : memref<1x16xf32, #tpu.memory_space<vmem>>, vector<1x16xf32>
    %7 = vector.broadcast %6 : vector<1x16xf32> to vector<128x16xf32>
    %8 = arith.mulf %7, %3 : vector<128x16xf32>
    %9 = arith.select %5, %3, %8 : vector<128x16xi1>, vector<128x16xf32>
    %c0_5 = arith.constant 0 : index
    %c0_6 = arith.constant 0 : index
    %10 = vector.load %arg3[%c0_5, %c0_6] : memref<16x16xf32, #tpu.memory_space<vmem>>, vector<16x16xf32>
    %cst_7 = arith.constant dense<0.000000e+00> : vector<128x16xf32>
    %11 = tpu.matmul %9, %10, %cst_7 {dimension_numbers = #tpu.dot_dimension_numbers<[1], [0], [0], [1], [0, 0, 1, 1], [], []>} : vector<128x16xf32>, vector<16x16xf32>, vector<128x16xf32> -> vector<128x16xf32>
    %c0_8 = arith.constant 0 : index
    %c0_9 = arith.constant 0 : index
    %12 = vector.load %arg6[%c0_8, %c0_9] : memref<1x16xf32, #tpu.memory_space<vmem>>, vector<1x16xf32>
    %13 = vector.broadcast %12 : vector<1x16xf32> to vector<128x16xf32>
    %14 = arith.addf %11, %13 : vector<128x16xf32>
    %cst_10 = arith.constant 0.000000e+00 : f32
    %15 = vector.broadcast %cst_10 : f32 to vector<128x16xf32>
    %16 = arith.cmpf oge, %14, %15 : vector<128x16xf32>
    %c0_11 = arith.constant 0 : index
    %c0_12 = arith.constant 0 : index
    %17 = vector.load %arg7[%c0_11, %c0_12] : memref<1x16xf32, #tpu.memory_space<vmem>>, vector<1x16xf32>
    %18 = vector.broadcast %17 : vector<1x16xf32> to vector<128x16xf32>
    %19 = arith.mulf %18, %14 : vector<128x16xf32>
    %20 = arith.select %16, %14, %19 : vector<128x16xi1>, vector<128x16xf32>
    %c0_13 = arith.constant 0 : index
    %c0_14 = arith.constant 0 : index
    %21 = vector.load %arg2[%c0_13, %c0_14] : memref<128x16xf32, #tpu.memory_space<vmem>>, vector<128x16xf32>
    %22 = arith.addf %20, %21 : vector<128x16xf32>
    %cst_15 = arith.constant 0.000000e+00 : f32
    %23 = vector.broadcast %cst_15 : f32 to vector<128x16xf32>
    %24 = arith.cmpf oge, %22, %23 : vector<128x16xf32>
    %c0_16 = arith.constant 0 : index
    %c0_17 = arith.constant 0 : index
    %25 = vector.load %arg8[%c0_16, %c0_17] : memref<1x16xf32, #tpu.memory_space<vmem>>, vector<1x16xf32>
    %26 = vector.broadcast %25 : vector<1x16xf32> to vector<128x16xf32>
    %27 = arith.mulf %26, %22 : vector<128x16xf32>
    %28 = arith.select %24, %22, %27 : vector<128x16xi1>, vector<128x16xf32>
    %c0_18 = arith.constant 0 : index
    %c0_19 = arith.constant 0 : index
    %29 = vector.load %arg9[%c0_18, %c0_19] : memref<128x16xf32, #tpu.memory_space<vmem>>, vector<128x16xf32>
    tpu.vector_store %arg9[%c0_18, %c0_19], %28 {strides = array<i32>} : memref<128x16xf32, #tpu.memory_space<vmem>>, vector<128x16xf32>,
    return
  }
  func.func @transform_0(%arg0: i32) -> (i32, i32) {
    %c0_i32 = arith.constant 0 : i32
    %c0_i32_0 = arith.constant 0 : i32
    return %arg0, %c0_i32 : i32, i32
  }
  func.func @transform_1(%arg0: i32) -> (i32, i32) {
    %c0_i32 = arith.constant 0 : i32
    %c0_i32_0 = arith.constant 0 : i32
    return %arg0, %c0_i32 : i32, i32
  }
  func.func @transform_2(%arg0: i32) -> (i32, i32) {
    %c0_i32 = arith.constant 0 : i32
    %c0_i32_0 = arith.constant 0 : i32
    %c0_i32_1 = arith.constant 0 : i32
    return %c0_i32, %c0_i32_0 : i32, i32
  }
  func.func @transform_3(%arg0: i32) -> (i32, i32) {
    %c0_i32 = arith.constant 0 : i32
    %c0_i32_0 = arith.constant 0 : i32
    %c0_i32_1 = arith.constant 0 : i32
    return %c0_i32, %c0_i32_0 : i32, i32
  }
  func.func @transform_4(%arg0: i32) -> (i32, i32) {
    %c0_i32 = arith.constant 0 : i32
    %c0_i32_0 = arith.constant 0 : i32
    %c0_i32_1 = arith.constant 0 : i32
    return %c0_i32, %c0_i32_0 : i32, i32
  }
  func.func @transform_5(%arg0: i32) -> (i32, i32) {
    %c0_i32 = arith.constant 0 : i32
    %c0_i32_0 = arith.constant 0 : i32
    %c0_i32_1 = arith.constant 0 : i32
    return %c0_i32, %c0_i32_0 : i32, i32
  }
  func.func @transform_6(%arg0: i32) -> (i32, i32) {
    %c0_i32 = arith.constant 0 : i32
    %c0_i32_0 = arith.constant 0 : i32
    %c0_i32_1 = arith.constant 0 : i32
    return %c0_i32, %c0_i32_0 : i32, i32
  }
  func.func @transform_7(%arg0: i32) -> (i32, i32) {
    %c0_i32 = arith.constant 0 : i32
    %c0_i32_0 = arith.constant 0 : i32
    %c0_i32_1 = arith.constant 0 : i32
    return %c0_i32, %c0_i32_0 : i32, i32
  }
  func.func @transform_8(%arg0: i32) -> (i32, i32) {
    %c0_i32 = arith.constant 0 : i32
    %c0_i32_0 = arith.constant 0 : i32
    return %arg0, %c0_i32 : i32, i32
  }
}

module attributes {stable_mosaic.version = 11 : i64} {
  func.func @_matmul_bias_prelu_kernel(%arg0: i32, %arg1: memref<128x16xf32, #tpu.memory_space<vmem>>, %arg2: memref<16x4xf32, #tpu.memory_space<vmem>>, %arg3: memref<1x4xf32, #tpu.memory_space<vmem>>, %arg4: memref<1x4xf32, #tpu.memory_space<vmem>>, %arg5: memref<128x4xf32, #tpu.memory_space<vmem>>) attributes {dimension_semantics = [#tpu.dimension_semantics<parallel>], iteration_bounds = array<i64: 1>, scalar_prefetch = 0 : i64, scratch_operands = 0 : i64, tpu.core_type = #tpu.core_type<tc>, window_params = [{transform_indices = @transform_0, window_bounds = array<i64: 128, 16>}, {pipeline_mode = #tpu.pipeline_mode<synchronous>, transform_indices = @transform_1, window_bounds = array<i64: 16, 4>}, {pipeline_mode = #tpu.pipeline_mode<synchronous>, transform_indices = @transform_2, window_bounds = array<i64: 1, 4>}, {pipeline_mode = #tpu.pipeline_mode<synchronous>, transform_indices = @transform_3, window_bounds = array<i64: 1, 4>}, {transform_indices = @transform_4, window_bounds = array<i64: 128, 4>}]} {
    %c0 = arith.constant 0 : index
    %c0_0 = arith.constant 0 : index
    %0 = vector.load %arg1[%c0, %c0_0] : memref<128x16xf32, #tpu.memory_space<vmem>>, vector<128x16xf32>
    %c0_1 = arith.constant 0 : index
    %c0_2 = arith.constant 0 : index
    %1 = vector.load %arg2[%c0_1, %c0_2] : memref<16x4xf32, #tpu.memory_space<vmem>>, vector<16x4xf32>
    %cst = arith.constant dense<0.000000e+00> : vector<128x4xf32>
    %2 = tpu.matmul %0, %1, %cst {dimension_numbers = #tpu.dot_dimension_numbers<[1], [0], [0], [1], [0, 0, 1, 1], [], []>} : vector<128x16xf32>, vector<16x4xf32>, vector<128x4xf32> -> vector<128x4xf32>
    %c0_3 = arith.constant 0 : index
    %c0_4 = arith.constant 0 : index
    %3 = vector.load %arg3[%c0_3, %c0_4] : memref<1x4xf32, #tpu.memory_space<vmem>>, vector<1x4xf32>
    %4 = vector.broadcast %3 : vector<1x4xf32> to vector<128x4xf32>
    %5 = arith.addf %2, %4 : vector<128x4xf32>
    %cst_5 = arith.constant 0.000000e+00 : f32
    %6 = vector.broadcast %cst_5 : f32 to vector<128x4xf32>
    %7 = arith.cmpf oge, %5, %6 : vector<128x4xf32>
    %c0_6 = arith.constant 0 : index
    %c0_7 = arith.constant 0 : index
    %8 = vector.load %arg4[%c0_6, %c0_7] : memref<1x4xf32, #tpu.memory_space<vmem>>, vector<1x4xf32>
    %9 = vector.broadcast %8 : vector<1x4xf32> to vector<128x4xf32>
    %10 = arith.mulf %9, %5 : vector<128x4xf32>
    %11 = arith.select %7, %5, %10 : vector<128x4xi1>, vector<128x4xf32>
    %c0_8 = arith.constant 0 : index
    %c0_9 = arith.constant 0 : index
    %12 = vector.load %arg5[%c0_8, %c0_9] : memref<128x4xf32, #tpu.memory_space<vmem>>, vector<128x4xf32>
    tpu.vector_store %arg5[%c0_8, %c0_9], %11 {strides = array<i32>} : memref<128x4xf32, #tpu.memory_space<vmem>>, vector<128x4xf32>,
    return
  }
  func.func @transform_0(%arg0: i32) -> (i32, i32) {
    %c0_i32 = arith.constant 0 : i32
    %c0_i32_0 = arith.constant 0 : i32
    return %arg0, %c0_i32 : i32, i32
  }
  func.func @transform_1(%arg0: i32) -> (i32, i32) {
    %c0_i32 = arith.constant 0 : i32
    %c0_i32_0 = arith.constant 0 : i32
    %c0_i32_1 = arith.constant 0 : i32
    return %c0_i32, %c0_i32_0 : i32, i32
  }
  func.func @transform_2(%arg0: i32) -> (i32, i32) {
    %c0_i32 = arith.constant 0 : i32
    %c0_i32_0 = arith.constant 0 : i32
    %c0_i32_1 = arith.constant 0 : i32
    return %c0_i32, %c0_i32_0 : i32, i32
  }
  func.func @transform_3(%arg0: i32) -> (i32, i32) {
    %c0_i32 = arith.constant 0 : i32
    %c0_i32_0 = arith.constant 0 : i32
    %c0_i32_1 = arith.constant 0 : i32
    return %c0_i32, %c0_i32_0 : i32, i32
  }
  func.func @transform_4(%arg0: i32) -> (i32, i32) {
    %c0_i32 = arith.constant 0 : i32
    %c0_i32_0 = arith.constant 0 : i32
    return %arg0, %c0_i32 : i32, i32
  }
}

module attributes {stable_mosaic.version = 11 : i64} {
  func.func @_tail_kernel(%arg0: i32, %arg1: memref<128x4xf32, #tpu.memory_space<vmem>>, %arg2: memref<128x16xf32, #tpu.memory_space<vmem>>, %arg3: memref<4x16xf32, #tpu.memory_space<vmem>>, %arg4: memref<1x4xf32, #tpu.memory_space<vmem>>, %arg5: memref<1x4xf32, #tpu.memory_space<vmem>>, %arg6: memref<1x16xf32, #tpu.memory_space<vmem>>, %arg7: memref<1x16xf32, #tpu.memory_space<vmem>>, %arg8: memref<1x16xf32, #tpu.memory_space<vmem>>, %arg9: memref<128x16xf32, #tpu.memory_space<vmem>>) attributes {dimension_semantics = [#tpu.dimension_semantics<parallel>], iteration_bounds = array<i64: 1>, scalar_prefetch = 0 : i64, scratch_operands = 0 : i64, tpu.core_type = #tpu.core_type<tc>, window_params = [{transform_indices = @transform_0, window_bounds = array<i64: 128, 4>}, {transform_indices = @transform_1, window_bounds = array<i64: 128, 16>}, {pipeline_mode = #tpu.pipeline_mode<synchronous>, transform_indices = @transform_2, window_bounds = array<i64: 4, 16>}, {pipeline_mode = #tpu.pipeline_mode<synchronous>, transform_indices = @transform_3, window_bounds = array<i64: 1, 4>}, {pipeline_mode = #tpu.pipeline_mode<synchronous>, transform_indices = @transform_4, window_bounds = array<i64: 1, 4>}, {pipeline_mode = #tpu.pipeline_mode<synchronous>, transform_indices = @transform_5, window_bounds = array<i64: 1, 16>}, {pipeline_mode = #tpu.pipeline_mode<synchronous>, transform_indices = @transform_6, window_bounds = array<i64: 1, 16>}, {pipeline_mode = #tpu.pipeline_mode<synchronous>, transform_indices = @transform_7, window_bounds = array<i64: 1, 16>}, {transform_indices = @transform_8, window_bounds = array<i64: 128, 16>}]} {
    %c0 = arith.constant 0 : index
    %c0_0 = arith.constant 0 : index
    %0 = vector.load %arg1[%c0, %c0_0] : memref<128x4xf32, #tpu.memory_space<vmem>>, vector<128x4xf32>
    %c0_1 = arith.constant 0 : index
    %c0_2 = arith.constant 0 : index
    %1 = vector.load %arg4[%c0_1, %c0_2] : memref<1x4xf32, #tpu.memory_space<vmem>>, vector<1x4xf32>
    %2 = vector.broadcast %1 : vector<1x4xf32> to vector<128x4xf32>
    %3 = arith.addf %0, %2 : vector<128x4xf32>
    %cst = arith.constant 0.000000e+00 : f32
    %4 = vector.broadcast %cst : f32 to vector<128x4xf32>
    %5 = arith.cmpf oge, %3, %4 : vector<128x4xf32>
    %c0_3 = arith.constant 0 : index
    %c0_4 = arith.constant 0 : index
    %6 = vector.load %arg5[%c0_3, %c0_4] : memref<1x4xf32, #tpu.memory_space<vmem>>, vector<1x4xf32>
    %7 = vector.broadcast %6 : vector<1x4xf32> to vector<128x4xf32>
    %8 = arith.mulf %7, %3 : vector<128x4xf32>
    %9 = arith.select %5, %3, %8 : vector<128x4xi1>, vector<128x4xf32>
    %c0_5 = arith.constant 0 : index
    %c0_6 = arith.constant 0 : index
    %10 = vector.load %arg3[%c0_5, %c0_6] : memref<4x16xf32, #tpu.memory_space<vmem>>, vector<4x16xf32>
    %cst_7 = arith.constant dense<0.000000e+00> : vector<128x16xf32>
    %11 = tpu.matmul %9, %10, %cst_7 {dimension_numbers = #tpu.dot_dimension_numbers<[1], [0], [0], [1], [0, 0, 1, 1], [], []>} : vector<128x4xf32>, vector<4x16xf32>, vector<128x16xf32> -> vector<128x16xf32>
    %c0_8 = arith.constant 0 : index
    %c0_9 = arith.constant 0 : index
    %12 = vector.load %arg6[%c0_8, %c0_9] : memref<1x16xf32, #tpu.memory_space<vmem>>, vector<1x16xf32>
    %13 = vector.broadcast %12 : vector<1x16xf32> to vector<128x16xf32>
    %14 = arith.addf %11, %13 : vector<128x16xf32>
    %cst_10 = arith.constant 0.000000e+00 : f32
    %15 = vector.broadcast %cst_10 : f32 to vector<128x16xf32>
    %16 = arith.cmpf oge, %14, %15 : vector<128x16xf32>
    %c0_11 = arith.constant 0 : index
    %c0_12 = arith.constant 0 : index
    %17 = vector.load %arg7[%c0_11, %c0_12] : memref<1x16xf32, #tpu.memory_space<vmem>>, vector<1x16xf32>
    %18 = vector.broadcast %17 : vector<1x16xf32> to vector<128x16xf32>
    %19 = arith.mulf %18, %14 : vector<128x16xf32>
    %20 = arith.select %16, %14, %19 : vector<128x16xi1>, vector<128x16xf32>
    %c0_13 = arith.constant 0 : index
    %c0_14 = arith.constant 0 : index
    %21 = vector.load %arg2[%c0_13, %c0_14] : memref<128x16xf32, #tpu.memory_space<vmem>>, vector<128x16xf32>
    %22 = arith.addf %20, %21 : vector<128x16xf32>
    %cst_15 = arith.constant 0.000000e+00 : f32
    %23 = vector.broadcast %cst_15 : f32 to vector<128x16xf32>
    %24 = arith.cmpf oge, %22, %23 : vector<128x16xf32>
    %c0_16 = arith.constant 0 : index
    %c0_17 = arith.constant 0 : index
    %25 = vector.load %arg8[%c0_16, %c0_17] : memref<1x16xf32, #tpu.memory_space<vmem>>, vector<1x16xf32>
    %26 = vector.broadcast %25 : vector<1x16xf32> to vector<128x16xf32>
    %27 = arith.mulf %26, %22 : vector<128x16xf32>
    %28 = arith.select %24, %22, %27 : vector<128x16xi1>, vector<128x16xf32>
    %c0_18 = arith.constant 0 : index
    %c0_19 = arith.constant 0 : index
    %29 = vector.load %arg9[%c0_18, %c0_19] : memref<128x16xf32, #tpu.memory_space<vmem>>, vector<128x16xf32>
    tpu.vector_store %arg9[%c0_18, %c0_19], %28 {strides = array<i32>} : memref<128x16xf32, #tpu.memory_space<vmem>>, vector<128x16xf32>,
    return
  }
  func.func @transform_0(%arg0: i32) -> (i32, i32) {
    %c0_i32 = arith.constant 0 : i32
    %c0_i32_0 = arith.constant 0 : i32
    return %arg0, %c0_i32 : i32, i32
  }
  func.func @transform_1(%arg0: i32) -> (i32, i32) {
    %c0_i32 = arith.constant 0 : i32
    %c0_i32_0 = arith.constant 0 : i32
    return %arg0, %c0_i32 : i32, i32
  }
  func.func @transform_2(%arg0: i32) -> (i32, i32) {
    %c0_i32 = arith.constant 0 : i32
    %c0_i32_0 = arith.constant 0 : i32
    %c0_i32_1 = arith.constant 0 : i32
    return %c0_i32, %c0_i32_0 : i32, i32
  }
  func.func @transform_3(%arg0: i32) -> (i32, i32) {
    %c0_i32 = arith.constant 0 : i32
    %c0_i32_0 = arith.constant 0 : i32
    %c0_i32_1 = arith.constant 0 : i32
    return %c0_i32, %c0_i32_0 : i32, i32
  }
  func.func @transform_4(%arg0: i32) -> (i32, i32) {
    %c0_i32 = arith.constant 0 : i32
    %c0_i32_0 = arith.constant 0 : i32
    %c0_i32_1 = arith.constant 0 : i32
    return %c0_i32, %c0_i32_0 : i32, i32
  }
  func.func @transform_5(%arg0: i32) -> (i32, i32) {
    %c0_i32 = arith.constant 0 : i32
    %c0_i32_0 = arith.constant 0 : i32
    %c0_i32_1 = arith.constant 0 : i32
    return %c0_i32, %c0_i32_0 : i32, i32
  }
  func.func @transform_6(%arg0: i32) -> (i32, i32) {
    %c0_i32 = arith.constant 0 : i32
    %c0_i32_0 = arith.constant 0 : i32
    %c0_i32_1 = arith.constant 0 : i32
    return %c0_i32, %c0_i32_0 : i32, i32
  }
  func.func @transform_7(%arg0: i32) -> (i32, i32) {
    %c0_i32 = arith.constant 0 : i32
    %c0_i32_0 = arith.constant 0 : i32
    %c0_i32_1 = arith.constant 0 : i32
    return %c0_i32, %c0_i32_0 : i32, i32
  }
  func.func @transform_8(%arg0: i32) -> (i32, i32) {
    %c0_i32 = arith.constant 0 : i32
    %c0_i32_0 = arith.constant 0 : i32
    return %arg0, %c0_i32 : i32, i32
  }
}

</mosaic_0001>

<bundles_post_ra>
// kernel: _lambda_.61
= control target key start
LH: loop header
LB: loop body
LE: loop exit
PB: predicated region body
PF: predicated region fallthrough
CT: control target
= control target key end

     0   :  { %s84_s0 = inlined_call_operand.vmem [shape: f32[16,128], index: 0, kind: input, shape index: {}]   ;;  %s85_s1 = inlined_call_operand.vmem [shape: f32[1,128], index: 1, kind: input, shape index: {}]   ;;  %s86_s2 = inlined_call_operand.vmem [shape: f32[1,128], index: 2, kind: input, shape index: {}]   ;;  %s87_s3 = inlined_call_operand.vmem [shape: f32[16,128], index: 3, kind: output, shape index: {}]  }
   0x1   :  { %v14_v0 = vld [vmem:[%s84_s0] sm:$0xff]  ;;  %v15_v4 = vld [vmem:[%s84_s0 + $0x8] sm:$0xff] }
   0x2   :  { %v44_v1 = vld [vmem:[%s85_s1] ss:$0 sm:$0xff] }
   0x3   :  { %v45_v2 = vld [vmem:[%s86_s2] ss:$0 sm:$0xff]  ;;  %v23_v3 = vadd.f32 %v44_v1, %v14_v0  ;;  %v24_v5 = vadd.f32 %v44_v1, %v15_v4 }
   0x5   :  { %vm25_vm0 = vcmp.ge.f32.partialorder %v23_v3, 0.0  ;;  %v34_v6 = vmul.f32 %v45_v2, %v23_v3  ;;  %vm26_vm1 = vcmp.ge.f32.partialorder %v24_v5, 0.0  ;;  %v35_v7 = vmul.f32 %v45_v2, %v24_v5 }
   0x7   :  { %v36_v8 = vsel %vm25_vm0, %v23_v3, %v34_v6  ;;  %v37_v9 = vsel %vm26_vm1, %v24_v5, %v35_v7 }
   0x8   :  { %38 = vst [vmem:[%s87_s3] sm:$0xff] %v36_v8  ;;  %39 = vst [vmem:[%s87_s3 + $0x8] sm:$0xff] %v37_v9 }

// kernel: _lambda_.62
= control target key start
LH: loop header
LB: loop body
LE: loop exit
PB: predicated region body
PF: predicated region fallthrough
CT: control target
= control target key end

     0   :  { %s107_s0 = inlined_call_operand.vmem [shape: f32[1,128], index: 0, kind: input, shape index: {}]   ;;  %s108_s1 = inlined_call_operand.vmem [shape: f32[1,128], index: 1, kind: input, shape index: {}]   ;;  %s109_s2 = inlined_call_operand.vmem [shape: f32[1,128], index: 2, kind: input, shape index: {}]   ;;  %s110_s3 = inlined_call_operand.vmem [shape: f32[1,128], index: 3, kind: output, shape index: {}]  }
   0x1   :  { %v14_v0 = vld [vmem:[%s107_s0] sm:$0xff] }
   0x2   :  { %v73_v1 = vld [vmem:[%s108_s1] ss:$0 sm:$0xff] }
   0x3   :  { %v74_v2 = vld [vmem:[%s109_s2] ss:$0 sm:$0xff]  ;;  %v22_v3 = vadd.f32 %v73_v1, %v14_v0 }
   0x5   :  { %vm23_vm0 = vcmp.ge.f32.partialorder %v22_v3, 0.0  ;;  %v31_v4 = vmul.f32 %v74_v2, %v22_v3 }
   0x7   :  { %v32_v5 = vsel %vm23_vm0, %v22_v3, %v31_v4 }
   0x8   :  { %33 = vst [vmem:[#allocation2] sm:$0xff] %v32_v5 }
   0xf   :  { %v51_v6 = vld [vmem:[#allocation2] sm:$0x1] }
  0x10   :  { %52 = vst [vmem:[%s110_s3] sm:$0x1] %v51_v6 }

// kernel: _lambda_.63
= control target key start
LH: loop header
LB: loop body
LE: loop exit
PB: predicated region body
PF: predicated region fallthrough
CT: control target
= control target key end

     0   :  { %vm84_vm0 = vcmask 1043456   ;;  %vm71_vm2 = vcmask 31744   ;;  %vm219_vm11 = vcmask 523264   ;;  %s352_s2 = inlined_call_operand.vmem [shape: f32[4,64], index: 2, kind: input, shape index: {}]   ;;  %s353_s0 = inlined_call_operand.vmem [shape: f32[32,4], index: 0, kind: input, shape index: {}]   ;;  %s354_s3 = inlined_call_operand.vmem [shape: f32[1,4], index: 3, kind: input, shape index: {}]   ;;  %s355_s4 = inlined_call_operand.vmem [shape: f32[1,4], index: 4, kind: input, shape index: {}]   ;;  %s356_s5 = inlined_call_operand.vmem [shape: f32[1,64], index: 5, kind: input, shape index: {}]   ;;  %s357_s6 = inlined_call_operand.vmem [shape: f32[1,64], index: 6, kind: input, shape index: {}, may-alias: {6,7}]   ;;  %s358_s1 = inlined_call_operand.vmem [shape: f32[32,64], index: 1, kind: input, shape index: {}]   ;;  %s359_s7 = inlined_call_operand.vmem [shape: f32[1,64], index: 7, kind: input, shape index: {}, may-alias: {6,7}]   ;;  %s360_s8 = inlined_call_operand.vmem [shape: f32[32,64], index: 8, kind: output, shape index: {}]  }
   0x1   :  { %v63_v0 = vld [vmem:[%s352_s2] sm:$0xf]  ;;  %v31_v5 = vld [vmem:[%s353_s0 + $0x10] sm:$0xff]  ;;  %v30_v6 = vld [vmem:[%s353_s0 + $0x8] sm:$0xff] }
   0x2   :  { %v29_v1 = vld [vmem:[%s353_s0] sm:$0xff]  ;;  %243 = vmatprep.subr.msk.mxu0 %vm84_vm0, %v63_v0  ;;  %251 = vmatprep.subr.msk.mxu1 %vm84_vm0, %v63_v0  ;;  %v32_v9 = vld [vmem:[%s353_s0 + $0x18] sm:$0xff]  ;;  %v193_v29 = vld [vmem:[%s358_s1 + $0x8] sm:$0xff] }
   0x3   :  { %v228_v2 = vld [vmem:[%s354_s3] ss:$0 sm:$0xff]  ;;  %244 = vmatpush3.msk.msra.mxu0 %vm84_vm0, %v63_v0  ;;  %252 = vmatpush3.msk.msra.mxu1 %vm84_vm0, %v63_v0  ;;  %v195_v32 = vld [vmem:[%s358_s1 + $0x18] sm:$0xff]  ;;  %v194_v38 = vld [vmem:[%s358_s1 + $0x10] sm:$0xff] }
   0x4   :  { %v40_v3 = vadd.f32 %v228_v2, %v29_v1  ;;  %v229_v4 = vld [vmem:[%s355_s4] ss:$0 sm:$0xff]  ;;  %v42_v7 = vadd.f32 %v228_v2, %v31_v5  ;;  %v41_v8 = vadd.f32 %v228_v2, %v30_v6  ;;  %v43_v11 = vadd.f32 %v228_v2, %v32_v9 }
   0x5   :  { %v230_v19 = vld [vmem:[%s356_s5] ss:$0 sm:$0xff] }
   0x6   :  { %vm44_vm1 = vcmp.ge.f32.partialorder %v40_v3, 0.0  ;;  %v55_v10 = vmul.f32 %v229_v4, %v40_v3  ;;  %vm46_vm3 = vcmp.ge.f32.partialorder %v42_v7, 0.0  ;;  %v57_v12 = vmul.f32 %v229_v4, %v42_v7  ;;  %v236_v21 = vld [vmem:[%s357_s6] ss:$0 sm:$0xff] }
   0x7   :  { %vm45_vm4 = vcmp.ge.f32.partialorder %v41_v8, 0.0  ;;  %v56_v13 = vmul.f32 %v229_v4, %v41_v8  ;;  %vm47_vm5 = vcmp.ge.f32.partialorder %v43_v11, 0.0  ;;  %v58_v15 = vmul.f32 %v229_v4, %v43_v11  ;;  %v192_v34 = vld [vmem:[%s358_s1] sm:$0xff] }
   0x8   :  { %v59_v14 = vsel %vm44_vm1, %v40_v3, %v55_v10  ;;  %v61_v16 = vsel %vm46_vm3, %v42_v7, %v57_v12  ;;  %v237_v36 = vld [vmem:[%s359_s7] ss:$0 sm:$0xff] }
   0x9   :  { %245 = vmatprep.mubr.msk.f32.mxu0 %vm71_vm2, %v59_v14  ;;  %v60_v17 = vsel %vm45_vm4, %v41_v8, %v56_v13  ;;  %248 = vmatprep.mubr.msk.f32.mxu1 %vm71_vm2, %v61_v16  ;;  %v62_v18 = vsel %vm47_vm5, %v43_v11, %v58_v15 }
   0xa   :  { %246 = vmatmul.mubr.msk.f32.vlgmr.msra.gmra.mrb[0].mxu0 %vm71_vm2, %v60_v17  ;;  %249 = vmatmul.mubr.msk.f32.vlgmr.msra.gmra.mrb[0].mxu1 %vm71_vm2, %v62_v18 }
  0xdd   :  { %v247_v20 = vpop.f32.mrb[0].mxu0  ;;  %v250_v23 = vpop.f32.mrb[0].mxu1 }
  0xde   :  { %v160_v22 = vadd.f32 %v247_v20, %v230_v19  ;;  %v154_v24 = vpop.f32.mrb[1].mxu0  ;;  %v170_v25 = vadd.f32 %v250_v23, %v230_v19  ;;  %v164_v27 = vpop.f32.mrb[1].mxu1 }
  0xdf   :  { %v155_v26 = vadd.f32 %v230_v19, %v154_v24  ;;  %v165_v30 = vadd.f32 %v230_v19, %v164_v27 }
  0xe0   :  { %vm174_vm6 = vcmp.ge.f32.partialorder %v160_v22, 0.0  ;;  %v185_v28 = vmul.f32 %v236_v21, %v160_v22  ;;  %vm176_vm7 = vcmp.ge.f32.partialorder %v170_v25, 0.0  ;;  %v187_v31 = vmul.f32 %v236_v21, %v170_v25 }
  0xe1   :  { %vm173_vm8 = vcmp.ge.f32.partialorder %v155_v26, 0.0  ;;  %v184_v33 = vmul.f32 %v236_v21, %v155_v26  ;;  %vm175_vm9 = vcmp.ge.f32.partialorder %v165_v30, 0.0  ;;  %v186_v37 = vmul.f32 %v236_v21, %v165_v30 }
  0xe2   :  { %v189_v35 = vsel %vm174_vm6, %v160_v22, %v185_v28  ;;  %v191_v40 = vsel %vm176_vm7, %v170_v25, %v187_v31 }
  0xe3   :  { %v197_v39 = vadd.f32 %v193_v29, %v189_v35  ;;  %v188_v41 = vsel %vm173_vm8, %v155_v26, %v184_v33  ;;  %v199_v42 = vadd.f32 %v195_v32, %v191_v40  ;;  %v190_v44 = vsel %vm175_vm9, %v165_v30, %v186_v37 }
  0xe4   :  { %v196_v43 = vadd.f32 %v192_v34, %v188_v41  ;;  %v198_v46 = vadd.f32 %v194_v38, %v190_v44 }
  0xe5   :  { %vm201_vm10 = vcmp.ge.f32.partialorder %v197_v39, 0.0  ;;  %v212_v45 = vmul.f32 %v237_v36, %v197_v39  ;;  %vm203_vm12 = vcmp.ge.f32.partialorder %v199_v42, 0.0  ;;  %v214_v47 = vmul.f32 %v237_v36, %v199_v42 }
  0xe6   :  { %vm200_vm13 = vcmp.ge.f32.partialorder %v196_v43, 0.0  ;;  %v211_v48 = vmul.f32 %v237_v36, %v196_v43  ;;  %vm202_vm14 = vcmp.ge.f32.partialorder %v198_v46, 0.0  ;;  %v213_v50 = vmul.f32 %v237_v36, %v198_v46 }
  0xe7   :  { %v216_v49 = vsel %vm201_vm10, %v197_v39, %v212_v45  ;;  %v218_v51 = vsel %vm203_vm12, %v199_v42, %v214_v47 }
  0xe8   :  { %221 = vst.msk [vmem:[%s360_s8 + $0x8] sm:$0xff] %vm219_vm11, %v216_v49  ;;  %v215_v52 = vsel %vm200_vm13, %v196_v43, %v211_v48  ;;  %223 = vst.msk [vmem:[%s360_s8 + $0x18] sm:$0xff] %vm219_vm11, %v218_v51  ;;  %v217_v53 = vsel %vm202_vm14, %v198_v46, %v213_v50 }
  0xe9   :  { %220 = vst.msk [vmem:[%s360_s8] sm:$0xff] %vm219_vm11, %v215_v52  ;;  %222 = vst.msk [vmem:[%s360_s8 + $0x10] sm:$0xff] %vm219_vm11, %v217_v53 }

// kernel: _lambda_.64
= control target key start
LH: loop header
LB: loop body
LE: loop exit
PB: predicated region body
PF: predicated region fallthrough
CT: control target
= control target key end

     0   :  { %vm36_vm0 = vcmask 523264   ;;  %vm153_vm1 = vcmask 130048   ;;  %s313_s1 = inlined_call_operand.vmem [shape: f32[64,16], index: 1, kind: input, shape index: {}]   ;;  %s314_s0 = inlined_call_operand.vmem [shape: f32[32,64], index: 0, kind: input, shape index: {}]   ;;  %s315_s2 = inlined_call_operand.vmem [shape: f32[1,16], index: 2, kind: input, shape index: {}]   ;;  %s316_s3 = inlined_call_operand.vmem [shape: f32[1,16], index: 3, kind: input, shape index: {}]   ;;  %s317_s4 = inlined_call_operand.vmem [shape: f32[32,16], index: 4, kind: output, shape index: {}]  }
   0x1   :  { %v21_v0 = vld [vmem:[%s313_s1] sm:$0xff]  ;;  %v22_v1 = vld [vmem:[%s313_s1 + $0x8] sm:$0xff]  ;;  %v23_v2 = vld [vmem:[%s313_s1 + $0x10] sm:$0xff] }
   0x2   :  { %v202_v3 = vpack.c.bf16 %v22_v1, %v21_v0  ;;  %v24_v4 = vld [vmem:[%s313_s1 + $0x18] sm:$0xff]  ;;  %v25_v6 = vld [vmem:[%s313_s1 + $0x20] sm:$0xff]  ;;  %v26_v7 = vld [vmem:[%s313_s1 + $0x28] sm:$0xff] }
   0x3   :  { %v206_v5 = vpack.c.bf16 %v24_v4, %v23_v2  ;;  %v17_v8 = vld [vmem:[%s314_s0] sm:$0xff]  ;;  %v19_v9 = vld [vmem:[%s314_s0 + $0x10] sm:$0xff]  ;;  %v210_v10 = vpack.c.bf16 %v26_v7, %v25_v6  ;;  %v28_v12 = vld [vmem:[%s313_s1 + $0x38] sm:$0xff] }
   0x4   :  { %203 = vmatprep.subr.bf16.mxu0 %v202_v3  ;;  %218 = vmatprep.subr.bf16.mxu1 %v202_v3  ;;  %v27_v11 = vld [vmem:[%s313_s1 + $0x30] sm:$0xff]  ;;  %v18_v14 = vld [vmem:[%s314_s0 + $0x8] sm:$0xff]  ;;  %v20_v15 = vld [vmem:[%s314_s0 + $0x18] sm:$0xff] }
   0x5   :  { %205 = vmatpush3.bf16.msra.mxu0 %v202_v3  ;;  %222 = vmatpush3.bf16.msra.mxu1 %v202_v3  ;;  %v214_v13 = vpack.c.bf16 %v28_v12, %v27_v11  ;;  %v162_v16 = vld [vmem:[%s315_s2] ss:$0 sm:$0xff] }
   0x6   :  { %207 = vmatprep.subr.bf16.mxu0 %v206_v5  ;;  %219 = vmatprep.subr.bf16.mxu1 %v206_v5  ;;  %v167_v18 = vld [vmem:[%s316_s3] ss:$0 sm:$0xff] }
   0x7   :  { %196 = vmatprep.mubr.msk.f32.mxu0 %vm36_vm0, %v17_v8  ;;  %199 = vmatprep.mubr.msk.f32.mxu1 %vm36_vm0, %v19_v9 }
   0x9   :  { %209 = vmatpush3.bf16.msra.mxu0 %v206_v5  ;;  %223 = vmatpush3.bf16.msra.mxu1 %v206_v5 }
   0xa   :  { %211 = vmatprep.subr.bf16.mxu0 %v210_v10  ;;  %220 = vmatprep.subr.bf16.mxu1 %v210_v10 }
   0xd   :  { %213 = vmatpush3.bf16.msra.mxu0 %v210_v10  ;;  %224 = vmatpush3.bf16.msra.mxu1 %v210_v10 }
   0xe   :  { %215 = vmatprep.subr.bf16.mxu0 %v214_v13  ;;  %221 = vmatprep.subr.bf16.mxu1 %v214_v13 }
  0x11   :  { %217 = vmatpush3.bf16.msra.mxu0 %v214_v13  ;;  %225 = vmatpush3.bf16.msra.mxu1 %v214_v13 }
  0x14   :  { %197 = vmatmul.mubr.msk.f32.vlgmr.msra.gmra.mrb[0].mxu0 %vm36_vm0, %v18_v14  ;;  %200 = vmatmul.mubr.msk.f32.vlgmr.msra.gmra.mrb[0].mxu1 %vm36_vm0, %v20_v15 }
  0xe7   :  { %v198_v17 = vpop.f32.mrb[0].mxu0  ;;  %v201_v19 = vpop.f32.mrb[0].mxu1 }
  0xe8   :  { %v121_v20 = vadd.f32 %v198_v17, %v162_v16  ;;  %v131_v21 = vadd.f32 %v201_v19, %v162_v16  ;;  %v115_v22 = vpop.f32.mrb[1].mxu0  ;;  %v125_v23 = vpop.f32.mrb[1].mxu1 }
  0xe9   :  { %v116_v24 = vadd.f32 %v162_v16, %v115_v22  ;;  %v126_v25 = vadd.f32 %v162_v16, %v125_v23 }
  0xea   :  { %vm135_vm2 = vcmp.ge.f32.partialorder %v121_v20, 0.0  ;;  %v146_v26 = vmul.f32 %v167_v18, %v121_v20  ;;  %vm137_vm3 = vcmp.ge.f32.partialorder %v131_v21, 0.0  ;;  %v148_v27 = vmul.f32 %v167_v18, %v131_v21 }
  0xeb   :  { %vm134_vm4 = vcmp.ge.f32.partialorder %v116_v24, 0.0  ;;  %v145_v28 = vmul.f32 %v167_v18, %v116_v24  ;;  %vm136_vm5 = vcmp.ge.f32.partialorder %v126_v25, 0.0  ;;  %v147_v29 = vmul.f32 %v167_v18, %v126_v25 }
  0xec   :  { %v150_v30 = vsel %vm135_vm2, %v121_v20, %v146_v26  ;;  %v152_v31 = vsel %vm137_vm3, %v131_v21, %v148_v27 }
  0xed   :  { %155 = vst.msk [vmem:[%s317_s4 + $0x8] sm:$0xff] %vm153_vm1, %v150_v30  ;;  %157 = vst.msk [vmem:[%s317_s4 + $0x18] sm:$0xff] %vm153_vm1, %v152_v31  ;;  %v149_v32 = vsel %vm134_vm4, %v116_v24, %v145_v28  ;;  %v151_v33 = vsel %vm136_vm5, %v126_v25, %v147_v29 }
  0xee   :  { %154 = vst.msk [vmem:[%s317_s4] sm:$0xff] %vm153_vm1, %v149_v32  ;;  %156 = vst.msk [vmem:[%s317_s4 + $0x10] sm:$0xff] %vm153_vm1, %v151_v33 }

// kernel: _lambda_.65
= control target key start
LH: loop header
LB: loop body
LE: loop exit
PB: predicated region body
PF: predicated region fallthrough
CT: control target
= control target key end

     0   :  { %vm72_vm0 = vcmask 130048   ;;  %vm216_vm9 = vcmask 523264   ;;  %s366_s2 = inlined_call_operand.vmem [shape: f32[16,64], index: 2, kind: input, shape index: {}]   ;;  %s367_s0 = inlined_call_operand.vmem [shape: f32[32,16], index: 0, kind: input, shape index: {}]   ;;  %s368_s3 = inlined_call_operand.vmem [shape: f32[1,16], index: 3, kind: input, shape index: {}]   ;;  %s369_s4 = inlined_call_operand.vmem [shape: f32[1,16], index: 4, kind: input, shape index: {}]   ;;  %s370_s5 = inlined_call_operand.vmem [shape: f32[1,64], index: 5, kind: input, shape index: {}]   ;;  %s371_s6 = inlined_call_operand.vmem [shape: f32[1,64], index: 6, kind: input, shape index: {}, may-alias: {6,7}]   ;;  %s372_s1 = inlined_call_operand.vmem [shape: f32[32,64], index: 1, kind: input, shape index: {}]   ;;  %s373_s7 = inlined_call_operand.vmem [shape: f32[1,64], index: 7, kind: input, shape index: {}, may-alias: {6,7}]   ;;  %s374_s8 = inlined_call_operand.vmem [shape: f32[32,64], index: 8, kind: output, shape index: {}]  }
   0x1   :  { %v63_v0 = vld [vmem:[%s366_s2] sm:$0xff]  ;;  %v64_v1 = vld [vmem:[%s366_s2 + $0x8] sm:$0xff]  ;;  %v31_v6 = vld [vmem:[%s367_s0 + $0x10] sm:$0xff] }
   0x2   :  { %v29_v2 = vld [vmem:[%s367_s0] sm:$0xff]  ;;  %v250_v3 = vpack.c.bf16 %v64_v1, %v63_v0  ;;  %v30_v9 = vld [vmem:[%s367_s0 + $0x8] sm:$0xff]  ;;  %v32_v10 = vld [vmem:[%s367_s0 + $0x18] sm:$0xff] }
   0x3   :  { %v225_v4 = vld [vmem:[%s368_s3] ss:$0 sm:$0xff]  ;;  %v190_v32 = vld [vmem:[%s372_s1 + $0x8] sm:$0xff]  ;;  %v192_v34 = vld [vmem:[%s372_s1 + $0x18] sm:$0xff] }
   0x4   :  { %v226_v5 = vld [vmem:[%s369_s4] ss:$0 sm:$0xff]  ;;  %v40_v7 = vadd.f32 %v225_v4, %v29_v2  ;;  %v42_v8 = vadd.f32 %v225_v4, %v31_v6  ;;  %251 = vmatprep.subr.bf16.mxu0 %v250_v3  ;;  %254 = vmatprep.subr.bf16.mxu1 %v250_v3  ;;  %v41_v11 = vadd.f32 %v225_v4, %v30_v9  ;;  %v191_v38 = vld [vmem:[%s372_s1 + $0x10] sm:$0xff] }
   0x5   :  { %v43_v12 = vadd.f32 %v225_v4, %v32_v10  ;;  %253 = vmatpush3.bf16.msra.mxu0 %v250_v3  ;;  %255 = vmatpush3.bf16.msra.mxu1 %v250_v3  ;;  %v227_v21 = vld [vmem:[%s370_s5] ss:$0 sm:$0xff] }
   0x6   :  { %vm44_vm1 = vcmp.ge.f32.partialorder %v40_v7, 0.0  ;;  %v55_v13 = vmul.f32 %v226_v5, %v40_v7  ;;  %vm46_vm2 = vcmp.ge.f32.partialorder %v42_v8, 0.0  ;;  %v57_v14 = vmul.f32 %v226_v5, %v42_v8  ;;  %v232_v23 = vld [vmem:[%s371_s6] ss:$0 sm:$0xff] }
   0x7   :  { %vm45_vm3 = vcmp.ge.f32.partialorder %v41_v11, 0.0  ;;  %v56_v15 = vmul.f32 %v226_v5, %v41_v11  ;;  %vm47_vm4 = vcmp.ge.f32.partialorder %v43_v12, 0.0  ;;  %v58_v16 = vmul.f32 %v226_v5, %v43_v12  ;;  %v189_v36 = vld [vmem:[%s372_s1] sm:$0xff] }
   0x8   :  { %v59_v17 = vsel %vm44_vm1, %v40_v7, %v55_v13  ;;  %v61_v18 = vsel %vm46_vm2, %v42_v8, %v57_v14  ;;  %v233_v40 = vld [vmem:[%s373_s7] ss:$0 sm:$0xff] }
   0x9   :  { %244 = vmatprep.mubr.msk.f32.mxu0 %vm72_vm0, %v59_v17  ;;  %247 = vmatprep.mubr.msk.f32.mxu1 %vm72_vm0, %v61_v18  ;;  %v60_v19 = vsel %vm45_vm3, %v41_v11, %v56_v15  ;;  %v62_v20 = vsel %vm47_vm4, %v43_v12, %v58_v16 }
   0xa   :  { %245 = vmatmul.mubr.msk.f32.vlgmr.msra.gmra.mrb[0].mxu0 %vm72_vm0, %v60_v19  ;;  %248 = vmatmul.mubr.msk.f32.vlgmr.msra.gmra.mrb[0].mxu1 %vm72_vm0, %v62_v20 }
  0xdd   :  { %v246_v22 = vpop.f32.mrb[0].mxu0  ;;  %v249_v24 = vpop.f32.mrb[0].mxu1 }
  0xde   :  { %v157_v25 = vadd.f32 %v246_v22, %v227_v21  ;;  %v167_v26 = vadd.f32 %v249_v24, %v227_v21  ;;  %v151_v27 = vpop.f32.mrb[1].mxu0  ;;  %v161_v28 = vpop.f32.mrb[1].mxu1 }
  0xdf   :  { %v152_v29 = vadd.f32 %v227_v21, %v151_v27  ;;  %v162_v30 = vadd.f32 %v227_v21, %v161_v28 }
  0xe0   :  { %vm171_vm5 = vcmp.ge.f32.partialorder %v157_v25, 0.0  ;;  %v182_v31 = vmul.f32 %v232_v23, %v157_v25  ;;  %vm173_vm6 = vcmp.ge.f32.partialorder %v167_v26, 0.0  ;;  %v184_v33 = vmul.f32 %v232_v23, %v167_v26 }
  0xe1   :  { %vm170_vm7 = vcmp.ge.f32.partialorder %v152_v29, 0.0  ;;  %v181_v35 = vmul.f32 %v232_v23, %v152_v29  ;;  %vm172_vm8 = vcmp.ge.f32.partialorder %v162_v30, 0.0  ;;  %v183_v37 = vmul.f32 %v232_v23, %v162_v30 }
  0xe2   :  { %v186_v39 = vsel %vm171_vm5, %v157_v25, %v182_v31  ;;  %v188_v41 = vsel %vm173_vm6, %v167_v26, %v184_v33 }
  0xe3   :  { %v194_v42 = vadd.f32 %v190_v32, %v186_v39  ;;  %v196_v43 = vadd.f32 %v192_v34, %v188_v41  ;;  %v185_v44 = vsel %vm170_vm7, %v152_v29, %v181_v35  ;;  %v187_v45 = vsel %vm172_vm8, %v162_v30, %v183_v37 }
  0xe4   :  { %v193_v46 = vadd.f32 %v189_v36, %v185_v44  ;;  %v195_v47 = vadd.f32 %v191_v38, %v187_v45 }
  0xe5   :  { %vm198_vm10 = vcmp.ge.f32.partialorder %v194_v42, 0.0  ;;  %v209_v48 = vmul.f32 %v233_v40, %v194_v42  ;;  %vm200_vm11 = vcmp.ge.f32.partialorder %v196_v43, 0.0  ;;  %v211_v49 = vmul.f32 %v233_v40, %v196_v43 }
  0xe6   :  { %vm197_vm12 = vcmp.ge.f32.partialorder %v193_v46, 0.0  ;;  %v208_v50 = vmul.f32 %v233_v40, %v193_v46  ;;  %vm199_vm13 = vcmp.ge.f32.partialorder %v195_v47, 0.0  ;;  %v210_v51 = vmul.f32 %v233_v40, %v195_v47 }
  0xe7   :  { %v213_v52 = vsel %vm198_vm10, %v194_v42, %v209_v48  ;;  %v215_v53 = vsel %vm200_vm11, %v196_v43, %v211_v49 }
  0xe8   :  { %218 = vst.msk [vmem:[%s374_s8 + $0x8] sm:$0xff] %vm216_vm9, %v213_v52  ;;  %220 = vst.msk [vmem:[%s374_s8 + $0x18] sm:$0xff] %vm216_vm9, %v215_v53  ;;  %v212_v54 = vsel %vm197_vm12, %v193_v46, %v208_v50  ;;  %v214_v55 = vsel %vm199_vm13, %v195_v47, %v210_v51 }
  0xe9   :  { %217 = vst.msk [vmem:[%s374_s8] sm:$0xff] %vm216_vm9, %v212_v54  ;;  %219 = vst.msk [vmem:[%s374_s8 + $0x10] sm:$0xff] %vm216_vm9, %v214_v55 }

// kernel: _lambda_.73
= control target key start
LH: loop header
LB: loop body
LE: loop exit
PB: predicated region body
PF: predicated region fallthrough
CT: control target
= control target key end

     0   :  { %v180_v0 = vmov 0.0|0.0   ;;  %vm181_vm0 = vmmov 0   ;;  %v182_v3 = vmov 0.0   ;;  %vm57_vm2 = vcmask 130048   ;;  %s258_s2 = inlined_call_operand.vmem [shape: f32[16,128], index: 2, kind: input, shape index: {}]   ;;  %s259_s0 = inlined_call_operand.vmem [shape: f32[8,16], index: 0, kind: input, shape index: {}]   ;;  %s260_s3 = inlined_call_operand.vmem [shape: f32[1,16], index: 3, kind: input, shape index: {}]   ;;  %s261_s4 = inlined_call_operand.vmem [shape: f32[1,16], index: 4, kind: input, shape index: {}]   ;;  %s262_s5 = inlined_call_operand.vmem [shape: f32[1,128], index: 5, kind: input, shape index: {}]   ;;  %s263_s6 = inlined_call_operand.vmem [shape: f32[1,128], index: 6, kind: input, shape index: {}, may-alias: {6,7}]   ;;  %s264_s1 = inlined_call_operand.vmem [shape: f32[8,128], index: 1, kind: input, shape index: {}]   ;;  %s265_s7 = inlined_call_operand.vmem [shape: f32[1,128], index: 7, kind: input, shape index: {}, may-alias: {6,7}]   ;;  %s266_s8 = inlined_call_operand.vmem [shape: f32[8,128], index: 8, kind: output, shape index: {}]  }
   0x1   :  { %174 = vmatprep.subr.bf16.mxu0 %v180_v0  ;;  %v48_v1 = vld [vmem:[%s258_s2] sm:$0xff]  ;;  %v49_v2 = vld [vmem:[%s258_s2 + $0x8] sm:$0xff]  ;;  %171 = vmatprep.mubr.msk.f32.mxu0 %vm181_vm0, %v182_v3 }
   0x2   :  { %v29_v4 = vld [vmem:[%s259_s0] sm:$0xff]  ;;  %v175_v5 = vpack.c.bf16 %v49_v2, %v48_v1 }
   0x3   :  { %v158_v6 = vld [vmem:[%s260_s3] ss:$0 sm:$0xff] }
   0x4   :  { %v159_v7 = vld [vmem:[%s261_s4] ss:$0 sm:$0xff]  ;;  %v37_v8 = vadd.f32 %v158_v6, %v29_v4  ;;  %176 = vmatpush3.bf16.msra.mxu0 %v175_v5 }
   0x5   :  { %v160_v11 = vld [vmem:[%s262_s5] ss:$0 sm:$0xff] }
   0x6   :  { %vm38_vm1 = vcmp.ge.f32.partialorder %v37_v8, 0.0  ;;  %v46_v9 = vmul.f32 %v159_v7, %v37_v8  ;;  %v162_v13 = vld [vmem:[%s263_s6] ss:$0 sm:$0xff] }
   0x7   :  { %v141_v17 = vld [vmem:[%s264_s1] sm:$0xff] }
   0x8   :  { %v47_v10 = vsel %vm38_vm1, %v37_v8, %v46_v9  ;;  %v163_v19 = vld [vmem:[%s265_s7] ss:$0 sm:$0xff] }
   0x9   :  { %172 = vmatmul.mubr.msk.f32.vlgmr.msra.gmra.mrb[0].mxu0 %vm57_vm2, %v47_v10 }
  0xdc   :  { %v127_v12 = vpop.f32.mrb[0].mxu0 }
  0xdd   :  { %v128_v14 = vadd.f32 %v160_v11, %v127_v12  ;;  %v173_v15 = vpop.f32.mrb[1].mxu0 }
  0xdf   :  { %vm131_vm3 = vcmp.ge.f32.partialorder %v128_v14, 0.0  ;;  %v139_v16 = vmul.f32 %v162_v13, %v128_v14 }
  0xe1   :  { %v140_v18 = vsel %vm131_vm3, %v128_v14, %v139_v16 }
  0xe2   :  { %v142_v20 = vadd.f32 %v141_v17, %v140_v18 }
  0xe4   :  { %vm143_vm4 = vcmp.ge.f32.partialorder %v142_v20, 0.0  ;;  %v151_v21 = vmul.f32 %v163_v19, %v142_v20 }
  0xe6   :  { %v152_v22 = vsel %vm143_vm4, %v142_v20, %v151_v21 }
  0xe7   :  { %153 = vst [vmem:[%s266_s8] sm:$0xff] %v152_v22 }

// kernel: _lambda_.74
= control target key start
LH: loop header
LB: loop body
LE: loop exit
PB: predicated region body
PF: predicated region fallthrough
CT: control target
= control target key end

     0   :  { %v208_v0 = vmov 0.0|0.0   ;;  %vm209_vm0 = vmmov 0   ;;  %v210_v4 = vmov 0.0   ;;  %vm121_vm2 = vcmask 261120   ;;  %s296_s1 = inlined_call_operand.vmem [shape: f32[128,32], index: 1, kind: input, shape index: {}]   ;;  %s297_s0 = inlined_call_operand.vmem [shape: f32[8,128], index: 0, kind: input, shape index: {}]   ;;  %s298_s2 = inlined_call_operand.vmem [shape: f32[1,32], index: 2, kind: input, shape index: {}]   ;;  %s299_s3 = inlined_call_operand.vmem [shape: f32[1,32], index: 3, kind: input, shape index: {}]   ;;  %s300_s4 = inlined_call_operand.vmem [shape: f32[8,32], index: 4, kind: output, shape index: {}]  }
   0x1   :  { %181 = vmatprep.subr.bf16.mxu0 %v208_v0  ;;  %v18_v1 = vld [vmem:[%s296_s1] sm:$0xff]  ;;  %v19_v2 = vld [vmem:[%s296_s1 + $0x8] sm:$0xff]  ;;  %v20_v3 = vld [vmem:[%s296_s1 + $0x10] sm:$0xff]  ;;  %178 = vmatprep.mubr.msk.f32.mxu0 %vm209_vm0, %v210_v4 }
   0x2   :  { %v182_v5 = vpack.c.bf16 %v19_v2, %v18_v1  ;;  %v21_v6 = vld [vmem:[%s296_s1 + $0x18] sm:$0xff]  ;;  %v22_v8 = vld [vmem:[%s296_s1 + $0x20] sm:$0xff]  ;;  %v23_v9 = vld [vmem:[%s296_s1 + $0x28] sm:$0xff] }
   0x3   :  { %v185_v7 = vpack.c.bf16 %v21_v6, %v20_v3  ;;  %v188_v10 = vpack.c.bf16 %v23_v9, %v22_v8  ;;  %v24_v11 = vld [vmem:[%s296_s1 + $0x30] sm:$0xff]  ;;  %v25_v12 = vld [vmem:[%s296_s1 + $0x38] sm:$0xff]  ;;  %v26_v14 = vld [vmem:[%s296_s1 + $0x40] sm:$0xff] }
   0x4   :  { %183 = vmatpush3.bf16.msra.mxu0 %v182_v5  ;;  %v191_v13 = vpack.c.bf16 %v25_v12, %v24_v11  ;;  %v27_v15 = vld [vmem:[%s296_s1 + $0x48] sm:$0xff]  ;;  %v28_v17 = vld [vmem:[%s296_s1 + $0x50] sm:$0xff]  ;;  %v29_v18 = vld [vmem:[%s296_s1 + $0x58] sm:$0xff] }
   0x5   :  { %184 = vmatprep.subr.bf16.mxu0 %v208_v0  ;;  %v194_v16 = vpack.c.bf16 %v27_v15, %v26_v14  ;;  %v197_v19 = vpack.c.bf16 %v29_v18, %v28_v17  ;;  %v30_v20 = vld [vmem:[%s296_s1 + $0x60] sm:$0xff]  ;;  %v31_v21 = vld [vmem:[%s296_s1 + $0x68] sm:$0xff]  ;;  %v32_v23 = vld [vmem:[%s296_s1 + $0x70] sm:$0xff] }
   0x6   :  { %v200_v22 = vpack.c.bf16 %v31_v21, %v30_v20  ;;  %v33_v24 = vld [vmem:[%s296_s1 + $0x78] sm:$0xff]  ;;  %v17_v26 = vld [vmem:[%s297_s0] sm:$0xff] }
   0x7   :  { %v203_v25 = vpack.c.bf16 %v33_v24, %v32_v23  ;;  %v127_v27 = vld [vmem:[%s298_s2] ss:$0 sm:$0xff] }
   0x8   :  { %186 = vmatpush3.bf16.msra.mxu0 %v185_v7  ;;  %v128_v29 = vld [vmem:[%s299_s3] ss:$0 sm:$0xff] }
   0x9   :  { %187 = vmatprep.subr.bf16.mxu0 %v208_v0 }
   0xc   :  { %189 = vmatpush3.bf16.msra.mxu0 %v188_v10 }
   0xd   :  { %190 = vmatprep.subr.bf16.mxu0 %v208_v0 }
  0x10   :  { %192 = vmatpush3.bf16.msra.mxu0 %v191_v13 }
  0x11   :  { %193 = vmatprep.subr.bf16.mxu0 %v208_v0 }
  0x14   :  { %195 = vmatpush3.bf16.msra.mxu0 %v194_v16 }
  0x15   :  { %196 = vmatprep.subr.bf16.mxu0 %v208_v0 }
  0x18   :  { %198 = vmatpush3.bf16.msra.mxu0 %v197_v19 }
  0x19   :  { %199 = vmatprep.subr.bf16.mxu0 %v208_v0 }
  0x1c   :  { %201 = vmatpush3.bf16.msra.mxu0 %v200_v22 }
  0x1d   :  { %202 = vmatprep.subr.bf16.mxu0 %v208_v0 }
  0x20   :  { %204 = vmatpush3.bf16.msra.mxu0 %v203_v25 }
  0x23   :  { %179 = vmatmul.mubr.f32.vlgmr.msra.gmra.mrb[0].mxu0 %v17_v26 }
  0xf6   :  { %v107_v28 = vpop.f32.mrb[0].mxu0 }
  0xf7   :  { %v108_v30 = vadd.f32 %v127_v27, %v107_v28  ;;  %v180_v31 = vpop.f32.mrb[1].mxu0 }
  0xf9   :  { %vm111_vm1 = vcmp.ge.f32.partialorder %v108_v30, 0.0  ;;  %v119_v32 = vmul.f32 %v128_v29, %v108_v30 }
  0xfb   :  { %v120_v33 = vsel %vm111_vm1, %v108_v30, %v119_v32 }
  0xfc   :  { %122 = vst.msk [vmem:[%s300_s4] sm:$0xff] %vm121_vm2, %v120_v33 }

// kernel: _lambda_.79
= control target key start
LH: loop header
LB: loop body
LE: loop exit
PB: predicated region body
PF: predicated region fallthrough
CT: control target
= control target key end

     0   :  { %s107_s0 = inlined_call_operand.vmem [shape: f32[2,128], index: 0, kind: input, shape index: {}]   ;;  %s108_s1 = inlined_call_operand.vmem [shape: f32[1,128], index: 1, kind: input, shape index: {}]   ;;  %s109_s2 = inlined_call_operand.vmem [shape: f32[1,128], index: 2, kind: input, shape index: {}]   ;;  %s110_s3 = inlined_call_operand.vmem [shape: f32[2,128], index: 3, kind: output, shape index: {}]  }
   0x1   :  { %v14_v0 = vld [vmem:[%s107_s0] sm:$0xff] }
   0x2   :  { %v73_v1 = vld [vmem:[%s108_s1] ss:$0 sm:$0xff] }
   0x3   :  { %v74_v2 = vld [vmem:[%s109_s2] ss:$0 sm:$0xff]  ;;  %v22_v3 = vadd.f32 %v73_v1, %v14_v0 }
   0x5   :  { %vm23_vm0 = vcmp.ge.f32.partialorder %v22_v3, 0.0  ;;  %v31_v4 = vmul.f32 %v74_v2, %v22_v3 }
   0x7   :  { %v32_v5 = vsel %vm23_vm0, %v22_v3, %v31_v4 }
   0x8   :  { %33 = vst [vmem:[#allocation2] sm:$0xff] %v32_v5 }
   0xf   :  { %v51_v6 = vld [vmem:[#allocation2] sm:$0x3] }
  0x10   :  { %52 = vst [vmem:[%s110_s3] sm:$0x3] %v51_v6 }

// kernel: _lambda_.75
= control target key start
LH: loop header
LB: loop body
LE: loop exit
PB: predicated region body
PF: predicated region fallthrough
CT: control target
= control target key end

     0   :  { %v191_v0 = vmov 0.0|0.0   ;;  %vm192_vm0 = vmmov 0   ;;  %v193_v4 = vmov 0.0   ;;  %vm59_vm2 = vcmask 261120   ;;  %s275_s2 = inlined_call_operand.vmem [shape: f32[32,128], index: 2, kind: input, shape index: {}]   ;;  %s276_s0 = inlined_call_operand.vmem [shape: f32[8,32], index: 0, kind: input, shape index: {}]   ;;  %s277_s3 = inlined_call_operand.vmem [shape: f32[1,32], index: 3, kind: input, shape index: {}]   ;;  %s278_s4 = inlined_call_operand.vmem [shape: f32[1,32], index: 4, kind: input, shape index: {}]   ;;  %s279_s5 = inlined_call_operand.vmem [shape: f32[1,128], index: 5, kind: input, shape index: {}]   ;;  %s280_s6 = inlined_call_operand.vmem [shape: f32[1,128], index: 6, kind: input, shape index: {}, may-alias: {6,7}]   ;;  %s281_s1 = inlined_call_operand.vmem [shape: f32[8,128], index: 1, kind: input, shape index: {}]   ;;  %s282_s7 = inlined_call_operand.vmem [shape: f32[1,128], index: 7, kind: input, shape index: {}, may-alias: {6,7}]   ;;  %s283_s8 = inlined_call_operand.vmem [shape: f32[8,128], index: 8, kind: output, shape index: {}]  }
   0x1   :  { %182 = vmatprep.subr.bf16.mxu0 %v191_v0  ;;  %v48_v1 = vld [vmem:[%s275_s2] sm:$0xff]  ;;  %v49_v2 = vld [vmem:[%s275_s2 + $0x8] sm:$0xff]  ;;  %v50_v3 = vld [vmem:[%s275_s2 + $0x10] sm:$0xff]  ;;  %179 = vmatprep.mubr.msk.f32.mxu0 %vm192_vm0, %v193_v4 }
   0x2   :  { %v183_v5 = vpack.c.bf16 %v49_v2, %v48_v1  ;;  %v51_v6 = vld [vmem:[%s275_s2 + $0x18] sm:$0xff]  ;;  %v29_v7 = vld [vmem:[%s276_s0] sm:$0xff] }
   0x3   :  { %v160_v8 = vld [vmem:[%s277_s3] ss:$0 sm:$0xff]  ;;  %v186_v11 = vpack.c.bf16 %v51_v6, %v50_v3 }
   0x4   :  { %v37_v9 = vadd.f32 %v160_v8, %v29_v7  ;;  %v161_v10 = vld [vmem:[%s278_s4] ss:$0 sm:$0xff]  ;;  %184 = vmatpush3.bf16.msra.mxu0 %v183_v5 }
   0x5   :  { %185 = vmatprep.subr.bf16.mxu0 %v191_v0  ;;  %v162_v14 = vld [vmem:[%s279_s5] ss:$0 sm:$0xff] }
   0x6   :  { %vm38_vm1 = vcmp.ge.f32.partialorder %v37_v9, 0.0  ;;  %v46_v12 = vmul.f32 %v161_v10, %v37_v9  ;;  %v164_v16 = vld [vmem:[%s280_s6] ss:$0 sm:$0xff] }
   0x7   :  { %v143_v20 = vld [vmem:[%s281_s1] sm:$0xff] }
   0x8   :  { %187 = vmatpush3.bf16.msra.mxu0 %v186_v11  ;;  %v47_v13 = vsel %vm38_vm1, %v37_v9, %v46_v12  ;;  %v165_v22 = vld [vmem:[%s282_s7] ss:$0 sm:$0xff] }
   0xb   :  { %180 = vmatmul.mubr.msk.f32.vlgmr.msra.gmra.mrb[0].mxu0 %vm59_vm2, %v47_v13 }
  0xde   :  { %v129_v15 = vpop.f32.mrb[0].mxu0 }
  0xdf   :  { %v130_v17 = vadd.f32 %v162_v14, %v129_v15  ;;  %v181_v18 = vpop.f32.mrb[1].mxu0 }
  0xe1   :  { %vm133_vm3 = vcmp.ge.f32.partialorder %v130_v17, 0.0  ;;  %v141_v19 = vmul.f32 %v164_v16, %v130_v17 }
  0xe3   :  { %v142_v21 = vsel %vm133_vm3, %v130_v17, %v141_v19 }
  0xe4   :  { %v144_v23 = vadd.f32 %v143_v20, %v142_v21 }
  0xe6   :  { %vm145_vm4 = vcmp.ge.f32.partialorder %v144_v23, 0.0  ;;  %v153_v24 = vmul.f32 %v165_v22, %v144_v23 }
  0xe8   :  { %v154_v25 = vsel %vm145_vm4, %v144_v23, %v153_v24 }
  0xe9   :  { %155 = vst [vmem:[%s283_s8] sm:$0xff] %v154_v25 }

// kernel: _lambda_.110
= control target key start
LH: loop header
LB: loop body
LE: loop exit
PB: predicated region body
PF: predicated region fallthrough
CT: control target
= control target key end

     0   :  { %v194_v0 = vmov 0.0|0.0   ;;  %vm195_vm0 = vmmov 0   ;;  %v196_v4 = vmov 0.0   ;;  %vm108_vm1 = vcmask 523264   ;;  %s274_s1 = inlined_call_operand.vmem [shape: f32[128,64], index: 1, kind: input, shape index: {}]   ;;  %s275_s0 = inlined_call_operand.vmem [shape: f32[8,128], index: 0, kind: input, shape index: {}]   ;;  %s276_s2 = inlined_call_operand.vmem [shape: f32[1,64], index: 2, kind: input, shape index: {}]   ;;  %s277_s3 = inlined_call_operand.vmem [shape: f32[8,64], index: 3, kind: output, shape index: {}]  }
   0x1   :  { %167 = vmatprep.subr.bf16.mxu0 %v194_v0  ;;  %v15_v1 = vld [vmem:[%s274_s1] sm:$0xff]  ;;  %v16_v2 = vld [vmem:[%s274_s1 + $0x8] sm:$0xff]  ;;  %v17_v3 = vld [vmem:[%s274_s1 + $0x10] sm:$0xff]  ;;  %164 = vmatprep.mubr.msk.f32.mxu0 %vm195_vm0, %v196_v4 }
   0x2   :  { %v168_v5 = vpack.c.bf16 %v16_v2, %v15_v1  ;;  %v18_v6 = vld [vmem:[%s274_s1 + $0x18] sm:$0xff]  ;;  %v19_v8 = vld [vmem:[%s274_s1 + $0x20] sm:$0xff]  ;;  %v20_v9 = vld [vmem:[%s274_s1 + $0x28] sm:$0xff] }
   0x3   :  { %v171_v7 = vpack.c.bf16 %v18_v6, %v17_v3  ;;  %v174_v10 = vpack.c.bf16 %v20_v9, %v19_v8  ;;  %v21_v11 = vld [vmem:[%s274_s1 + $0x30] sm:$0xff]  ;;  %v22_v12 = vld [vmem:[%s274_s1 + $0x38] sm:$0xff]  ;;  %v23_v14 = vld [vmem:[%s274_s1 + $0x40] sm:$0xff] }
   0x4   :  { %169 = vmatpush3.bf16.msra.mxu0 %v168_v5  ;;  %v177_v13 = vpack.c.bf16 %v22_v12, %v21_v11  ;;  %v24_v15 = vld [vmem:[%s274_s1 + $0x48] sm:$0xff]  ;;  %v25_v17 = vld [vmem:[%s274_s1 + $0x50] sm:$0xff]  ;;  %v26_v18 = vld [vmem:[%s274_s1 + $0x58] sm:$0xff] }
   0x5   :  { %170 = vmatprep.subr.bf16.mxu0 %v194_v0  ;;  %v180_v16 = vpack.c.bf16 %v24_v15, %v23_v14  ;;  %v183_v19 = vpack.c.bf16 %v26_v18, %v25_v17  ;;  %v27_v20 = vld [vmem:[%s274_s1 + $0x60] sm:$0xff]  ;;  %v28_v21 = vld [vmem:[%s274_s1 + $0x68] sm:$0xff]  ;;  %v29_v23 = vld [vmem:[%s274_s1 + $0x70] sm:$0xff] }
   0x6   :  { %v186_v22 = vpack.c.bf16 %v28_v21, %v27_v20  ;;  %v30_v24 = vld [vmem:[%s274_s1 + $0x78] sm:$0xff]  ;;  %v14_v26 = vld [vmem:[%s275_s0] sm:$0xff] }
   0x7   :  { %v189_v25 = vpack.c.bf16 %v30_v24, %v29_v23  ;;  %v114_v27 = vld [vmem:[%s276_s2] ss:$0 sm:$0xff] }
   0x8   :  { %172 = vmatpush3.bf16.msra.mxu0 %v171_v7 }
   0x9   :  { %173 = vmatprep.subr.bf16.mxu0 %v194_v0 }
   0xc   :  { %175 = vmatpush3.bf16.msra.mxu0 %v174_v10 }
   0xd   :  { %176 = vmatprep.subr.bf16.mxu0 %v194_v0 }
  0x10   :  { %178 = vmatpush3.bf16.msra.mxu0 %v177_v13 }
  0x11   :  { %179 = vmatprep.subr.bf16.mxu0 %v194_v0 }
  0x14   :  { %181 = vmatpush3.bf16.msra.mxu0 %v180_v16 }
  0x15   :  { %182 = vmatprep.subr.bf16.mxu0 %v194_v0 }
  0x18   :  { %184 = vmatpush3.bf16.msra.mxu0 %v183_v19 }
  0x19   :  { %185 = vmatprep.subr.bf16.mxu0 %v194_v0 }
  0x1c   :  { %187 = vmatpush3.bf16.msra.mxu0 %v186_v22 }
  0x1d   :  { %188 = vmatprep.subr.bf16.mxu0 %v194_v0 }
  0x20   :  { %190 = vmatpush3.bf16.msra.mxu0 %v189_v25 }
  0x23   :  { %165 = vmatmul.mubr.f32.vlgmr.msra.gmra.mrb[0].mxu0 %v14_v26 }
  0xf6   :  { %v104_v28 = vpop.f32.mrb[0].mxu0 }
  0xf7   :  { %v105_v29 = vadd.f32 %v114_v27, %v104_v28  ;;  %v166_v30 = vpop.f32.mrb[1].mxu0 }
  0xf9   :  { %109 = vst.msk [vmem:[%s277_s3] sm:$0xff] %vm108_vm1, %v105_v29 }

// kernel: _lambda_.117
= control target key start
LH: loop header
LB: loop body
LE: loop exit
PB: predicated region body
PF: predicated region fallthrough
CT: control target
= control target key end

     0   :  { %vm33_vm0 = vcmask 523264   ;;  %vm131_vm1 = vcmask 130048   ;;  %s278_s1 = inlined_call_operand.vmem [shape: f32[64,16], index: 1, kind: input, shape index: {}]   ;;  %s279_s0 = inlined_call_operand.vmem [shape: f32[32,64], index: 0, kind: input, shape index: {}]   ;;  %s280_s2 = inlined_call_operand.vmem [shape: f32[1,16], index: 2, kind: input, shape index: {}]   ;;  %s281_s3 = inlined_call_operand.vmem [shape: f32[32,16], index: 3, kind: output, shape index: {}]  }
   0x1   :  { %v18_v0 = vld [vmem:[%s278_s1] sm:$0xff]  ;;  %v19_v1 = vld [vmem:[%s278_s1 + $0x8] sm:$0xff]  ;;  %v20_v2 = vld [vmem:[%s278_s1 + $0x10] sm:$0xff] }
   0x2   :  { %v179_v3 = vpack.c.bf16 %v19_v1, %v18_v0  ;;  %v21_v4 = vld [vmem:[%s278_s1 + $0x18] sm:$0xff]  ;;  %v22_v6 = vld [vmem:[%s278_s1 + $0x20] sm:$0xff]  ;;  %v23_v7 = vld [vmem:[%s278_s1 + $0x28] sm:$0xff] }
   0x3   :  { %v183_v5 = vpack.c.bf16 %v21_v4, %v20_v2  ;;  %v14_v8 = vld [vmem:[%s279_s0] sm:$0xff]  ;;  %v16_v9 = vld [vmem:[%s279_s0 + $0x10] sm:$0xff]  ;;  %v187_v10 = vpack.c.bf16 %v23_v7, %v22_v6  ;;  %v25_v12 = vld [vmem:[%s278_s1 + $0x38] sm:$0xff] }
   0x4   :  { %180 = vmatprep.subr.bf16.mxu0 %v179_v3  ;;  %195 = vmatprep.subr.bf16.mxu1 %v179_v3  ;;  %v24_v11 = vld [vmem:[%s278_s1 + $0x30] sm:$0xff]  ;;  %v15_v14 = vld [vmem:[%s279_s0 + $0x8] sm:$0xff]  ;;  %v17_v15 = vld [vmem:[%s279_s0 + $0x18] sm:$0xff] }
   0x5   :  { %182 = vmatpush3.bf16.msra.mxu0 %v179_v3  ;;  %199 = vmatpush3.bf16.msra.mxu1 %v179_v3  ;;  %v191_v13 = vpack.c.bf16 %v25_v12, %v24_v11  ;;  %v140_v16 = vld [vmem:[%s280_s2] ss:$0 sm:$0xff] }
   0x6   :  { %184 = vmatprep.subr.bf16.mxu0 %v183_v5  ;;  %196 = vmatprep.subr.bf16.mxu1 %v183_v5 }
   0x7   :  { %173 = vmatprep.mubr.msk.f32.mxu0 %vm33_vm0, %v14_v8  ;;  %176 = vmatprep.mubr.msk.f32.mxu1 %vm33_vm0, %v16_v9 }
   0x9   :  { %186 = vmatpush3.bf16.msra.mxu0 %v183_v5  ;;  %200 = vmatpush3.bf16.msra.mxu1 %v183_v5 }
   0xa   :  { %188 = vmatprep.subr.bf16.mxu0 %v187_v10  ;;  %197 = vmatprep.subr.bf16.mxu1 %v187_v10 }
   0xd   :  { %190 = vmatpush3.bf16.msra.mxu0 %v187_v10  ;;  %201 = vmatpush3.bf16.msra.mxu1 %v187_v10 }
   0xe   :  { %192 = vmatprep.subr.bf16.mxu0 %v191_v13  ;;  %198 = vmatprep.subr.bf16.mxu1 %v191_v13 }
  0x11   :  { %194 = vmatpush3.bf16.msra.mxu0 %v191_v13  ;;  %202 = vmatpush3.bf16.msra.mxu1 %v191_v13 }
  0x14   :  { %174 = vmatmul.mubr.msk.f32.vlgmr.msra.gmra.mrb[0].mxu0 %vm33_vm0, %v15_v14  ;;  %177 = vmatmul.mubr.msk.f32.vlgmr.msra.gmra.mrb[0].mxu1 %vm33_vm0, %v17_v15 }
  0xe7   :  { %v175_v17 = vpop.f32.mrb[0].mxu0  ;;  %v178_v18 = vpop.f32.mrb[0].mxu1 }
  0xe8   :  { %v118_v19 = vadd.f32 %v175_v17, %v140_v16  ;;  %v128_v20 = vadd.f32 %v178_v18, %v140_v16  ;;  %v112_v21 = vpop.f32.mrb[1].mxu0  ;;  %v122_v22 = vpop.f32.mrb[1].mxu1 }
  0xe9   :  { %v113_v23 = vadd.f32 %v140_v16, %v112_v21  ;;  %v123_v24 = vadd.f32 %v140_v16, %v122_v22 }
  0xea   :  { %133 = vst.msk [vmem:[%s281_s3 + $0x8] sm:$0xff] %vm131_vm1, %v118_v19  ;;  %135 = vst.msk [vmem:[%s281_s3 + $0x18] sm:$0xff] %vm131_vm1, %v128_v20 }
  0xeb   :  { %132 = vst.msk [vmem:[%s281_s3] sm:$0xff] %vm131_vm1, %v113_v23  ;;  %134 = vst.msk [vmem:[%s281_s3 + $0x10] sm:$0xff] %vm131_vm1, %v123_v24 }

// kernel: _lambda_.112
= control target key start
LH: loop header
LB: loop body
LE: loop exit
PB: predicated region body
PF: predicated region fallthrough
CT: control target
= control target key end

     0   :  { %vm74_vm1 = vcmask 261120   ;;  %vm218_vm9 = vcmask 523264   ;;  %s386_s2 = inlined_call_operand.vmem [shape: f32[32,64], index: 2, kind: input, shape index: {}]   ;;  %s387_s0 = inlined_call_operand.vmem [shape: f32[32,32], index: 0, kind: input, shape index: {}]   ;;  %s388_s3 = inlined_call_operand.vmem [shape: f32[1,32], index: 3, kind: input, shape index: {}]   ;;  %s389_s4 = inlined_call_operand.vmem [shape: f32[1,32], index: 4, kind: input, shape index: {}]   ;;  %s390_s5 = inlined_call_operand.vmem [shape: f32[1,64], index: 5, kind: input, shape index: {}]   ;;  %s391_s6 = inlined_call_operand.vmem [shape: f32[1,64], index: 6, kind: input, shape index: {}, may-alias: {6,7}]   ;;  %s392_s1 = inlined_call_operand.vmem [shape: f32[32,64], index: 1, kind: input, shape index: {}]   ;;  %s393_s7 = inlined_call_operand.vmem [shape: f32[1,64], index: 7, kind: input, shape index: {}, may-alias: {6,7}]   ;;  %s394_s8 = inlined_call_operand.vmem [shape: f32[32,64], index: 8, kind: output, shape index: {}]  }
   0x1   :  { %v63_v0 = vld [vmem:[%s386_s2] sm:$0xff]  ;;  %v64_v1 = vld [vmem:[%s386_s2 + $0x8] sm:$0xff]  ;;  %v65_v2 = vld [vmem:[%s386_s2 + $0x10] sm:$0xff] }
   0x2   :  { %v258_v3 = vpack.c.bf16 %v64_v1, %v63_v0  ;;  %v66_v4 = vld [vmem:[%s386_s2 + $0x18] sm:$0xff]  ;;  %v29_v5 = vld [vmem:[%s387_s0] sm:$0xff]  ;;  %v31_v10 = vld [vmem:[%s387_s0 + $0x10] sm:$0xff] }
   0x3   :  { %v227_v6 = vld [vmem:[%s388_s3] ss:$0 sm:$0xff]  ;;  %v262_v7 = vpack.c.bf16 %v66_v4, %v65_v2  ;;  %v30_v11 = vld [vmem:[%s387_s0 + $0x8] sm:$0xff]  ;;  %v32_v14 = vld [vmem:[%s387_s0 + $0x18] sm:$0xff] }
   0x4   :  { %v40_v8 = vadd.f32 %v227_v6, %v29_v5  ;;  %v228_v9 = vld [vmem:[%s389_s4] ss:$0 sm:$0xff]  ;;  %259 = vmatprep.subr.bf16.mxu0 %v258_v3  ;;  %266 = vmatprep.subr.bf16.mxu1 %v258_v3  ;;  %v42_v12 = vadd.f32 %v227_v6, %v31_v10  ;;  %v41_v13 = vadd.f32 %v227_v6, %v30_v11  ;;  %v192_v35 = vld [vmem:[%s392_s1 + $0x8] sm:$0xff]  ;;  %v194_v37 = vld [vmem:[%s392_s1 + $0x18] sm:$0xff] }
   0x5   :  { %261 = vmatpush3.bf16.msra.mxu0 %v258_v3  ;;  %268 = vmatpush3.bf16.msra.mxu1 %v258_v3  ;;  %v43_v16 = vadd.f32 %v227_v6, %v32_v14  ;;  %v229_v24 = vld [vmem:[%s390_s5] ss:$0 sm:$0xff]  ;;  %v193_v41 = vld [vmem:[%s392_s1 + $0x10] sm:$0xff] }
   0x6   :  { %vm44_vm0 = vcmp.ge.f32.partialorder %v40_v8, 0.0  ;;  %v55_v15 = vmul.f32 %v228_v9, %v40_v8  ;;  %263 = vmatprep.subr.bf16.mxu0 %v262_v7  ;;  %267 = vmatprep.subr.bf16.mxu1 %v262_v7  ;;  %vm46_vm2 = vcmp.ge.f32.partialorder %v42_v12, 0.0  ;;  %v57_v17 = vmul.f32 %v228_v9, %v42_v12  ;;  %v234_v26 = vld [vmem:[%s391_s6] ss:$0 sm:$0xff] }
   0x7   :  { %vm45_vm3 = vcmp.ge.f32.partialorder %v41_v13, 0.0  ;;  %v56_v18 = vmul.f32 %v228_v9, %v41_v13  ;;  %vm47_vm4 = vcmp.ge.f32.partialorder %v43_v16, 0.0  ;;  %v58_v20 = vmul.f32 %v228_v9, %v43_v16  ;;  %v191_v39 = vld [vmem:[%s392_s1] sm:$0xff] }
   0x8   :  { %v59_v19 = vsel %vm44_vm0, %v40_v8, %v55_v15  ;;  %v61_v21 = vsel %vm46_vm2, %v42_v12, %v57_v17  ;;  %v235_v43 = vld [vmem:[%s393_s7] ss:$0 sm:$0xff] }
   0x9   :  { %252 = vmatprep.mubr.msk.f32.mxu0 %vm74_vm1, %v59_v19  ;;  %265 = vmatpush3.bf16.msra.mxu0 %v262_v7  ;;  %v60_v22 = vsel %vm45_vm3, %v41_v13, %v56_v18  ;;  %v62_v23 = vsel %vm47_vm4, %v43_v16, %v58_v20 }
   0xa   :  { %269 = vmatpush3.bf16.msra.mxu1 %v262_v7  ;;  %255 = vmatprep.mubr.msk.f32.mxu1 %vm74_vm1, %v61_v21 }
   0xc   :  { %253 = vmatmul.mubr.msk.f32.vlgmr.msra.gmra.mrb[0].mxu0 %vm74_vm1, %v60_v22 }
   0xd   :  { %256 = vmatmul.mubr.msk.f32.vlgmr.msra.gmra.mrb[0].mxu1 %vm74_vm1, %v62_v23 }
  0xdf   :  { %v254_v25 = vpop.f32.mrb[0].mxu0 }
  0xe0   :  { %v257_v27 = vpop.f32.mrb[0].mxu1  ;;  %v159_v28 = vadd.f32 %v254_v25, %v229_v24  ;;  %v153_v30 = vpop.f32.mrb[1].mxu0 }
  0xe1   :  { %v169_v29 = vadd.f32 %v257_v27, %v229_v24  ;;  %v163_v31 = vpop.f32.mrb[1].mxu1  ;;  %v154_v32 = vadd.f32 %v229_v24, %v153_v30 }
  0xe2   :  { %v164_v33 = vadd.f32 %v229_v24, %v163_v31  ;;  %vm173_vm5 = vcmp.ge.f32.partialorder %v159_v28, 0.0  ;;  %v184_v34 = vmul.f32 %v234_v26, %v159_v28 }
  0xe3   :  { %vm175_vm6 = vcmp.ge.f32.partialorder %v169_v29, 0.0  ;;  %v186_v36 = vmul.f32 %v234_v26, %v169_v29  ;;  %vm172_vm7 = vcmp.ge.f32.partialorder %v154_v32, 0.0  ;;  %v183_v38 = vmul.f32 %v234_v26, %v154_v32 }
  0xe4   :  { %vm174_vm8 = vcmp.ge.f32.partialorder %v164_v33, 0.0  ;;  %v185_v40 = vmul.f32 %v234_v26, %v164_v33  ;;  %v188_v42 = vsel %vm173_vm5, %v159_v28, %v184_v34 }
  0xe5   :  { %v190_v44 = vsel %vm175_vm6, %v169_v29, %v186_v36  ;;  %v196_v45 = vadd.f32 %v192_v35, %v188_v42  ;;  %v187_v47 = vsel %vm172_vm7, %v154_v32, %v183_v38 }
  0xe6   :  { %v198_v46 = vadd.f32 %v194_v37, %v190_v44  ;;  %v189_v48 = vsel %vm174_vm8, %v164_v33, %v185_v40  ;;  %v195_v49 = vadd.f32 %v191_v39, %v187_v47 }
  0xe7   :  { %v197_v50 = vadd.f32 %v193_v41, %v189_v48  ;;  %vm200_vm10 = vcmp.ge.f32.partialorder %v196_v45, 0.0  ;;  %v211_v51 = vmul.f32 %v235_v43, %v196_v45 }
  0xe8   :  { %vm202_vm11 = vcmp.ge.f32.partialorder %v198_v46, 0.0  ;;  %v213_v52 = vmul.f32 %v235_v43, %v198_v46  ;;  %vm199_vm12 = vcmp.ge.f32.partialorder %v195_v49, 0.0  ;;  %v210_v53 = vmul.f32 %v235_v43, %v195_v49 }
  0xe9   :  { %vm201_vm13 = vcmp.ge.f32.partialorder %v197_v50, 0.0  ;;  %v212_v54 = vmul.f32 %v235_v43, %v197_v50  ;;  %v215_v55 = vsel %vm200_vm10, %v196_v45, %v211_v51 }
  0xea   :  { %v217_v56 = vsel %vm202_vm11, %v198_v46, %v213_v52  ;;  %220 = vst.msk [vmem:[%s394_s8 + $0x8] sm:$0xff] %vm218_vm9, %v215_v55  ;;  %v214_v57 = vsel %vm199_vm12, %v195_v49, %v210_v53 }
  0xeb   :  { %222 = vst.msk [vmem:[%s394_s8 + $0x18] sm:$0xff] %vm218_vm9, %v217_v56  ;;  %v216_v58 = vsel %vm201_vm13, %v197_v50, %v212_v54  ;;  %219 = vst.msk [vmem:[%s394_s8] sm:$0xff] %vm218_vm9, %v214_v57 }
  0xec   :  { %221 = vst.msk [vmem:[%s394_s8 + $0x10] sm:$0xff] %vm218_vm9, %v216_v58 }

// kernel: _lambda_.119
= control target key start
LH: loop header
LB: loop body
LE: loop exit
PB: predicated region body
PF: predicated region fallthrough
CT: control target
= control target key end

     0   :  { %vm132_vm0 = vcmask 130048   ;;  %s894_s2 = inlined_call_operand.vmem [shape: f32[16,16], index: 2, kind: input, shape index: {}]   ;;  %s895_s0 = inlined_call_operand.vmem [shape: f32[128,16], index: 0, kind: input, shape index: {}]   ;;  %s896_s3 = inlined_call_operand.vmem [shape: f32[1,16], index: 3, kind: input, shape index: {}, may-alias: {3,5}]   ;;  %s897_s4 = inlined_call_operand.vmem [shape: f32[1,16], index: 4, kind: input, shape index: {}, may-alias: {4,6,7}]   ;;  %s898_s5 = inlined_call_operand.vmem [shape: f32[1,16], index: 5, kind: input, shape index: {}, may-alias: {3,5}]   ;;  %s899_s6 = inlined_call_operand.vmem [shape: f32[1,16], index: 6, kind: input, shape index: {}, may-alias: {4,6,7}]   ;;  %s900_s1 = inlined_call_operand.vmem [shape: f32[128,16], index: 1, kind: input, shape index: {}]   ;;  %s901_s7 = inlined_call_operand.vmem [shape: f32[1,16], index: 7, kind: input, shape index: {}, may-alias: {4,6,7}]   ;;  %s902_s8 = inlined_call_operand.vmem [shape: f32[128,16], index: 8, kind: output, shape index: {}]  }
   0x1   :  { %v123_v0 = vld [vmem:[%s894_s2] sm:$0xff]  ;;  %v124_v1 = vld [vmem:[%s894_s2 + $0x8] sm:$0xff]  ;;  %v31_v11 = vld [vmem:[%s895_s0 + $0x10] sm:$0xff] }
   0x2   :  { %v29_v2 = vld [vmem:[%s895_s0] sm:$0xff]  ;;  %v555_v3 = vpack.c.bf16 %v124_v1, %v123_v0  ;;  %v30_v9 = vld [vmem:[%s895_s0 + $0x8] sm:$0xff]  ;;  %v39_v17 = vld [vmem:[%s895_s0 + $0x50] sm:$0xff] }
   0x3   :  { %v618_v4 = vld [vmem:[%s896_s3] ss:$0 sm:$0xff]  ;;  %v38_v10 = vld [vmem:[%s895_s0 + $0x48] sm:$0xff]  ;;  %v32_v20 = vld [vmem:[%s895_s0 + $0x18] sm:$0xff] }
   0x4   :  { %v623_v5 = vld [vmem:[%s897_s4] ss:$0 sm:$0xff]  ;;  %v52_v7 = vadd.f32 %v618_v4, %v29_v2  ;;  %556 = vmatprep.subr.bf16.mxu0 %v555_v3  ;;  %559 = vmatprep.subr.bf16.mxu1 %v555_v3  ;;  %v53_v12 = vadd.f32 %v618_v4, %v30_v9  ;;  %v61_v13 = vadd.f32 %v618_v4, %v38_v10  ;;  %v40_v21 = vld [vmem:[%s895_s0 + $0x58] sm:$0xff]  ;;  %v34_v36 = vld [vmem:[%s895_s0 + $0x28] sm:$0xff] }
   0x5   :  { %v37_v6 = vld [vmem:[%s895_s0 + $0x40] sm:$0xff]  ;;  %v54_v14 = vadd.f32 %v618_v4, %v31_v11  ;;  %558 = vmatpush3.bf16.msra.mxu0 %v555_v3  ;;  %560 = vmatpush3.bf16.msra.mxu1 %v555_v3  ;;  %v62_v29 = vadd.f32 %v618_v4, %v39_v17  ;;  %v55_v31 = vadd.f32 %v618_v4, %v32_v20  ;;  %v42_v39 = vld [vmem:[%s895_s0 + $0x68] sm:$0xff]  ;;  %v35_v40 = vld [vmem:[%s895_s0 + $0x30] sm:$0xff] }
   0x6   :  { %v60_v8 = vadd.f32 %v618_v4, %v37_v6  ;;  %vm68_vm1 = vcmp.ge.f32.partialorder %v52_v7, 0.0  ;;  %v91_v15 = vmul.f32 %v623_v5, %v52_v7  ;;  %vm69_vm3 = vcmp.ge.f32.partialorder %v53_v12, 0.0  ;;  %v33_v25 = vld [vmem:[%s895_s0 + $0x20] sm:$0xff]  ;;  %v43_v43 = vld [vmem:[%s895_s0 + $0x70] sm:$0xff]  ;;  %v36_v51 = vld [vmem:[%s895_s0 + $0x38] sm:$0xff] }
   0x7   :  { %v92_v18 = vmul.f32 %v623_v5, %v53_v12  ;;  %vm77_vm4 = vcmp.ge.f32.partialorder %v61_v13, 0.0  ;;  %v100_v19 = vmul.f32 %v623_v5, %v61_v13  ;;  %vm70_vm5 = vcmp.ge.f32.partialorder %v54_v14, 0.0  ;;  %v41_v26 = vld [vmem:[%s895_s0 + $0x60] sm:$0xff]  ;;  %v44_v55 = vld [vmem:[%s895_s0 + $0x78] sm:$0xff] }
   0x8   :  { %vm76_vm2 = vcmp.ge.f32.partialorder %v60_v8, 0.0  ;;  %v99_v16 = vmul.f32 %v623_v5, %v60_v8  ;;  %v107_v22 = vsel %vm68_vm1, %v52_v7, %v91_v15  ;;  %v93_v24 = vmul.f32 %v623_v5, %v54_v14  ;;  %v381_v20 = vld [vmem:[%s900_s1] sm:$0xff] }
   0x9   :  { %531 = vmatprep.mubr.msk.f32.mxu0 %vm132_vm0, %v107_v22  ;;  %v108_v27 = vsel %vm69_vm3, %v53_v12, %v92_v18  ;;  %v116_v28 = vsel %vm77_vm4, %v61_v13, %v100_v19  ;;  %v63_v32 = vadd.f32 %v618_v4, %v40_v21  ;;  %vm78_vm6 = vcmp.ge.f32.partialorder %v62_v29, 0.0  ;;  %v390_v18 = vld [vmem:[%s900_s1 + $0x48] sm:$0xff]  ;;  %v389_v22 = vld [vmem:[%s900_s1 + $0x40] sm:$0xff] }
   0xa   :  { %v115_v23 = vsel %vm76_vm2, %v60_v8, %v99_v16  ;;  %532 = vmatmul.mubr.msk.f32.vlgmr.msra.gmra.mrb[0].mxu0 %vm132_vm0, %v108_v27  ;;  %v109_v30 = vsel %vm70_vm5, %v54_v14, %v93_v24  ;;  %v101_v33 = vmul.f32 %v623_v5, %v62_v29  ;;  %v56_v34 = vadd.f32 %v618_v4, %v33_v25  ;;  %v726_v8 = vld [vmem:[%s899_s6] ss:$0 sm:$0xff]  ;;  %v382_v16 = vld [vmem:[%s900_s1 + $0x8] sm:$0xff] }
   0xb   :  { %543 = vmatprep.mubr.msk.f32.mxu1 %vm132_vm0, %v115_v23  ;;  %534 = vmatprep.mubr.msk.f32.mxu0 %vm132_vm0, %v109_v30  ;;  %v64_v35 = vadd.f32 %v618_v4, %v41_v26  ;;  %vm71_vm7 = vcmp.ge.f32.partialorder %v55_v31, 0.0  ;;  %v94_v37 = vmul.f32 %v623_v5, %v55_v31  ;;  %vm79_vm8 = vcmp.ge.f32.partialorder %v63_v32, 0.0  ;;  %v751_v24 = vld [vmem:[%s901_s7] ss:$0 sm:$0xff] }
   0xc   :  { %544 = vmatmul.mubr.msk.f32.vlgmr.msra.gmra.mrb[0].mxu1 %vm132_vm0, %v116_v28  ;;  %v102_v38 = vmul.f32 %v623_v5, %v63_v32  ;;  %v117_v41 = vsel %vm78_vm6, %v62_v29, %v101_v33  ;;  %vm72_vm9 = vcmp.ge.f32.partialorder %v56_v34, 0.0  ;;  %v95_v42 = vmul.f32 %v623_v5, %v56_v34 }
   0xd   :  { %vm80_vm10 = vcmp.ge.f32.partialorder %v64_v35, 0.0  ;;  %546 = vmatprep.mubr.msk.f32.mxu1 %vm132_vm0, %v117_v41  ;;  %v110_v44 = vsel %vm71_vm7, %v55_v31, %v94_v37  ;;  %v103_v46 = vmul.f32 %v623_v5, %v64_v35  ;;  %v57_v47 = vadd.f32 %v618_v4, %v34_v36 }
   0xe   :  { %v118_v45 = vsel %vm79_vm8, %v63_v32, %v102_v38  ;;  %535 = vmatmul.mubr.msk.f32.gmra.mrb[2].mxu0 %vm132_vm0, %v110_v44  ;;  %v111_v48 = vsel %vm72_vm9, %v56_v34, %v95_v42  ;;  %v65_v49 = vadd.f32 %v618_v4, %v42_v39  ;;  %v58_v50 = vadd.f32 %v618_v4, %v35_v40 }
   0xf   :  { %537 = vmatprep.mubr.msk.f32.mxu0 %vm132_vm0, %v111_v48  ;;  %v119_v52 = vsel %vm80_vm10, %v64_v35, %v103_v46  ;;  %vm73_vm11 = vcmp.ge.f32.partialorder %v57_v47, 0.0  ;;  %v96_v53 = vmul.f32 %v623_v5, %v57_v47  ;;  %v66_v54 = vadd.f32 %v618_v4, %v43_v43  ;;  %v384_v46 = vld [vmem:[%s900_s1 + $0x18] sm:$0xff] }
  0x10   :  { %547 = vmatmul.mubr.msk.f32.gmra.mrb[2].mxu1 %vm132_vm0, %v118_v45  ;;  %vm81_vm12 = vcmp.ge.f32.partialorder %v65_v49, 0.0  ;;  %v104_v56 = vmul.f32 %v623_v5, %v65_v49  ;;  %vm74_vm13 = vcmp.ge.f32.partialorder %v58_v50, 0.0  ;;  %v97_v57 = vmul.f32 %v623_v5, %v58_v50 }
  0x11   :  { %549 = vmatprep.mubr.msk.f32.mxu1 %vm132_vm0, %v119_v52  ;;  %v112_v58 = vsel %vm73_vm11, %v57_v47, %v96_v53  ;;  %vm82_vm14 = vcmp.ge.f32.partialorder %v66_v54, 0.0  ;;  %v105_v59 = vmul.f32 %v623_v5, %v66_v54  ;;  %v59_v60 = vadd.f32 %v618_v4, %v36_v51  ;;  %v392_v52 = vld [vmem:[%s900_s1 + $0x58] sm:$0xff] }
  0x12   :  { %538 = vmatmul.mubr.msk.f32.gmra.mrb[4].mxu0 %vm132_vm0, %v112_v58  ;;  %v120_v61 = vsel %vm81_vm12, %v65_v49, %v104_v56  ;;  %v113_v62 = vsel %vm74_vm13, %v58_v50, %v97_v57  ;;  %v67_v63 = vadd.f32 %v618_v4, %v44_v55  ;;  %v721_v4 = vld [vmem:[%s898_s5] ss:$0 sm:$0xff] }
  0x13   :  { %540 = vmatprep.mubr.msk.f32.mxu0 %vm132_vm0, %v113_v62  ;;  %v121_v0 = vsel %vm82_vm14, %v66_v54, %v105_v59  ;;  %vm75_vm15 = vcmp.ge.f32.partialorder %v59_v60, 0.0  ;;  %v98_v1 = vmul.f32 %v623_v5, %v59_v60 }
  0x14   :  { %550 = vmatmul.mubr.msk.f32.gmra.mrb[4].mxu1 %vm132_vm0, %v120_v61  ;;  %vm83_vm1 = vcmp.ge.f32.partialorder %v67_v63, 0.0  ;;  %v106_v2 = vmul.f32 %v623_v5, %v67_v63 }
  0x15   :  { %552 = vmatprep.mubr.msk.f32.mxu1 %vm132_vm0, %v121_v0  ;;  %v114_v3 = vsel %vm75_vm15, %v59_v60, %v98_v1  ;;  %v383_v1 = vld [vmem:[%s900_s1 + $0x10] sm:$0xff] }
  0x16   :  { %541 = vmatmul.mubr.msk.f32.gmra.mrb[6].mxu0 %vm132_vm0, %v114_v3  ;;  %v122_v6 = vsel %vm83_vm1, %v67_v63, %v106_v2 }
  0x18   :  { %553 = vmatmul.mubr.msk.f32.gmra.mrb[6].mxu1 %vm132_vm0, %v122_v6 }
  0xdd   :  { %v533_v7 = vpop.f32.mrb[0].mxu0 }
  0xde   :  { %v253_v5 = vadd.f32 %v533_v7, %v721_v4  ;;  %v247_v11 = vpop.f32.mrb[1].mxu0 }
  0xdf   :  { %v545_v9 = vpop.f32.mrb[0].mxu1  ;;  %v248_v13 = vadd.f32 %v721_v4, %v247_v11 }
  0xe0   :  { %v293_v10 = vadd.f32 %v545_v9, %v721_v4  ;;  %v287_v12 = vpop.f32.mrb[1].mxu1  ;;  %vm327_vm2 = vcmp.ge.f32.partialorder %v253_v5, 0.0  ;;  %v350_v15 = vmul.f32 %v726_v8, %v253_v5  ;;  %v391_v9 = vld [vmem:[%s900_s1 + $0x50] sm:$0xff] }
  0xe1   :  { %v288_v14 = vadd.f32 %v721_v4, %v287_v12  ;;  %vm326_vm4 = vcmp.ge.f32.partialorder %v248_v13, 0.0  ;;  %v349_v19 = vmul.f32 %v726_v8, %v248_v13  ;;  %v536_v26 = vpop.f32.mrb[2].mxu0 }
  0xe2   :  { %vm335_vm3 = vcmp.ge.f32.partialorder %v293_v10, 0.0  ;;  %v358_v17 = vmul.f32 %v726_v8, %v293_v10  ;;  %v366_v23 = vsel %vm327_vm2, %v253_v5, %v350_v15  ;;  %v257_v32 = vpop.f32.mrb[3].mxu0  ;;  %v263_v36 = vadd.f32 %v536_v26, %v721_v4 }
  0xe3   :  { %vm334_vm5 = vcmp.ge.f32.partialorder %v288_v14, 0.0  ;;  %v357_v21 = vmul.f32 %v726_v8, %v288_v14  ;;  %v548_v27 = vpop.f32.mrb[2].mxu1  ;;  %v398_v28 = vadd.f32 %v382_v16, %v366_v23  ;;  %v365_v30 = vsel %vm326_vm4, %v248_v13, %v349_v19  ;;  %v386_v13 = vld [vmem:[%s900_s1 + $0x28] sm:$0xff] }
  0xe4   :  { %v374_v25 = vsel %vm335_vm3, %v293_v10, %v358_v17  ;;  %v297_v33 = vpop.f32.mrb[3].mxu1  ;;  %v397_v34 = vadd.f32 %v381_v20, %v365_v30  ;;  %v303_v37 = vadd.f32 %v548_v27, %v721_v4  ;;  %vm329_vm10 = vcmp.ge.f32.partialorder %v263_v36, 0.0 }
  0xe5   :  { %v406_v29 = vadd.f32 %v390_v18, %v374_v25  ;;  %v373_v31 = vsel %vm334_vm5, %v288_v14, %v357_v21  ;;  %vm414_vm6 = vcmp.ge.f32.partialorder %v398_v28, 0.0  ;;  %v437_v38 = vmul.f32 %v751_v24, %v398_v28  ;;  %v539_v42 = vpop.f32.mrb[4].mxu0  ;;  %v394_v21 = vld [vmem:[%s900_s1 + $0x68] sm:$0xff] }
  0xe6   :  { %v405_v35 = vadd.f32 %v389_v22, %v373_v31  ;;  %vm413_vm8 = vcmp.ge.f32.partialorder %v397_v34, 0.0  ;;  %v436_v40 = vmul.f32 %v751_v24, %v397_v34  ;;  %v352_v45 = vmul.f32 %v726_v8, %v263_v36  ;;  %v267_v48 = vpop.f32.mrb[5].mxu0 }
  0xe7   :  { %vm422_vm7 = vcmp.ge.f32.partialorder %v406_v29, 0.0  ;;  %v445_v39 = vmul.f32 %v751_v24, %v406_v29  ;;  %v453_v43 = vsel %vm414_vm6, %v398_v28, %v437_v38  ;;  %v551_v47 = vpop.f32.mrb[4].mxu1  ;;  %vm337_vm11 = vcmp.ge.f32.partialorder %v303_v37, 0.0  ;;  %v385_v28 = vld [vmem:[%s900_s1 + $0x20] sm:$0xff] }
  0xe8   :  { %vm421_vm9 = vcmp.ge.f32.partialorder %v405_v35, 0.0  ;;  %v444_v41 = vmul.f32 %v751_v24, %v405_v35  ;;  %469 = vst.msk [vmem:[%s902_s8 + $0x8] sm:$0xff] %vm132_vm0, %v453_v43  ;;  %v452_v49 = vsel %vm413_vm8, %v397_v34, %v436_v40  ;;  %v360_v51 = vmul.f32 %v726_v8, %v303_v37  ;;  %v307_v53 = vpop.f32.mrb[5].mxu1  ;;  %v393_v40 = vld [vmem:[%s900_s1 + $0x60] sm:$0xff] }
  0xe9   :  { %v461_v44 = vsel %vm422_vm7, %v406_v29, %v445_v39  ;;  %468 = vst.msk [vmem:[%s902_s8] sm:$0xff] %vm132_vm0, %v452_v49  ;;  %v368_v54 = vsel %vm329_vm10, %v263_v36, %v352_v45  ;;  %v258_v55 = vadd.f32 %v721_v4, %v257_v32  ;;  %v298_v56 = vadd.f32 %v721_v4, %v297_v33  ;;  %v542_v62 = vpop.f32.mrb[6].mxu0 }
  0xea   :  { %477 = vst.msk [vmem:[%s902_s8 + $0x48] sm:$0xff] %vm132_vm0, %v461_v44  ;;  %v460_v50 = vsel %vm421_vm9, %v405_v35, %v444_v41  ;;  %v273_v57 = vadd.f32 %v539_v42, %v721_v4  ;;  %v400_v58 = vadd.f32 %v384_v46, %v368_v54  ;;  %v376_v59 = vsel %vm337_vm11, %v303_v37, %v360_v51  ;;  %v277_v3 = vpop.f32.mrb[7].mxu0  ;;  %v388_v42 = vld [vmem:[%s900_s1 + $0x38] sm:$0xff] }
  0xeb   :  { %476 = vst.msk [vmem:[%s902_s8 + $0x40] sm:$0xff] %vm132_vm0, %v460_v50  ;;  %v313_v60 = vadd.f32 %v551_v47, %v721_v4  ;;  %v268_v61 = vadd.f32 %v721_v4, %v267_v48  ;;  %v408_v63 = vadd.f32 %v392_v52, %v376_v59  ;;  %vm328_vm12 = vcmp.ge.f32.partialorder %v258_v55, 0.0  ;;  %v554_v2 = vpop.f32.mrb[6].mxu1  ;;  %v396_v54 = vld [vmem:[%s900_s1 + $0x78] sm:$0xff] }
  0xec   :  { %v351_v0 = vmul.f32 %v726_v8, %v258_v55  ;;  %vm336_vm13 = vcmp.ge.f32.partialorder %v298_v56, 0.0  ;;  %vm416_vm14 = vcmp.ge.f32.partialorder %v400_v58, 0.0  ;;  %v439_v6 = vmul.f32 %v751_v24, %v400_v58  ;;  %v317_v5 = vpop.f32.mrb[7].mxu1 }
  0xed   :  { %v359_v7 = vmul.f32 %v726_v8, %v298_v56  ;;  %vm331_vm15 = vcmp.ge.f32.partialorder %v273_v57, 0.0  ;;  %vm424_vm1 = vcmp.ge.f32.partialorder %v408_v63, 0.0  ;;  %v447_v10 = vmul.f32 %v751_v24, %v408_v63 }
  0xee   :  { %v367_v11 = vsel %vm328_vm12, %v258_v55, %v351_v0  ;;  %v354_v12 = vmul.f32 %v726_v8, %v273_v57  ;;  %v455_v14 = vsel %vm416_vm14, %v400_v58, %v439_v6  ;;  %vm339_vm2 = vcmp.ge.f32.partialorder %v313_v60, 0.0 }
  0xef   :  { %v399_v15 = vadd.f32 %v383_v1, %v367_v11  ;;  %v375_v16 = vsel %vm336_vm13, %v298_v56, %v359_v7  ;;  %471 = vst.msk [vmem:[%s902_s8 + $0x18] sm:$0xff] %vm132_vm0, %v455_v14  ;;  %v463_v17 = vsel %vm424_vm1, %v408_v63, %v447_v10  ;;  %v362_v20 = vmul.f32 %v726_v8, %v313_v60  ;;  %v395_v1 = vld [vmem:[%s900_s1 + $0x70] sm:$0xff] }
  0xf0   :  { %v407_v18 = vadd.f32 %v391_v9, %v375_v16  ;;  %v370_v19 = vsel %vm331_vm15, %v273_v57, %v354_v12  ;;  %479 = vst.msk [vmem:[%s902_s8 + $0x58] sm:$0xff] %vm132_vm0, %v463_v17  ;;  %vm330_vm4 = vcmp.ge.f32.partialorder %v268_v61, 0.0  ;;  %v353_v27 = vmul.f32 %v726_v8, %v268_v61 }
  0xf1   :  { %vm415_vm3 = vcmp.ge.f32.partialorder %v399_v15, 0.0  ;;  %v438_v22 = vmul.f32 %v751_v24, %v399_v15  ;;  %v402_v23 = vadd.f32 %v386_v13, %v370_v19  ;;  %v378_v26 = vsel %vm339_vm2, %v313_v60, %v362_v20 }
  0xf2   :  { %vm423_vm5 = vcmp.ge.f32.partialorder %v407_v18, 0.0  ;;  %v446_v25 = vmul.f32 %v751_v24, %v407_v18  ;;  %v410_v31 = vadd.f32 %v394_v21, %v378_v26  ;;  %v369_v33 = vsel %vm330_vm4, %v268_v61, %v353_v27 }
  0xf3   :  { %v454_v29 = vsel %vm415_vm3, %v399_v15, %v438_v22  ;;  %vm418_vm6 = vcmp.ge.f32.partialorder %v402_v23, 0.0  ;;  %v441_v30 = vmul.f32 %v751_v24, %v402_v23  ;;  %v308_v34 = vadd.f32 %v721_v4, %v307_v53 }
  0xf4   :  { %470 = vst.msk [vmem:[%s902_s8 + $0x10] sm:$0xff] %vm132_vm0, %v454_v29  ;;  %v462_v32 = vsel %vm423_vm5, %v407_v18, %v446_v25  ;;  %v283_v35 = vadd.f32 %v542_v62, %v721_v4  ;;  %vm426_vm7 = vcmp.ge.f32.partialorder %v410_v31, 0.0  ;;  %v449_v37 = vmul.f32 %v751_v24, %v410_v31 }
  0xf5   :  { %478 = vst.msk [vmem:[%s902_s8 + $0x50] sm:$0xff] %vm132_vm0, %v462_v32  ;;  %v457_v36 = vsel %vm418_vm6, %v402_v23, %v441_v30  ;;  %v401_v38 = vadd.f32 %v385_v28, %v369_v33  ;;  %vm338_vm8 = vcmp.ge.f32.partialorder %v308_v34, 0.0  ;;  %v361_v39 = vmul.f32 %v726_v8, %v308_v34 }
  0xf6   :  { %473 = vst.msk [vmem:[%s902_s8 + $0x28] sm:$0xff] %vm132_vm0, %v457_v36  ;;  %vm333_vm9 = vcmp.ge.f32.partialorder %v283_v35, 0.0  ;;  %v356_v41 = vmul.f32 %v726_v8, %v283_v35  ;;  %v465_v43 = vsel %vm426_vm7, %v410_v31, %v449_v37  ;;  %v323_v45 = vadd.f32 %v554_v2, %v721_v4 }
  0xf7   :  { %vm417_vm10 = vcmp.ge.f32.partialorder %v401_v38, 0.0  ;;  %v440_v44 = vmul.f32 %v751_v24, %v401_v38  ;;  %481 = vst.msk [vmem:[%s902_s8 + $0x68] sm:$0xff] %vm132_vm0, %v465_v43  ;;  %v377_v46 = vsel %vm338_vm8, %v308_v34, %v361_v39  ;;  %v278_v48 = vadd.f32 %v721_v4, %v277_v3 }
  0xf8   :  { %v372_v47 = vsel %vm333_vm9, %v283_v35, %v356_v41  ;;  %v318_v49 = vadd.f32 %v721_v4, %v317_v5  ;;  %v409_v51 = vadd.f32 %v393_v40, %v377_v46  ;;  %vm341_vm11 = vcmp.ge.f32.partialorder %v323_v45, 0.0  ;;  %v387_v4 = vld [vmem:[%s900_s1 + $0x30] sm:$0xff] }
  0xf9   :  { %v456_v50 = vsel %vm417_vm10, %v401_v38, %v440_v44  ;;  %v404_v52 = vadd.f32 %v388_v42, %v372_v47  ;;  %v364_v53 = vmul.f32 %v726_v8, %v323_v45  ;;  %vm332_vm12 = vcmp.ge.f32.partialorder %v278_v48, 0.0 }
  0xfa   :  { %472 = vst.msk [vmem:[%s902_s8 + $0x20] sm:$0xff] %vm132_vm0, %v456_v50  ;;  %v355_v55 = vmul.f32 %v726_v8, %v278_v48  ;;  %vm340_vm13 = vcmp.ge.f32.partialorder %v318_v49, 0.0  ;;  %vm425_vm14 = vcmp.ge.f32.partialorder %v409_v51, 0.0  ;;  %v448_v56 = vmul.f32 %v751_v24, %v409_v51 }
  0xfb   :  { %vm420_vm15 = vcmp.ge.f32.partialorder %v404_v52, 0.0  ;;  %v443_v57 = vmul.f32 %v751_v24, %v404_v52  ;;  %v380_v58 = vsel %vm341_vm11, %v323_v45, %v364_v53  ;;  %v363_v60 = vmul.f32 %v726_v8, %v318_v49 }
  0xfc   :  { %v371_v59 = vsel %vm332_vm12, %v278_v48, %v355_v55  ;;  %v464_v61 = vsel %vm425_vm14, %v409_v51, %v448_v56  ;;  %v412_v63 = vadd.f32 %v396_v54, %v380_v58 }
  0xfd   :  { %v459_v62 = vsel %vm420_vm15, %v404_v52, %v443_v57  ;;  %v403_v0 = vadd.f32 %v387_v4, %v371_v59  ;;  %480 = vst.msk [vmem:[%s902_s8 + $0x60] sm:$0xff] %vm132_vm0, %v464_v61  ;;  %v379_v2 = vsel %vm340_vm13, %v318_v49, %v363_v60 }
  0xfe   :  { %475 = vst.msk [vmem:[%s902_s8 + $0x38] sm:$0xff] %vm132_vm0, %v459_v62  ;;  %vm428_vm1 = vcmp.ge.f32.partialorder %v412_v63, 0.0  ;;  %v451_v8 = vmul.f32 %v751_v24, %v412_v63  ;;  %v411_v6 = vadd.f32 %v395_v1, %v379_v2 }
  0xff   :  { %vm419_vm2 = vcmp.ge.f32.partialorder %v403_v0, 0.0  ;;  %v442_v3 = vmul.f32 %v751_v24, %v403_v0 }
 0x100   :  { %v467_v7 = vsel %vm428_vm1, %v412_v63, %v451_v8  ;;  %vm427_vm3 = vcmp.ge.f32.partialorder %v411_v6, 0.0  ;;  %v450_v5 = vmul.f32 %v751_v24, %v411_v6 }
 0x101   :  { %v458_v9 = vsel %vm419_vm2, %v403_v0, %v442_v3  ;;  %483 = vst.msk [vmem:[%s902_s8 + $0x78] sm:$0xff] %vm132_vm0, %v467_v7 }
 0x102   :  { %474 = vst.msk [vmem:[%s902_s8 + $0x30] sm:$0xff] %vm132_vm0, %v458_v9  ;;  %v466_v10 = vsel %vm427_vm3, %v411_v6, %v450_v5 }
 0x103   :  { %482 = vst.msk [vmem:[%s902_s8 + $0x70] sm:$0xff] %vm132_vm0, %v466_v10 }

// kernel: _lambda_.120
= control target key start
LH: loop header
LB: loop body
LE: loop exit
PB: predicated region body
PF: predicated region fallthrough
CT: control target
= control target key end

     0   :  { %vm42_vm0 = vcmask 130048   ;;  %vm291_vm1 = vcmask 31744   ;;  %s583_s1 = inlined_call_operand.vmem [shape: f32[16,4], index: 1, kind: input, shape index: {}]   ;;  %s584_s0 = inlined_call_operand.vmem [shape: f32[128,16], index: 0, kind: input, shape index: {}]   ;;  %s585_s2 = inlined_call_operand.vmem [shape: f32[1,4], index: 2, kind: input, shape index: {}]   ;;  %s586_s3 = inlined_call_operand.vmem [shape: f32[1,4], index: 3, kind: input, shape index: {}]   ;;  %s587_s4 = inlined_call_operand.vmem [shape: f32[128,4], index: 4, kind: output, shape index: {}]  }
   0x1   :  { %v33_v0 = vld [vmem:[%s583_s1] sm:$0xff]  ;;  %v34_v1 = vld [vmem:[%s583_s1 + $0x8] sm:$0xff]  ;;  %v19_v7 = vld [vmem:[%s584_s0 + $0x10] sm:$0xff] }
   0x2   :  { %v17_v2 = vld [vmem:[%s584_s0] sm:$0xff]  ;;  %v376_v3 = vpack.c.bf16 %v34_v1, %v33_v0  ;;  %v18_v5 = vld [vmem:[%s584_s0 + $0x8] sm:$0xff]  ;;  %v27_v8 = vld [vmem:[%s584_s0 + $0x50] sm:$0xff] }
   0x3   :  { %352 = vmatprep.mubr.msk.f32.mxu0 %vm42_vm0, %v17_v2  ;;  %v25_v4 = vld [vmem:[%s584_s0 + $0x40] sm:$0xff]  ;;  %v26_v6 = vld [vmem:[%s584_s0 + $0x48] sm:$0xff]  ;;  %v20_v9 = vld [vmem:[%s584_s0 + $0x18] sm:$0xff] }
   0x4   :  { %364 = vmatprep.mubr.msk.f32.mxu1 %vm42_vm0, %v25_v4  ;;  %377 = vmatprep.subr.bf16.mxu0 %v376_v3  ;;  %v28_v10 = vld [vmem:[%s584_s0 + $0x58] sm:$0xff]  ;;  %v21_v11 = vld [vmem:[%s584_s0 + $0x20] sm:$0xff]  ;;  %v22_v13 = vld [vmem:[%s584_s0 + $0x28] sm:$0xff] }
   0x5   :  { %380 = vmatprep.subr.bf16.mxu1 %v376_v3  ;;  %379 = vmatpush3.bf16.msra.mxu0 %v376_v3  ;;  %v29_v12 = vld [vmem:[%s584_s0 + $0x60] sm:$0xff]  ;;  %v30_v14 = vld [vmem:[%s584_s0 + $0x68] sm:$0xff]  ;;  %v23_v15 = vld [vmem:[%s584_s0 + $0x30] sm:$0xff] }
   0x6   :  { %381 = vmatpush3.bf16.msra.mxu1 %v376_v3  ;;  %v31_v16 = vld [vmem:[%s584_s0 + $0x70] sm:$0xff]  ;;  %v24_v17 = vld [vmem:[%s584_s0 + $0x38] sm:$0xff]  ;;  %v480_v19 = vld [vmem:[%s585_s2] ss:$0 sm:$0xff] }
   0x7   :  { %v32_v18 = vld [vmem:[%s584_s0 + $0x78] sm:$0xff]  ;;  %v485_v21 = vld [vmem:[%s586_s3] ss:$0 sm:$0xff] }
   0x8   :  { %353 = vmatmul.mubr.msk.f32.vlgmr.msra.gmra.mrb[0].mxu0 %vm42_vm0, %v18_v5 }
   0x9   :  { %365 = vmatmul.mubr.msk.f32.vlgmr.msra.gmra.mrb[0].mxu1 %vm42_vm0, %v26_v6  ;;  %355 = vmatprep.mubr.msk.f32.mxu0 %vm42_vm0, %v19_v7 }
   0xa   :  { %367 = vmatprep.mubr.msk.f32.mxu1 %vm42_vm0, %v27_v8 }
   0xc   :  { %356 = vmatmul.mubr.msk.f32.gmra.mrb[2].mxu0 %vm42_vm0, %v20_v9 }
   0xd   :  { %368 = vmatmul.mubr.msk.f32.gmra.mrb[2].mxu1 %vm42_vm0, %v28_v10  ;;  %358 = vmatprep.mubr.msk.f32.mxu0 %vm42_vm0, %v21_v11 }
   0xe   :  { %370 = vmatprep.mubr.msk.f32.mxu1 %vm42_vm0, %v29_v12 }
  0x10   :  { %359 = vmatmul.mubr.msk.f32.gmra.mrb[4].mxu0 %vm42_vm0, %v22_v13 }
  0x11   :  { %371 = vmatmul.mubr.msk.f32.gmra.mrb[4].mxu1 %vm42_vm0, %v30_v14  ;;  %361 = vmatprep.mubr.msk.f32.mxu0 %vm42_vm0, %v23_v15 }
  0x12   :  { %373 = vmatprep.mubr.msk.f32.mxu1 %vm42_vm0, %v31_v16 }
  0x14   :  { %362 = vmatmul.mubr.msk.f32.gmra.mrb[6].mxu0 %vm42_vm0, %v24_v17 }
  0x15   :  { %374 = vmatmul.mubr.msk.f32.gmra.mrb[6].mxu1 %vm42_vm0, %v32_v18 }
  0xdb   :  { %v354_v20 = vpop.f32.mrb[0].mxu0 }
  0xdc   :  { %v366_v22 = vpop.f32.mrb[0].mxu1  ;;  %v163_v23 = vadd.f32 %v354_v20, %v480_v19  ;;  %v157_v25 = vpop.f32.mrb[1].mxu0 }
  0xdd   :  { %v203_v24 = vadd.f32 %v366_v22, %v480_v19  ;;  %v197_v26 = vpop.f32.mrb[1].mxu1  ;;  %v158_v27 = vadd.f32 %v480_v19, %v157_v25 }
  0xde   :  { %v198_v28 = vadd.f32 %v480_v19, %v197_v26  ;;  %vm237_vm2 = vcmp.ge.f32.partialorder %v163_v23, 0.0  ;;  %v260_v29 = vmul.f32 %v485_v21, %v163_v23 }
  0xdf   :  { %vm245_vm3 = vcmp.ge.f32.partialorder %v203_v24, 0.0  ;;  %v268_v30 = vmul.f32 %v485_v21, %v203_v24  ;;  %vm236_vm4 = vcmp.ge.f32.partialorder %v158_v27, 0.0  ;;  %v259_v31 = vmul.f32 %v485_v21, %v158_v27  ;;  %v357_v33 = vpop.f32.mrb[2].mxu0 }
  0xe0   :  { %vm244_vm5 = vcmp.ge.f32.partialorder %v198_v28, 0.0  ;;  %v267_v32 = vmul.f32 %v485_v21, %v198_v28  ;;  %v369_v34 = vpop.f32.mrb[2].mxu1  ;;  %v276_v35 = vsel %vm237_vm2, %v163_v23, %v260_v29  ;;  %v173_v37 = vadd.f32 %v357_v33, %v480_v19  ;;  %v167_v39 = vpop.f32.mrb[3].mxu0 }
  0xe1   :  { %v284_v36 = vsel %vm245_vm3, %v203_v24, %v268_v30  ;;  %v213_v38 = vadd.f32 %v369_v34, %v480_v19  ;;  %v207_v40 = vpop.f32.mrb[3].mxu1  ;;  %293 = vst.msk [vmem:[%s587_s4 + $0x8] sm:$0xff] %vm291_vm1, %v276_v35  ;;  %v275_v41 = vsel %vm236_vm4, %v158_v27, %v259_v31  ;;  %v168_v43 = vadd.f32 %v480_v19, %v167_v39 }
  0xe2   :  { %301 = vst.msk [vmem:[%s587_s4 + $0x48] sm:$0xff] %vm291_vm1, %v284_v36  ;;  %v283_v42 = vsel %vm244_vm5, %v198_v28, %v267_v32  ;;  %v208_v44 = vadd.f32 %v480_v19, %v207_v40  ;;  %292 = vst.msk [vmem:[%s587_s4] sm:$0xff] %vm291_vm1, %v275_v41  ;;  %vm239_vm6 = vcmp.ge.f32.partialorder %v173_v37, 0.0  ;;  %v262_v45 = vmul.f32 %v485_v21, %v173_v37 }
  0xe3   :  { %300 = vst.msk [vmem:[%s587_s4 + $0x40] sm:$0xff] %vm291_vm1, %v283_v42  ;;  %vm247_vm7 = vcmp.ge.f32.partialorder %v213_v38, 0.0  ;;  %v270_v46 = vmul.f32 %v485_v21, %v213_v38  ;;  %vm238_vm8 = vcmp.ge.f32.partialorder %v168_v43, 0.0  ;;  %v261_v47 = vmul.f32 %v485_v21, %v168_v43  ;;  %v360_v49 = vpop.f32.mrb[4].mxu0 }
  0xe4   :  { %vm246_vm9 = vcmp.ge.f32.partialorder %v208_v44, 0.0  ;;  %v269_v48 = vmul.f32 %v485_v21, %v208_v44  ;;  %v372_v50 = vpop.f32.mrb[4].mxu1  ;;  %v278_v51 = vsel %vm239_vm6, %v173_v37, %v262_v45  ;;  %v183_v53 = vadd.f32 %v360_v49, %v480_v19  ;;  %v177_v55 = vpop.f32.mrb[5].mxu0 }
  0xe5   :  { %v286_v52 = vsel %vm247_vm7, %v213_v38, %v270_v46  ;;  %v223_v54 = vadd.f32 %v372_v50, %v480_v19  ;;  %v217_v56 = vpop.f32.mrb[5].mxu1  ;;  %295 = vst.msk [vmem:[%s587_s4 + $0x18] sm:$0xff] %vm291_vm1, %v278_v51  ;;  %v277_v57 = vsel %vm238_vm8, %v168_v43, %v261_v47  ;;  %v178_v59 = vadd.f32 %v480_v19, %v177_v55 }
  0xe6   :  { %303 = vst.msk [vmem:[%s587_s4 + $0x58] sm:$0xff] %vm291_vm1, %v286_v52  ;;  %v285_v58 = vsel %vm246_vm9, %v208_v44, %v269_v48  ;;  %v218_v60 = vadd.f32 %v480_v19, %v217_v56  ;;  %294 = vst.msk [vmem:[%s587_s4 + $0x10] sm:$0xff] %vm291_vm1, %v277_v57  ;;  %vm241_vm10 = vcmp.ge.f32.partialorder %v183_v53, 0.0  ;;  %v264_v61 = vmul.f32 %v485_v21, %v183_v53 }
  0xe7   :  { %302 = vst.msk [vmem:[%s587_s4 + $0x50] sm:$0xff] %vm291_vm1, %v285_v58  ;;  %vm249_vm11 = vcmp.ge.f32.partialorder %v223_v54, 0.0  ;;  %v272_v62 = vmul.f32 %v485_v21, %v223_v54  ;;  %vm240_vm12 = vcmp.ge.f32.partialorder %v178_v59, 0.0  ;;  %v263_v63 = vmul.f32 %v485_v21, %v178_v59  ;;  %v363_v1 = vpop.f32.mrb[6].mxu0 }
  0xe8   :  { %vm248_vm13 = vcmp.ge.f32.partialorder %v218_v60, 0.0  ;;  %v271_v0 = vmul.f32 %v485_v21, %v218_v60  ;;  %v375_v2 = vpop.f32.mrb[6].mxu1  ;;  %v280_v3 = vsel %vm241_vm10, %v183_v53, %v264_v61  ;;  %v193_v5 = vadd.f32 %v363_v1, %v480_v19  ;;  %v187_v7 = vpop.f32.mrb[7].mxu0 }
  0xe9   :  { %v288_v4 = vsel %vm249_vm11, %v223_v54, %v272_v62  ;;  %v233_v6 = vadd.f32 %v375_v2, %v480_v19  ;;  %v227_v8 = vpop.f32.mrb[7].mxu1  ;;  %297 = vst.msk [vmem:[%s587_s4 + $0x28] sm:$0xff] %vm291_vm1, %v280_v3  ;;  %v279_v9 = vsel %vm240_vm12, %v178_v59, %v263_v63  ;;  %v188_v11 = vadd.f32 %v480_v19, %v187_v7 }
  0xea   :  { %305 = vst.msk [vmem:[%s587_s4 + $0x68] sm:$0xff] %vm291_vm1, %v288_v4  ;;  %v287_v10 = vsel %vm248_vm13, %v218_v60, %v271_v0  ;;  %v228_v12 = vadd.f32 %v480_v19, %v227_v8  ;;  %296 = vst.msk [vmem:[%s587_s4 + $0x20] sm:$0xff] %vm291_vm1, %v279_v9  ;;  %vm243_vm14 = vcmp.ge.f32.partialorder %v193_v5, 0.0  ;;  %v266_v13 = vmul.f32 %v485_v21, %v193_v5 }
  0xeb   :  { %304 = vst.msk [vmem:[%s587_s4 + $0x60] sm:$0xff] %vm291_vm1, %v287_v10  ;;  %vm251_vm15 = vcmp.ge.f32.partialorder %v233_v6, 0.0  ;;  %v274_v14 = vmul.f32 %v485_v21, %v233_v6  ;;  %vm242_vm0 = vcmp.ge.f32.partialorder %v188_v11, 0.0  ;;  %v265_v15 = vmul.f32 %v485_v21, %v188_v11 }
  0xec   :  { %vm250_vm2 = vcmp.ge.f32.partialorder %v228_v12, 0.0  ;;  %v273_v16 = vmul.f32 %v485_v21, %v228_v12  ;;  %v282_v17 = vsel %vm243_vm14, %v193_v5, %v266_v13 }
  0xed   :  { %v290_v18 = vsel %vm251_vm15, %v233_v6, %v274_v14  ;;  %299 = vst.msk [vmem:[%s587_s4 + $0x38] sm:$0xff] %vm291_vm1, %v282_v17  ;;  %v281_v19 = vsel %vm242_vm0, %v188_v11, %v265_v15 }
  0xee   :  { %307 = vst.msk [vmem:[%s587_s4 + $0x78] sm:$0xff] %vm291_vm1, %v290_v18  ;;  %v289_v20 = vsel %vm250_vm2, %v228_v12, %v273_v16  ;;  %298 = vst.msk [vmem:[%s587_s4 + $0x30] sm:$0xff] %vm291_vm1, %v281_v19 }
  0xef   :  { %306 = vst.msk [vmem:[%s587_s4 + $0x70] sm:$0xff] %vm291_vm1, %v289_v20 }

// kernel: _lambda_.121
= control target key start
LH: loop header
LB: loop body
LE: loop exit
PB: predicated region body
PF: predicated region fallthrough
CT: control target
= control target key end

     0   :  { %vm180_vm0 = vcmask 1043456   ;;  %vm131_vm1 = vcmask 31744   ;;  %s889_s2 = inlined_call_operand.vmem [shape: f32[4,16], index: 2, kind: input, shape index: {}]   ;;  %s890_s0 = inlined_call_operand.vmem [shape: f32[128,4], index: 0, kind: input, shape index: {}]   ;;  %s891_s3 = inlined_call_operand.vmem [shape: f32[1,4], index: 3, kind: input, shape index: {}]   ;;  %s892_s4 = inlined_call_operand.vmem [shape: f32[1,4], index: 4, kind: input, shape index: {}]   ;;  %s893_s5 = inlined_call_operand.vmem [shape: f32[1,16], index: 5, kind: input, shape index: {}]   ;;  %s894_s6 = inlined_call_operand.vmem [shape: f32[1,16], index: 6, kind: input, shape index: {}, may-alias: {6,7}]   ;;  %s895_s1 = inlined_call_operand.vmem [shape: f32[128,16], index: 1, kind: input, shape index: {}]   ;;  %s896_s7 = inlined_call_operand.vmem [shape: f32[1,16], index: 7, kind: input, shape index: {}, may-alias: {6,7}]   ;;  %s897_s8 = inlined_call_operand.vmem [shape: f32[128,16], index: 8, kind: output, shape index: {}]  }
   0x1   :  { %v123_v0 = vld [vmem:[%s889_s2] sm:$0xf]  ;;  %v30_v6 = vld [vmem:[%s890_s0 + $0x8] sm:$0xff]  ;;  %v31_v10 = vld [vmem:[%s890_s0 + $0x10] sm:$0xff] }
   0x2   :  { %v29_v1 = vld [vmem:[%s890_s0] sm:$0xff]  ;;  %531 = vmatprep.subr.msk.mxu0 %vm180_vm0, %v123_v0  ;;  %557 = vmatprep.subr.msk.mxu1 %vm180_vm0, %v123_v0  ;;  %v38_v9 = vld [vmem:[%s890_s0 + $0x48] sm:$0xff]  ;;  %v39_v14 = vld [vmem:[%s890_s0 + $0x50] sm:$0xff] }
   0x3   :  { %v613_v2 = vld [vmem:[%s891_s3] ss:$0 sm:$0xff]  ;;  %532 = vmatpush3.msk.msra.mxu0 %vm180_vm0, %v123_v0  ;;  %558 = vmatpush3.msk.msra.mxu1 %vm180_vm0, %v123_v0  ;;  %v32_v17 = vld [vmem:[%s890_s0 + $0x18] sm:$0xff]  ;;  %v34_v33 = vld [vmem:[%s890_s0 + $0x28] sm:$0xff] }
   0x4   :  { %v52_v3 = vadd.f32 %v613_v2, %v29_v1  ;;  %v619_v4 = vld [vmem:[%s892_s4] ss:$0 sm:$0xff]  ;;  %v53_v8 = vadd.f32 %v613_v2, %v30_v6  ;;  %v61_v12 = vadd.f32 %v613_v2, %v38_v9  ;;  %v54_v13 = vadd.f32 %v613_v2, %v31_v10  ;;  %v40_v18 = vld [vmem:[%s890_s0 + $0x58] sm:$0xff]  ;;  %v42_v34 = vld [vmem:[%s890_s0 + $0x68] sm:$0xff] }
   0x5   :  { %v37_v5 = vld [vmem:[%s890_s0 + $0x40] sm:$0xff]  ;;  %v62_v25 = vadd.f32 %v613_v2, %v39_v14  ;;  %v55_v27 = vadd.f32 %v613_v2, %v32_v17  ;;  %v63_v28 = vadd.f32 %v613_v2, %v40_v18  ;;  %v35_v37 = vld [vmem:[%s890_s0 + $0x30] sm:$0xff]  ;;  %v57_v43 = vadd.f32 %v613_v2, %v34_v33  ;;  %v36_v49 = vld [vmem:[%s890_s0 + $0x38] sm:$0xff] }
   0x6   :  { %v60_v7 = vadd.f32 %v613_v2, %v37_v5  ;;  %vm68_vm2 = vcmp.ge.f32.partialorder %v52_v3, 0.0  ;;  %v91_v11 = vmul.f32 %v619_v4, %v52_v3  ;;  %vm69_vm4 = vcmp.ge.f32.partialorder %v53_v8, 0.0  ;;  %v33_v21 = vld [vmem:[%s890_s0 + $0x20] sm:$0xff]  ;;  %v43_v45 = vld [vmem:[%s890_s0 + $0x70] sm:$0xff]  ;;  %v44_v50 = vld [vmem:[%s890_s0 + $0x78] sm:$0xff] }
   0x7   :  { %v92_v16 = vmul.f32 %v619_v4, %v53_v8  ;;  %vm77_vm5 = vcmp.ge.f32.partialorder %v61_v12, 0.0  ;;  %v100_v20 = vmul.f32 %v619_v4, %v61_v12  ;;  %vm70_vm6 = vcmp.ge.f32.partialorder %v54_v13, 0.0  ;;  %v41_v29 = vld [vmem:[%s890_s0 + $0x60] sm:$0xff] }
   0x8   :  { %vm76_vm3 = vcmp.ge.f32.partialorder %v60_v7, 0.0  ;;  %v99_v15 = vmul.f32 %v619_v4, %v60_v7  ;;  %v107_v19 = vsel %vm68_vm2, %v52_v3, %v91_v11  ;;  %v93_v24 = vmul.f32 %v619_v4, %v54_v13  ;;  %v716_v3 = vld [vmem:[%s893_s5] ss:$0 sm:$0xff] }
   0x9   :  { %533 = vmatprep.mubr.msk.f32.mxu0 %vm131_vm1, %v107_v19  ;;  %v108_v23 = vsel %vm69_vm4, %v53_v8, %v92_v16  ;;  %v116_v26 = vsel %vm77_vm5, %v61_v12, %v100_v20  ;;  %vm78_vm7 = vcmp.ge.f32.partialorder %v62_v25, 0.0  ;;  %v101_v31 = vmul.f32 %v619_v4, %v62_v25  ;;  %v721_v6 = vld [vmem:[%s894_s6] ss:$0 sm:$0xff]  ;;  %v393_v16 = vld [vmem:[%s895_s1 + $0x48] sm:$0xff] }
   0xa   :  { %v115_v22 = vsel %vm76_vm3, %v60_v7, %v99_v15  ;;  %534 = vmatmul.mubr.msk.f32.vlgmr.msra.gmra.mrb[0].mxu0 %vm131_vm1, %v108_v23  ;;  %v109_v30 = vsel %vm70_vm6, %v54_v13, %v93_v24  ;;  %v56_v32 = vadd.f32 %v613_v2, %v33_v21  ;;  %vm71_vm8 = vcmp.ge.f32.partialorder %v55_v27, 0.0  ;;  %v385_v13 = vld [vmem:[%s895_s1 + $0x8] sm:$0xff]  ;;  %v384_v18 = vld [vmem:[%s895_s1] sm:$0xff] }
   0xb   :  { %545 = vmatprep.mubr.msk.f32.mxu1 %vm131_vm1, %v115_v22  ;;  %536 = vmatprep.mubr.msk.f32.mxu0 %vm131_vm1, %v109_v30  ;;  %v94_v35 = vmul.f32 %v619_v4, %v55_v27  ;;  %vm79_vm9 = vcmp.ge.f32.partialorder %v63_v28, 0.0  ;;  %v102_v36 = vmul.f32 %v619_v4, %v63_v28  ;;  %v117_v38 = vsel %vm78_vm7, %v62_v25, %v101_v31  ;;  %v392_v19 = vld [vmem:[%s895_s1 + $0x40] sm:$0xff] }
   0xc   :  { %546 = vmatmul.mubr.msk.f32.vlgmr.msra.gmra.mrb[0].mxu1 %vm131_vm1, %v116_v26  ;;  %vm72_vm10 = vcmp.ge.f32.partialorder %v56_v32, 0.0  ;;  %v95_v39 = vmul.f32 %v619_v4, %v56_v32  ;;  %v64_v40 = vadd.f32 %v613_v2, %v41_v29  ;;  %v65_v44 = vadd.f32 %v613_v2, %v42_v34  ;;  %v745_v21 = vld [vmem:[%s896_s7] ss:$0 sm:$0xff] }
   0xd   :  { %548 = vmatprep.mubr.msk.f32.mxu1 %vm131_vm1, %v117_v38  ;;  %v110_v41 = vsel %vm71_vm8, %v55_v27, %v94_v35  ;;  %v118_v42 = vsel %vm79_vm9, %v63_v28, %v102_v36  ;;  %v58_v48 = vadd.f32 %v613_v2, %v35_v37  ;;  %vm73_vm12 = vcmp.ge.f32.partialorder %v57_v43, 0.0 }
   0xe   :  { %537 = vmatmul.mubr.msk.f32.gmra.mrb[2].mxu0 %vm131_vm1, %v110_v41  ;;  %v111_v46 = vsel %vm72_vm10, %v56_v32, %v95_v39  ;;  %vm80_vm11 = vcmp.ge.f32.partialorder %v64_v40, 0.0  ;;  %v103_v47 = vmul.f32 %v619_v4, %v64_v40  ;;  %v96_v51 = vmul.f32 %v619_v4, %v57_v43 }
   0xf   :  { %539 = vmatprep.mubr.msk.f32.mxu0 %vm131_vm1, %v111_v46  ;;  %vm81_vm13 = vcmp.ge.f32.partialorder %v65_v44, 0.0  ;;  %v104_v52 = vmul.f32 %v619_v4, %v65_v44  ;;  %vm74_vm14 = vcmp.ge.f32.partialorder %v58_v48, 0.0  ;;  %v97_v54 = vmul.f32 %v619_v4, %v58_v48 }
  0x10   :  { %549 = vmatmul.mubr.msk.f32.gmra.mrb[2].mxu1 %vm131_vm1, %v118_v42  ;;  %v119_v53 = vsel %vm80_vm11, %v64_v40, %v103_v47  ;;  %v66_v55 = vadd.f32 %v613_v2, %v43_v45  ;;  %v112_v56 = vsel %vm73_vm12, %v57_v43, %v96_v51  ;;  %v59_v58 = vadd.f32 %v613_v2, %v36_v49 }
  0x11   :  { %551 = vmatprep.mubr.msk.f32.mxu1 %vm131_vm1, %v119_v53  ;;  %v120_v57 = vsel %vm81_vm13, %v65_v44, %v104_v52  ;;  %v67_v59 = vadd.f32 %v613_v2, %v44_v50  ;;  %v113_v60 = vsel %vm74_vm14, %v58_v48, %v97_v54  ;;  %vm471_vm5 = vcmask 130048   ;;  %v387_v44 = vld [vmem:[%s895_s1 + $0x18] sm:$0xff] }
  0x12   :  { %540 = vmatmul.mubr.msk.f32.gmra.mrb[4].mxu0 %vm131_vm1, %v112_v56  ;;  %vm82_vm15 = vcmp.ge.f32.partialorder %v66_v55, 0.0  ;;  %v105_v61 = vmul.f32 %v619_v4, %v66_v55  ;;  %vm75_vm0 = vcmp.ge.f32.partialorder %v59_v58, 0.0  ;;  %v98_v62 = vmul.f32 %v619_v4, %v59_v58  ;;  %v395_v50 = vld [vmem:[%s895_s1 + $0x58] sm:$0xff] }
  0x13   :  { %542 = vmatprep.mubr.msk.f32.mxu0 %vm131_vm1, %v113_v60  ;;  %vm83_vm2 = vcmp.ge.f32.partialorder %v67_v59, 0.0  ;;  %v106_v63 = vmul.f32 %v619_v4, %v67_v59 }
  0x14   :  { %552 = vmatmul.mubr.msk.f32.gmra.mrb[4].mxu1 %vm131_vm1, %v120_v57  ;;  %v121_v0 = vsel %vm82_vm15, %v66_v55, %v105_v61  ;;  %v114_v1 = vsel %vm75_vm0, %v59_v58, %v98_v62 }
  0x15   :  { %554 = vmatprep.mubr.msk.f32.mxu1 %vm131_vm1, %v121_v0  ;;  %v122_v2 = vsel %vm83_vm2, %v67_v59, %v106_v63  ;;  %v386_v63 = vld [vmem:[%s895_s1 + $0x10] sm:$0xff] }
  0x16   :  { %543 = vmatmul.mubr.msk.f32.gmra.mrb[6].mxu0 %vm131_vm1, %v114_v1 }
  0x18   :  { %555 = vmatmul.mubr.msk.f32.gmra.mrb[6].mxu1 %vm131_vm1, %v122_v2 }
  0xdd   :  { %v535_v5 = vpop.f32.mrb[0].mxu0 }
  0xde   :  { %v256_v4 = vadd.f32 %v535_v5, %v716_v3  ;;  %v250_v8 = vpop.f32.mrb[1].mxu0 }
  0xdf   :  { %v547_v7 = vpop.f32.mrb[0].mxu1  ;;  %v251_v10 = vadd.f32 %v716_v3, %v250_v8 }
  0xe0   :  { %v296_v9 = vadd.f32 %v547_v7, %v716_v3  ;;  %v290_v11 = vpop.f32.mrb[1].mxu1  ;;  %vm330_vm1 = vcmp.ge.f32.partialorder %v256_v4, 0.0  ;;  %v353_v12 = vmul.f32 %v721_v6, %v256_v4 }
  0xe1   :  { %v291_v14 = vadd.f32 %v716_v3, %v290_v11  ;;  %vm329_vm4 = vcmp.ge.f32.partialorder %v251_v10, 0.0  ;;  %v352_v17 = vmul.f32 %v721_v6, %v251_v10  ;;  %v538_v23 = vpop.f32.mrb[2].mxu0 }
  0xe2   :  { %vm338_vm3 = vcmp.ge.f32.partialorder %v296_v9, 0.0  ;;  %v361_v15 = vmul.f32 %v721_v6, %v296_v9  ;;  %v369_v20 = vsel %vm330_vm1, %v256_v4, %v353_v12  ;;  %v266_v28 = vadd.f32 %v538_v23, %v716_v3  ;;  %v260_v29 = vpop.f32.mrb[3].mxu0  ;;  %v394_v4 = vld [vmem:[%s895_s1 + $0x50] sm:$0xff] }
  0xe3   :  { %vm337_vm6 = vcmp.ge.f32.partialorder %v291_v14, 0.0  ;;  %v360_v22 = vmul.f32 %v721_v6, %v291_v14  ;;  %v550_v24 = vpop.f32.mrb[2].mxu1  ;;  %v401_v25 = vadd.f32 %v385_v13, %v369_v20  ;;  %v368_v27 = vsel %vm329_vm4, %v251_v10, %v352_v17  ;;  %v389_v10 = vld [vmem:[%s895_s1 + $0x28] sm:$0xff] }
  0xe4   :  { %v377_v26 = vsel %vm338_vm3, %v296_v9, %v361_v15  ;;  %v300_v30 = vpop.f32.mrb[3].mxu1  ;;  %v400_v32 = vadd.f32 %v384_v18, %v368_v27  ;;  %v306_v34 = vadd.f32 %v550_v24, %v716_v3  ;;  %vm332_vm8 = vcmp.ge.f32.partialorder %v266_v28, 0.0  ;;  %v397_v18 = vld [vmem:[%s895_s1 + $0x68] sm:$0xff] }
  0xe5   :  { %v409_v31 = vadd.f32 %v393_v16, %v377_v26  ;;  %v376_v33 = vsel %vm337_vm6, %v291_v14, %v360_v22  ;;  %vm417_vm7 = vcmp.ge.f32.partialorder %v401_v25, 0.0  ;;  %v440_v35 = vmul.f32 %v745_v21, %v401_v25  ;;  %v541_v39 = vpop.f32.mrb[4].mxu0 }
  0xe6   :  { %v408_v36 = vadd.f32 %v392_v19, %v376_v33  ;;  %vm416_vm10 = vcmp.ge.f32.partialorder %v400_v32, 0.0  ;;  %v439_v38 = vmul.f32 %v745_v21, %v400_v32  ;;  %v355_v43 = vmul.f32 %v721_v6, %v266_v28  ;;  %v270_v45 = vpop.f32.mrb[5].mxu0 }
  0xe7   :  { %vm425_vm9 = vcmp.ge.f32.partialorder %v409_v31, 0.0  ;;  %v448_v37 = vmul.f32 %v745_v21, %v409_v31  ;;  %v553_v40 = vpop.f32.mrb[4].mxu1  ;;  %v456_v41 = vsel %vm417_vm7, %v401_v25, %v440_v35  ;;  %vm340_vm12 = vcmp.ge.f32.partialorder %v306_v34, 0.0  ;;  %v396_v35 = vld [vmem:[%s895_s1 + $0x60] sm:$0xff] }
  0xe8   :  { %vm424_vm11 = vcmp.ge.f32.partialorder %v408_v36, 0.0  ;;  %v447_v42 = vmul.f32 %v745_v21, %v408_v36  ;;  %v310_v46 = vpop.f32.mrb[5].mxu1  ;;  %473 = vst.msk [vmem:[%s897_s8 + $0x8] sm:$0xff] %vm471_vm5, %v456_v41  ;;  %v455_v48 = vsel %vm416_vm10, %v400_v32, %v439_v38  ;;  %v363_v49 = vmul.f32 %v721_v6, %v306_v34 }
  0xe9   :  { %v464_v47 = vsel %vm425_vm9, %v409_v31, %v448_v37  ;;  %472 = vst.msk [vmem:[%s897_s8] sm:$0xff] %vm471_vm5, %v455_v48  ;;  %v371_v52 = vsel %vm332_vm8, %v266_v28, %v355_v43  ;;  %v261_v53 = vadd.f32 %v716_v3, %v260_v29  ;;  %v301_v54 = vadd.f32 %v716_v3, %v300_v30  ;;  %v544_v59 = vpop.f32.mrb[6].mxu0  ;;  %v388_v31 = vld [vmem:[%s895_s1 + $0x20] sm:$0xff] }
  0xea   :  { %481 = vst.msk [vmem:[%s897_s8 + $0x48] sm:$0xff] %vm471_vm5, %v464_v47  ;;  %v463_v51 = vsel %vm424_vm11, %v408_v36, %v447_v42  ;;  %v403_v55 = vadd.f32 %v387_v44, %v371_v52  ;;  %v379_v56 = vsel %vm340_vm12, %v306_v34, %v363_v49  ;;  %v276_v57 = vadd.f32 %v541_v39, %v716_v3  ;;  %v280_v0 = vpop.f32.mrb[7].mxu0  ;;  %v390_v52 = vld [vmem:[%s895_s1 + $0x30] sm:$0xff] }
  0xeb   :  { %480 = vst.msk [vmem:[%s897_s8 + $0x40] sm:$0xff] %vm471_vm5, %v463_v51  ;;  %v316_v58 = vadd.f32 %v553_v40, %v716_v3  ;;  %v556_v60 = vpop.f32.mrb[6].mxu1  ;;  %v411_v61 = vadd.f32 %v395_v50, %v379_v56  ;;  %vm331_vm13 = vcmp.ge.f32.partialorder %v261_v53, 0.0  ;;  %v354_v62 = vmul.f32 %v721_v6, %v261_v53 }
  0xec   :  { %vm339_vm14 = vcmp.ge.f32.partialorder %v301_v54, 0.0  ;;  %v320_v1 = vpop.f32.mrb[7].mxu1  ;;  %vm419_vm15 = vcmp.ge.f32.partialorder %v403_v55, 0.0  ;;  %v442_v2 = vmul.f32 %v745_v21, %v403_v55  ;;  %v362_v5 = vmul.f32 %v721_v6, %v301_v54 }
  0xed   :  { %vm334_vm0 = vcmp.ge.f32.partialorder %v276_v57, 0.0  ;;  %vm427_vm2 = vcmp.ge.f32.partialorder %v411_v61, 0.0  ;;  %v450_v7 = vmul.f32 %v745_v21, %v411_v61  ;;  %v370_v8 = vsel %vm331_vm13, %v261_v53, %v354_v62 }
  0xee   :  { %v357_v9 = vmul.f32 %v721_v6, %v276_v57  ;;  %v458_v11 = vsel %vm419_vm15, %v403_v55, %v442_v2  ;;  %v402_v12 = vadd.f32 %v386_v63, %v370_v8  ;;  %v378_v13 = vsel %vm339_vm14, %v301_v54, %v362_v5 }
  0xef   :  { %vm342_vm1 = vcmp.ge.f32.partialorder %v316_v58, 0.0  ;;  %475 = vst.msk [vmem:[%s897_s8 + $0x18] sm:$0xff] %vm471_vm5, %v458_v11  ;;  %v466_v14 = vsel %vm427_vm2, %v411_v61, %v450_v7  ;;  %v410_v15 = vadd.f32 %v394_v4, %v378_v13  ;;  %v365_v17 = vmul.f32 %v721_v6, %v316_v58 }
  0xf0   :  { %v373_v16 = vsel %vm334_vm0, %v276_v57, %v357_v9  ;;  %483 = vst.msk [vmem:[%s897_s8 + $0x58] sm:$0xff] %vm471_vm5, %v466_v14  ;;  %vm418_vm3 = vcmp.ge.f32.partialorder %v402_v12, 0.0  ;;  %v441_v19 = vmul.f32 %v745_v21, %v402_v12  ;;  %v271_v22 = vadd.f32 %v716_v3, %v270_v45 }
  0xf1   :  { %v405_v20 = vadd.f32 %v389_v10, %v373_v16  ;;  %vm426_vm4 = vcmp.ge.f32.partialorder %v410_v15, 0.0  ;;  %v449_v23 = vmul.f32 %v745_v21, %v410_v15  ;;  %v381_v24 = vsel %vm342_vm1, %v316_v58, %v365_v17 }
  0xf2   :  { %v311_v25 = vadd.f32 %v716_v3, %v310_v46  ;;  %v457_v26 = vsel %vm418_vm3, %v402_v12, %v441_v19  ;;  %v413_v28 = vadd.f32 %v397_v18, %v381_v24  ;;  %vm333_vm7 = vcmp.ge.f32.partialorder %v271_v22, 0.0  ;;  %v391_v46 = vld [vmem:[%s895_s1 + $0x38] sm:$0xff] }
  0xf3   :  { %vm421_vm6 = vcmp.ge.f32.partialorder %v405_v20, 0.0  ;;  %v444_v27 = vmul.f32 %v745_v21, %v405_v20  ;;  %474 = vst.msk [vmem:[%s897_s8 + $0x10] sm:$0xff] %vm471_vm5, %v457_v26  ;;  %v465_v29 = vsel %vm426_vm4, %v410_v15, %v449_v23  ;;  %v356_v30 = vmul.f32 %v721_v6, %v271_v22 }
  0xf4   :  { %vm341_vm8 = vcmp.ge.f32.partialorder %v311_v25, 0.0  ;;  %482 = vst.msk [vmem:[%s897_s8 + $0x50] sm:$0xff] %vm471_vm5, %v465_v29  ;;  %vm429_vm9 = vcmp.ge.f32.partialorder %v413_v28, 0.0  ;;  %v452_v33 = vmul.f32 %v745_v21, %v413_v28  ;;  %v364_v34 = vmul.f32 %v721_v6, %v311_v25 }
  0xf5   :  { %v460_v32 = vsel %vm421_vm6, %v405_v20, %v444_v27  ;;  %v372_v36 = vsel %vm333_vm7, %v271_v22, %v356_v30  ;;  %v286_v37 = vadd.f32 %v544_v59, %v716_v3  ;;  %v326_v38 = vadd.f32 %v556_v60, %v716_v3  ;;  %v398_v60 = vld [vmem:[%s895_s1 + $0x70] sm:$0xff] }
  0xf6   :  { %477 = vst.msk [vmem:[%s897_s8 + $0x28] sm:$0xff] %vm471_vm5, %v460_v32  ;;  %v281_v39 = vadd.f32 %v716_v3, %v280_v0  ;;  %v468_v40 = vsel %vm429_vm9, %v413_v28, %v452_v33  ;;  %v404_v41 = vadd.f32 %v388_v31, %v372_v36  ;;  %v380_v42 = vsel %vm341_vm8, %v311_v25, %v364_v34 }
  0xf7   :  { %v321_v43 = vadd.f32 %v716_v3, %v320_v1  ;;  %485 = vst.msk [vmem:[%s897_s8 + $0x68] sm:$0xff] %vm471_vm5, %v468_v40  ;;  %v412_v44 = vadd.f32 %v396_v35, %v380_v42  ;;  %vm336_vm10 = vcmp.ge.f32.partialorder %v286_v37, 0.0  ;;  %v359_v45 = vmul.f32 %v721_v6, %v286_v37  ;;  %v399_v3 = vld [vmem:[%s895_s1 + $0x78] sm:$0xff] }
  0xf8   :  { %vm344_vm11 = vcmp.ge.f32.partialorder %v326_v38, 0.0  ;;  %vm420_vm12 = vcmp.ge.f32.partialorder %v404_v41, 0.0  ;;  %v443_v47 = vmul.f32 %v745_v21, %v404_v41  ;;  %v367_v48 = vmul.f32 %v721_v6, %v326_v38 }
  0xf9   :  { %vm335_vm13 = vcmp.ge.f32.partialorder %v281_v39, 0.0  ;;  %vm428_vm14 = vcmp.ge.f32.partialorder %v412_v44, 0.0  ;;  %v451_v49 = vmul.f32 %v745_v21, %v412_v44  ;;  %v375_v50 = vsel %vm336_vm10, %v286_v37, %v359_v45 }
  0xfa   :  { %v358_v51 = vmul.f32 %v721_v6, %v281_v39  ;;  %v459_v53 = vsel %vm420_vm12, %v404_v41, %v443_v47  ;;  %v407_v54 = vadd.f32 %v391_v46, %v375_v50  ;;  %v383_v55 = vsel %vm344_vm11, %v326_v38, %v367_v48 }
  0xfb   :  { %vm343_vm15 = vcmp.ge.f32.partialorder %v321_v43, 0.0  ;;  %476 = vst.msk [vmem:[%s897_s8 + $0x20] sm:$0xff] %vm471_vm5, %v459_v53  ;;  %v467_v56 = vsel %vm428_vm14, %v412_v44, %v451_v49  ;;  %v415_v57 = vadd.f32 %v399_v3, %v383_v55  ;;  %v366_v59 = vmul.f32 %v721_v6, %v321_v43 }
  0xfc   :  { %v374_v58 = vsel %vm335_vm13, %v281_v39, %v358_v51  ;;  %484 = vst.msk [vmem:[%s897_s8 + $0x60] sm:$0xff] %vm471_vm5, %v467_v56  ;;  %vm423_vm0 = vcmp.ge.f32.partialorder %v407_v54, 0.0  ;;  %v446_v61 = vmul.f32 %v745_v21, %v407_v54 }
  0xfd   :  { %v406_v62 = vadd.f32 %v390_v52, %v374_v58  ;;  %vm431_vm2 = vcmp.ge.f32.partialorder %v415_v57, 0.0  ;;  %v454_v63 = vmul.f32 %v745_v21, %v415_v57  ;;  %v382_v0 = vsel %vm343_vm15, %v321_v43, %v366_v59 }
  0xfe   :  { %v462_v1 = vsel %vm423_vm0, %v407_v54, %v446_v61  ;;  %v414_v2 = vadd.f32 %v398_v60, %v382_v0 }
  0xff   :  { %vm422_vm1 = vcmp.ge.f32.partialorder %v406_v62, 0.0  ;;  %v445_v6 = vmul.f32 %v745_v21, %v406_v62  ;;  %479 = vst.msk [vmem:[%s897_s8 + $0x38] sm:$0xff] %vm471_vm5, %v462_v1  ;;  %v470_v5 = vsel %vm431_vm2, %v415_v57, %v454_v63 }
 0x100   :  { %487 = vst.msk [vmem:[%s897_s8 + $0x78] sm:$0xff] %vm471_vm5, %v470_v5  ;;  %vm430_vm3 = vcmp.ge.f32.partialorder %v414_v2, 0.0  ;;  %v453_v7 = vmul.f32 %v745_v21, %v414_v2 }
 0x101   :  { %v461_v4 = vsel %vm422_vm1, %v406_v62, %v445_v6 }
 0x102   :  { %478 = vst.msk [vmem:[%s897_s8 + $0x30] sm:$0xff] %vm471_vm5, %v461_v4  ;;  %v469_v8 = vsel %vm430_vm3, %v414_v2, %v453_v7 }
 0x103   :  { %486 = vst.msk [vmem:[%s897_s8 + $0x70] sm:$0xff] %vm471_vm5, %v469_v8 }

</bundles_post_ra>
